<compile_context>
chip_gen: v7x
topology: tpu7x:2x2x1
jax: 0.10.0
libtpu: 0.0.40
codegen_flags: <defaults>
</compile_context>

<pallas_src>
import functools

import jax
import jax.numpy as jnp
from jax.experimental import pallas as pl
from jax.experimental.pallas import tpu as pltpu


def _round_up(x: int, m: int) -> int:
    return (x + m - 1) // m * m


def _cdiv(a: int, b: int) -> int:
    return -(-a // b)


def _elu(x):
    # ELU with alpha=1 (matches F.elu defaults); safe exp on the negative branch.
    return jnp.where(x > 0, x, jnp.exp(jnp.minimum(x, 0.0)) - 1.0)


def _low_frequency_kernel(
    x_ref,
    g0w_ref, g0b_ref, g1w_ref, g1b_ref, g2w_ref, g2b_ref,
    w1_ref, b1_ref, w2_ref, b2_ref, w3_ref, b3_ref, w4_ref, b4_ref, sel_ref,
    out_ref, gate_ref,
    *, n_out,
):
    x = x_ref[...]                                         # (TB, K_PAD) f32
    tb = x.shape[0]
    bf16 = jnp.bfloat16

    # ---- gating network: bf16 MXU matmuls, f32 accumulation / ELU / softmax.
    g = _elu(jnp.dot(x.astype(bf16), g0w_ref[...],
                     preferred_element_type=jnp.float32) + g0b_ref[...])
    g = _elu(jnp.dot(g.astype(bf16), g1w_ref[...],
                     preferred_element_type=jnp.float32) + g1b_ref[...])
    logits = jnp.dot(g.astype(bf16), g2w_ref[...],
                     preferred_element_type=jnp.float32) + g2b_ref[...]
    # padded logit lanes carry a -1e30 bias, so they vanish in the softmax
    logits = logits - jnp.max(logits, axis=-1, keepdims=True)
    e = jnp.exp(logits)
    gate = e / jnp.sum(e, axis=-1, keepdims=True)          # exact normalization
    gate_ref[...] = gate                                   # (TB, G_PAD); lanes >= 3 are 0

    hdim = w2_ref.shape[0]                                 # 512
    # hoist the three gate lane-broadcasts once (JAX does not CSE broadcast_in_dim)
    gb0 = jnp.broadcast_to(gate[:, 0:1], (tb, hdim))
    gb1 = jnp.broadcast_to(gate[:, 1:2], (tb, hdim))
    gb2 = jnp.broadcast_to(gate[:, 2:3], (tb, hdim))

    def moe3(a, w_ref, b_ref):
        # fused 3-expert matmul: (TB, K) @ (K, 3*h) -> (TB, 3*h), then gate-combine
        y = jnp.dot(a.astype(bf16), w_ref[...],
                    preferred_element_type=jnp.float32) + b_ref[...]
        return (y[:, 0:hdim] * gb0
                + y[:, hdim:2 * hdim] * gb1
                + y[:, 2 * hdim:3 * hdim] * gb2)

    a = jnp.maximum(moe3(x, w1_ref, b1_ref), 0.0)
    a = jnp.maximum(moe3(a, w2_ref, b2_ref), 0.0)
    a = jnp.maximum(moe3(a, w3_ref, b3_ref), 0.0)

    # ---- layer 4: 3 experts packed in ONE 128-lane slab at offsets 0/n/2n.
    y4 = jnp.dot(a.astype(bf16), w4_ref[...],
                 preferred_element_type=jnp.float32) + b4_ref[...]   # (TB, N4S)
    n4s = y4.shape[-1]
    lane = jax.lax.broadcasted_iota(jnp.int32, (tb, n4s), 1)
    gate_slab = jnp.where(lane < n_out, gate[:, 0:1],
                jnp.where(lane < 2 * n_out, gate[:, 1:2],
                jnp.where(lane < 3 * n_out, gate[:, 2:3], 0.0)))
    z = (y4 * gate_slab).astype(bf16)
    # constant selector sums the 3 gated expert groups into lanes [0, n_out)
    out_ref[...] = jnp.dot(z, sel_ref[...], preferred_element_type=jnp.float32)


def make_params(featureDim: int, latentDim: int, key):
    """Deterministic init mimicking nn.Linear's uniform(-1/sqrt(fan_in)), then
    padded / fused / pre-transposed for the kernel."""
    n_input = featureDim * 2 + latentDim
    n_output = latentDim
    hg, h = 32, 512

    K_PAD = _round_up(n_input, 128)
    HG_PAD = _round_up(hg, 128)
    G_PAD = 128                              # padded gate-logit width (>= 3)
    N4S = _round_up(3 * n_output, 128)       # layer-4 single-slab width
    N4O = _round_up(n_output, 128)           # final output pad width

    def linear(k, fin, fout):
        kw, kb = jax.random.split(k)
        bound = 1.0 / jnp.sqrt(jnp.float32(fin))
        w = jax.random.uniform(kw, (fin, fout), jnp.float32, -bound, bound)
        b = jax.random.uniform(kb, (1, fout), jnp.float32, -bound, bound)
        return w, b

    def pad2(a, rows, cols):
        return jnp.pad(a, ((0, rows - a.shape[0]), (0, cols - a.shape[1])))

    keys = jax.random.split(key, 15)

    g0w, g0b = linear(keys[0], n_input, hg)
    g1w, g1b = linear(keys[1], hg, hg)
    g2w, g2b = linear(keys[2], hg, 3)

    # gating weights in bf16 (fast MXU path); biases stay f32
    g0w = pad2(g0w, K_PAD, HG_PAD).astype(jnp.bfloat16)
    g0b = pad2(g0b, 1, HG_PAD)
    g1w = pad2(g1w, HG_PAD, HG_PAD).astype(jnp.bfloat16)
    g1b = pad2(g1b, 1, HG_PAD)
    g2w = pad2(g2w, HG_PAD, G_PAD).astype(jnp.bfloat16)
    # padded logit lanes get a very negative bias so the softmax ignores them
    g2b = jnp.concatenate(
        [g2b, jnp.full((1, G_PAD - 3), -1e30, jnp.float32)], axis=-1)

    def fused3(ks, fin, fout, fin_pad):
        ws, bs = [], []
        for k in ks:
            w, b = linear(k, fin, fout)
            ws.append(pad2(w, fin_pad, fout))
            bs.append(pad2(b, 1, fout))
        # fused (in, 3*out) weight in bf16; bias stays f32 (added after f32 accumulation)
        return (jnp.concatenate(ws, axis=-1).astype(jnp.bfloat16),
                jnp.concatenate(bs, axis=-1))

    w1, b1 = fused3(keys[3:6], n_input, h, K_PAD)
    w2, b2 = fused3(keys[6:9], h, h, h)
    w3, b3 = fused3(keys[9:12], h, h, h)

    # layer 4: all 3 experts' real outputs packed into a single N4S-lane slab
    w4 = jnp.zeros((h, N4S), jnp.float32)
    b4 = jnp.zeros((1, N4S), jnp.float32)
    for e, k in enumerate(keys[12:15]):
        w, b = linear(k, h, n_output)
        w4 = w4.at[:, e * n_output:(e + 1) * n_output].set(w)
        b4 = b4.at[:, e * n_output:(e + 1) * n_output].set(b)
    w4 = w4.astype(jnp.bfloat16)

    # constant lane-combine selector: sums gated groups 0/1/2 into lanes [0, n_output)
    sel = jnp.zeros((N4S, N4O), jnp.float32)
    eye = jnp.eye(n_output, dtype=jnp.float32)
    for e in range(3):
        sel = sel.at[e * n_output:(e + 1) * n_output, :n_output].set(eye)
    sel = sel.astype(jnp.bfloat16)

    return dict(
        g0w=g0w, g0b=g0b, g1w=g1w, g1b=g1b, g2w=g2w, g2b=g2b,
        w1=w1, b1=b1, w2=w2, b2=b2, w3=w3, b3=b3, w4=w4, b4=b4, sel=sel,
        n_output=n_output,
    )


def low_frequency_forward(params, feature_1, feature_2, latent_last, *, max_tb=1024):
    """Inference-mode forward (training dropout branches skipped)."""
    # TODO(synk): `norm_feature` is not defined in the reference source; treated as identity here.
    f32 = jnp.float32
    B = feature_1.shape[0]
    n_in = feature_1.shape[-1] + feature_2.shape[-1] + latent_last.shape[-1]
    n_output = params["n_output"]

    K_PAD = params["w1"].shape[0]
    N4O = params["sel"].shape[1]
    G_PAD = params["g2w"].shape[1]

    # Batch tiling: big tiles to amortize per-step overhead, but always >= 2
    # grid steps when the batch allows it so both v7x TensorCores get work.
    B8 = _round_up(max(B, 1), 8)
    if B8 <= 8:
        nsteps, TB = 1, B8
    else:
        nsteps = max(2, _cdiv(B8, max_tb))
        TB = _round_up(_cdiv(B8, nsteps), 8)
    B_pad = TB * nsteps

    # Build padded x in one shot (no concat-then-rewrite of the whole array).
    x = jnp.concatenate(
        [feature_1.astype(f32), feature_2.astype(f32), latent_last.astype(f32),
         jnp.zeros((B, K_PAD - n_in), f32)], axis=-1)
    if B_pad > B:
        x = jnp.concatenate([x, jnp.zeros((B_pad - B, K_PAD), f32)], axis=0)

    arg_names = ["g0w", "g0b", "g1w", "g1b", "g2w", "g2b",
                 "w1", "b1", "w2", "b2", "w3", "b3", "w4", "b4", "sel"]
    args = [params[n] for n in arg_names]

    # weights/biases: full-array blocks with a constant index_map -> fetched once, resident
    weight_specs = [pl.BlockSpec(a.shape, lambda i: (0, 0)) for a in args]

    kernel = functools.partial(_low_frequency_kernel, n_out=n_output)

    out_pad, gate_pad = pl.pallas_call(
        kernel,
        grid=(nsteps,),
        out_shape=(
            jax.ShapeDtypeStruct((B_pad, N4O), jnp.float32),
            jax.ShapeDtypeStruct((B_pad, G_PAD), jnp.float32),
        ),
        in_specs=[pl.BlockSpec((TB, K_PAD), lambda i: (i, 0))] + weight_specs,
        out_specs=(
            pl.BlockSpec((TB, N4O), lambda i: (i, 0)),
            pl.BlockSpec((TB, G_PAD), lambda i: (i, 0)),
        ),
        compiler_params=pltpu.CompilerParams(
            dimension_semantics=("parallel",),
            vmem_limit_bytes=48 << 20,
        ),
    )(x, *args)

    out = out_pad[:B, :n_output]
    # PyTorch returns Gate after .unsqueeze(-2): shape (..., 1, 3)
    gate = gate_pad[:B, :3].reshape(B, 1, 3)
    return out, gate


def _reference_forward(params, feature_1, feature_2, latent_last):
    """Pure-JAX reference using the same (padded/fused) params, all-f32 math."""
    f32 = jnp.float32
    x = jnp.concatenate([feature_1, feature_2, latent_last], axis=-1).astype(f32)
    K_PAD = params["w1"].shape[0]
    x = jnp.pad(x, ((0, 0), (0, K_PAD - x.shape[-1])))
    n = params["n_output"]

    g = _elu(x @ params["g0w"].astype(f32) + params["g0b"])
    g = _elu(g @ params["g1w"].astype(f32) + params["g1b"])
    gate = jax.nn.softmax(g @ params["g2w"].astype(f32) + params["g2b"], axis=-1)[:, :3]

    def moe3(a, w, b):
        hh = w.shape[1] // 3
        y = a @ w.astype(f32) + b
        return (y[:, 0:hh] * gate[:, 0:1]
                + y[:, hh:2 * hh] * gate[:, 1:2]
                + y[:, 2 * hh:3 * hh] * gate[:, 2:3])

    a = jnp.maximum(moe3(x, params["w1"], params["b1"]), 0.0)
    a = jnp.maximum(moe3(a, params["w2"], params["b2"]), 0.0)
    a = jnp.maximum(moe3(a, params["w3"], params["b3"]), 0.0)

    y4 = a @ params["w4"].astype(f32) + params["b4"]
    out = (y4[:, 0:n] * gate[:, 0:1]
           + y4[:, n:2 * n] * gate[:, 1:2]
           + y4[:, 2 * n:3 * n] * gate[:, 2:3])
    return out, gate.reshape(gate.shape[0], 1, 3)


if __name__ == "__main__":
    featureDim = 16
    latentDim = 8

    key = jax.random.PRNGKey(0)
    k_par, k_f1, k_f2, k_lat = jax.random.split(key, 4)
    params = make_params(featureDim, latentDim, k_par)

    def run_and_check(B, kf1, kf2, klat):
        feature_1 = jax.random.normal(kf1, (B, featureDim), jnp.float32)
        feature_2 = jax.random.normal(kf2, (B, featureDim), jnp.float32)
        latent_last = jax.random.normal(klat, (B, latentDim), jnp.float32)

        out, gate = low_frequency_forward(params, feature_1, feature_2, latent_last)
        jax.block_until_ready((out, gate))

        assert out.shape == (B, latentDim)
        assert gate.shape == (B, 1, 3)

        # sanity check against all-f32 pure-JAX reference (kernel uses bf16
        # operands on the MXU -> loose tolerances)
        out_ref, gate_ref = _reference_forward(params, feature_1, feature_2, latent_last)
        assert jnp.allclose(gate, gate_ref, rtol=2e-2, atol=2e-2)
        assert jnp.allclose(out, out_ref, rtol=5e-2, atol=5e-2)

    # small batch (single grid step)
    run_and_check(2, k_f1, k_f2, k_lat)
    # slightly larger batch to exercise the multi-step / padded-row path
    k2 = jax.random.split(jax.random.PRNGKey(1), 3)
    run_and_check(20, k2[0], k2[1], k2[2])

    print("KERNEL_OK")
</pallas_src>

<mosaic_0001>
module attributes {stable_mosaic.version = 11 : i64} {
  func.func @_low_frequency_kernel(%arg0: i32, %arg1: memref<8x128xf32, #tpu.memory_space<vmem>>, %arg2: memref<128x128xbf16, #tpu.memory_space<vmem>>, %arg3: memref<1x128xf32, #tpu.memory_space<vmem>>, %arg4: memref<128x128xbf16, #tpu.memory_space<vmem>>, %arg5: memref<1x128xf32, #tpu.memory_space<vmem>>, %arg6: memref<128x128xbf16, #tpu.memory_space<vmem>>, %arg7: memref<1x128xf32, #tpu.memory_space<vmem>>, %arg8: memref<128x1536xbf16, #tpu.memory_space<vmem>>, %arg9: memref<1x1536xf32, #tpu.memory_space<vmem>>, %arg10: memref<512x1536xbf16, #tpu.memory_space<vmem>>, %arg11: memref<1x1536xf32, #tpu.memory_space<vmem>>, %arg12: memref<512x1536xbf16, #tpu.memory_space<vmem>>, %arg13: memref<1x1536xf32, #tpu.memory_space<vmem>>, %arg14: memref<512x128xbf16, #tpu.memory_space<vmem>>, %arg15: memref<1x128xf32, #tpu.memory_space<vmem>>, %arg16: memref<128x128xbf16, #tpu.memory_space<vmem>>, %arg17: memref<8x128xf32, #tpu.memory_space<vmem>>, %arg18: memref<8x128xf32, #tpu.memory_space<vmem>>) attributes {dimension_semantics = [#tpu.dimension_semantics<parallel>], iteration_bounds = array<i64: 1>, scalar_prefetch = 0 : i64, scratch_operands = 0 : i64, tpu.core_type = #tpu.core_type<tc>, window_params = [{transform_indices = @transform_0, window_bounds = array<i64: 8, 128>}, {pipeline_mode = #tpu.pipeline_mode<synchronous>, transform_indices = @transform_1, window_bounds = array<i64: 128, 128>}, {pipeline_mode = #tpu.pipeline_mode<synchronous>, transform_indices = @transform_2, window_bounds = array<i64: 1, 128>}, {pipeline_mode = #tpu.pipeline_mode<synchronous>, transform_indices = @transform_3, window_bounds = array<i64: 128, 128>}, {pipeline_mode = #tpu.pipeline_mode<synchronous>, transform_indices = @transform_4, window_bounds = array<i64: 1, 128>}, {pipeline_mode = #tpu.pipeline_mode<synchronous>, transform_indices = @transform_5, window_bounds = array<i64: 128, 128>}, {pipeline_mode = #tpu.pipeline_mode<synchronous>, transform_indices = @transform_6, window_bounds = array<i64: 1, 128>}, {pipeline_mode = #tpu.pipeline_mode<synchronous>, transform_indices = @transform_7, window_bounds = array<i64: 128, 1536>}, {pipeline_mode = #tpu.pipeline_mode<synchronous>, transform_indices = @transform_8, window_bounds = array<i64: 1, 1536>}, {pipeline_mode = #tpu.pipeline_mode<synchronous>, transform_indices = @transform_9, window_bounds = array<i64: 512, 1536>}, {pipeline_mode = #tpu.pipeline_mode<synchronous>, transform_indices = @transform_10, window_bounds = array<i64: 1, 1536>}, {pipeline_mode = #tpu.pipeline_mode<synchronous>, transform_indices = @transform_11, window_bounds = array<i64: 512, 1536>}, {pipeline_mode = #tpu.pipeline_mode<synchronous>, transform_indices = @transform_12, window_bounds = array<i64: 1, 1536>}, {pipeline_mode = #tpu.pipeline_mode<synchronous>, transform_indices = @transform_13, window_bounds = array<i64: 512, 128>}, {pipeline_mode = #tpu.pipeline_mode<synchronous>, transform_indices = @transform_14, window_bounds = array<i64: 1, 128>}, {pipeline_mode = #tpu.pipeline_mode<synchronous>, transform_indices = @transform_15, window_bounds = array<i64: 128, 128>}, {transform_indices = @transform_16, window_bounds = array<i64: 8, 128>}, {transform_indices = @transform_17, window_bounds = array<i64: 8, 128>}]} {
    %c0 = arith.constant 0 : index
    %c0_0 = arith.constant 0 : index
    %0 = vector.load %arg1[%c0, %c0_0] : memref<8x128xf32, #tpu.memory_space<vmem>>, vector<8x128xf32>
    %1 = arith.truncf %0 : vector<8x128xf32> to vector<8x128xbf16>
    %c0_1 = arith.constant 0 : index
    %c0_2 = arith.constant 0 : index
    %2 = vector.load %arg2[%c0_1, %c0_2] : memref<128x128xbf16, #tpu.memory_space<vmem>>, vector<128x128xbf16>
    %cst = arith.constant dense<0.000000e+00> : vector<8x128xf32>
    %3 = tpu.matmul %1, %2, %cst {dimension_numbers = #tpu.dot_dimension_numbers<[1], [0], [0], [1], [0, 0, 1, 1], [], []>} : vector<8x128xbf16>, vector<128x128xbf16>, vector<8x128xf32> -> vector<8x128xf32>
    %c0_3 = arith.constant 0 : index
    %c0_4 = arith.constant 0 : index
    %4 = vector.load %arg3[%c0_3, %c0_4] : memref<1x128xf32, #tpu.memory_space<vmem>>, vector<1x128xf32>
    %5 = vector.broadcast %4 : vector<1x128xf32> to vector<8x128xf32>
    %6 = arith.addf %3, %5 : vector<8x128xf32>
    %cst_5 = arith.constant 0.000000e+00 : f32
    %7 = vector.broadcast %cst_5 : f32 to vector<8x128xf32>
    %8 = arith.cmpf ogt, %6, %7 : vector<8x128xf32>
    %cst_6 = arith.constant 0.000000e+00 : f32
    %9 = vector.broadcast %cst_6 : f32 to vector<8x128xf32>
    %10 = arith.minimumf %6, %9 : vector<8x128xf32>
    %11 = math.exp %10 : vector<8x128xf32>
    %cst_7 = arith.constant 1.000000e+00 : f32
    %12 = vector.broadcast %cst_7 : f32 to vector<8x128xf32>
    %13 = arith.subf %11, %12 : vector<8x128xf32>
    %14 = arith.select %8, %6, %13 : vector<8x128xi1>, vector<8x128xf32>
    %15 = arith.truncf %14 : vector<8x128xf32> to vector<8x128xbf16>
    %c0_8 = arith.constant 0 : index
    %c0_9 = arith.constant 0 : index
    %16 = vector.load %arg4[%c0_8, %c0_9] : memref<128x128xbf16, #tpu.memory_space<vmem>>, vector<128x128xbf16>
    %cst_10 = arith.constant dense<0.000000e+00> : vector<8x128xf32>
    %17 = tpu.matmul %15, %16, %cst_10 {dimension_numbers = #tpu.dot_dimension_numbers<[1], [0], [0], [1], [0, 0, 1, 1], [], []>} : vector<8x128xbf16>, vector<128x128xbf16>, vector<8x128xf32> -> vector<8x128xf32>
    %c0_11 = arith.constant 0 : index
    %c0_12 = arith.constant 0 : index
    %18 = vector.load %arg5[%c0_11, %c0_12] : memref<1x128xf32, #tpu.memory_space<vmem>>, vector<1x128xf32>
    %19 = vector.broadcast %18 : vector<1x128xf32> to vector<8x128xf32>
    %20 = arith.addf %17, %19 : vector<8x128xf32>
    %cst_13 = arith.constant 0.000000e+00 : f32
    %21 = vector.broadcast %cst_13 : f32 to vector<8x128xf32>
    %22 = arith.cmpf ogt, %20, %21 : vector<8x128xf32>
    %cst_14 = arith.constant 0.000000e+00 : f32
    %23 = vector.broadcast %cst_14 : f32 to vector<8x128xf32>
    %24 = arith.minimumf %20, %23 : vector<8x128xf32>
    %25 = math.exp %24 : vector<8x128xf32>
    %cst_15 = arith.constant 1.000000e+00 : f32
    %26 = vector.broadcast %cst_15 : f32 to vector<8x128xf32>
    %27 = arith.subf %25, %26 : vector<8x128xf32>
    %28 = arith.select %22, %20, %27 : vector<8x128xi1>, vector<8x128xf32>
    %29 = arith.truncf %28 : vector<8x128xf32> to vector<8x128xbf16>
    %c0_16 = arith.constant 0 : index
    %c0_17 = arith.constant 0 : index
    %30 = vector.load %arg6[%c0_16, %c0_17] : memref<128x128xbf16, #tpu.memory_space<vmem>>, vector<128x128xbf16>
    %cst_18 = arith.constant dense<0.000000e+00> : vector<8x128xf32>
    %31 = tpu.matmul %29, %30, %cst_18 {dimension_numbers = #tpu.dot_dimension_numbers<[1], [0], [0], [1], [0, 0, 1, 1], [], []>} : vector<8x128xbf16>, vector<128x128xbf16>, vector<8x128xf32> -> vector<8x128xf32>
    %c0_19 = arith.constant 0 : index
    %c0_20 = arith.constant 0 : index
    %32 = vector.load %arg7[%c0_19, %c0_20] : memref<1x128xf32, #tpu.memory_space<vmem>>, vector<1x128xf32>
    %33 = vector.broadcast %32 : vector<1x128xf32> to vector<8x128xf32>
    %34 = arith.addf %31, %33 : vector<8x128xf32>
    %cst_21 = arith.constant dense<0xFF800000> : vector<8xf32>
    %35 = vector.multi_reduction <maximumf>, %34, %cst_21 [1] : vector<8x128xf32> to vector<8xf32>
    %36 = vector.shape_cast %35 : vector<8xf32> to vector<8x1xf32>
    %37 = vector.broadcast %36 : vector<8x1xf32> to vector<8x128xf32>
    %38 = arith.subf %34, %37 : vector<8x128xf32>
    %39 = math.exp %38 : vector<8x128xf32>
    %cst_22 = arith.constant dense<0.000000e+00> : vector<8xf32>
    %40 = vector.multi_reduction <add>, %39, %cst_22 [1] : vector<8x128xf32> to vector<8xf32>
    %41 = vector.shape_cast %40 : vector<8xf32> to vector<8x1xf32>
    %42 = vector.broadcast %41 : vector<8x1xf32> to vector<8x128xf32>
    %43 = arith.divf %39, %42 : vector<8x128xf32>
    %c0_23 = arith.constant 0 : index
    %c0_24 = arith.constant 0 : index
    %44 = vector.load %arg18[%c0_23, %c0_24] : memref<8x128xf32, #tpu.memory_space<vmem>>, vector<8x128xf32>
    tpu.vector_store %arg18[%c0_23, %c0_24], %43 {strides = array<i32>} : memref<8x128xf32, #tpu.memory_space<vmem>>, vector<8x128xf32>,
    %45 = vector.extract_strided_slice %43 {offsets = [0, 0], sizes = [8, 1], strides = [1, 1]} : vector<8x128xf32> to vector<8x1xf32>
    %46 = vector.shape_cast %45 : vector<8x1xf32> to vector<8x1xf32>
    %47 = vector.broadcast %46 : vector<8x1xf32> to vector<8x512xf32>
    %48 = vector.extract_strided_slice %43 {offsets = [0, 1], sizes = [8, 1], strides = [1, 1]} : vector<8x128xf32> to vector<8x1xf32>
    %49 = vector.shape_cast %48 : vector<8x1xf32> to vector<8x1xf32>
    %50 = vector.broadcast %49 : vector<8x1xf32> to vector<8x512xf32>
    %51 = vector.extract_strided_slice %43 {offsets = [0, 2], sizes = [8, 1], strides = [1, 1]} : vector<8x128xf32> to vector<8x1xf32>
    %52 = vector.shape_cast %51 : vector<8x1xf32> to vector<8x1xf32>
    %53 = vector.broadcast %52 : vector<8x1xf32> to vector<8x512xf32>
    %54 = arith.truncf %0 : vector<8x128xf32> to vector<8x128xbf16>
    %c0_25 = arith.constant 0 : index
    %c0_26 = arith.constant 0 : index
    %55 = vector.load %arg8[%c0_25, %c0_26] : memref<128x1536xbf16, #tpu.memory_space<vmem>>, vector<128x1536xbf16>
    %cst_27 = arith.constant dense<0.000000e+00> : vector<8x1536xf32>
    %56 = tpu.matmul %54, %55, %cst_27 {dimension_numbers = #tpu.dot_dimension_numbers<[1], [0], [0], [1], [0, 0, 1, 1], [], []>} : vector<8x128xbf16>, vector<128x1536xbf16>, vector<8x1536xf32> -> vector<8x1536xf32>
    %c0_28 = arith.constant 0 : index
    %c0_29 = arith.constant 0 : index
    %57 = vector.load %arg9[%c0_28, %c0_29] : memref<1x1536xf32, #tpu.memory_space<vmem>>, vector<1x1536xf32>
    %58 = vector.broadcast %57 : vector<1x1536xf32> to vector<8x1536xf32>
    %59 = arith.addf %56, %58 : vector<8x1536xf32>
    %60 = vector.extract_strided_slice %59 {offsets = [0, 0], sizes = [8, 512], strides = [1, 1]} : vector<8x1536xf32> to vector<8x512xf32>
    %61 = arith.mulf %60, %47 : vector<8x512xf32>
    %62 = vector.extract_strided_slice %59 {offsets = [0, 512], sizes = [8, 512], strides = [1, 1]} : vector<8x1536xf32> to vector<8x512xf32>
    %63 = arith.mulf %62, %50 : vector<8x512xf32>
    %64 = arith.addf %61, %63 : vector<8x512xf32>
    %65 = vector.extract_strided_slice %59 {offsets = [0, 1024], sizes = [8, 512], strides = [1, 1]} : vector<8x1536xf32> to vector<8x512xf32>
    %66 = arith.mulf %65, %53 : vector<8x512xf32>
    %67 = arith.addf %64, %66 : vector<8x512xf32>
    %cst_30 = arith.constant 0.000000e+00 : f32
    %68 = vector.broadcast %cst_30 : f32 to vector<8x512xf32>
    %69 = arith.maximumf %67, %68 : vector<8x512xf32>
    %70 = arith.truncf %69 : vector<8x512xf32> to vector<8x512xbf16>
    %c0_31 = arith.constant 0 : index
    %c0_32 = arith.constant 0 : index
    %71 = vector.load %arg10[%c0_31, %c0_32] : memref<512x1536xbf16, #tpu.memory_space<vmem>>, vector<512x1536xbf16>
    %cst_33 = arith.constant dense<0.000000e+00> : vector<8x1536xf32>
    %72 = tpu.matmul %70, %71, %cst_33 {dimension_numbers = #tpu.dot_dimension_numbers<[1], [0], [0], [1], [0, 0, 1, 1], [], []>} : vector<8x512xbf16>, vector<512x1536xbf16>, vector<8x1536xf32> -> vector<8x1536xf32>
    %c0_34 = arith.constant 0 : index
    %c0_35 = arith.constant 0 : index
    %73 = vector.load %arg11[%c0_34, %c0_35] : memref<1x1536xf32, #tpu.memory_space<vmem>>, vector<1x1536xf32>
    %74 = vector.broadcast %73 : vector<1x1536xf32> to vector<8x1536xf32>
    %75 = arith.addf %72, %74 : vector<8x1536xf32>
    %76 = vector.extract_strided_slice %75 {offsets = [0, 0], sizes = [8, 512], strides = [1, 1]} : vector<8x1536xf32> to vector<8x512xf32>
    %77 = arith.mulf %76, %47 : vector<8x512xf32>
    %78 = vector.extract_strided_slice %75 {offsets = [0, 512], sizes = [8, 512], strides = [1, 1]} : vector<8x1536xf32> to vector<8x512xf32>
    %79 = arith.mulf %78, %50 : vector<8x512xf32>
    %80 = arith.addf %77, %79 : vector<8x512xf32>
    %81 = vector.extract_strided_slice %75 {offsets = [0, 1024], sizes = [8, 512], strides = [1, 1]} : vector<8x1536xf32> to vector<8x512xf32>
    %82 = arith.mulf %81, %53 : vector<8x512xf32>
    %83 = arith.addf %80, %82 : vector<8x512xf32>
    %cst_36 = arith.constant 0.000000e+00 : f32
    %84 = vector.broadcast %cst_36 : f32 to vector<8x512xf32>
    %85 = arith.maximumf %83, %84 : vector<8x512xf32>
    %86 = arith.truncf %85 : vector<8x512xf32> to vector<8x512xbf16>
    %c0_37 = arith.constant 0 : index
    %c0_38 = arith.constant 0 : index
    %87 = vector.load %arg12[%c0_37, %c0_38] : memref<512x1536xbf16, #tpu.memory_space<vmem>>, vector<512x1536xbf16>
    %cst_39 = arith.constant dense<0.000000e+00> : vector<8x1536xf32>
    %88 = tpu.matmul %86, %87, %cst_39 {dimension_numbers = #tpu.dot_dimension_numbers<[1], [0], [0], [1], [0, 0, 1, 1], [], []>} : vector<8x512xbf16>, vector<512x1536xbf16>, vector<8x1536xf32> -> vector<8x1536xf32>
    %c0_40 = arith.constant 0 : index
    %c0_41 = arith.constant 0 : index
    %89 = vector.load %arg13[%c0_40, %c0_41] : memref<1x1536xf32, #tpu.memory_space<vmem>>, vector<1x1536xf32>
    %90 = vector.broadcast %89 : vector<1x1536xf32> to vector<8x1536xf32>
    %91 = arith.addf %88, %90 : vector<8x1536xf32>
    %92 = vector.extract_strided_slice %91 {offsets = [0, 0], sizes = [8, 512], strides = [1, 1]} : vector<8x1536xf32> to vector<8x512xf32>
    %93 = arith.mulf %92, %47 : vector<8x512xf32>
    %94 = vector.extract_strided_slice %91 {offsets = [0, 512], sizes = [8, 512], strides = [1, 1]} : vector<8x1536xf32> to vector<8x512xf32>
    %95 = arith.mulf %94, %50 : vector<8x512xf32>
    %96 = arith.addf %93, %95 : vector<8x512xf32>
    %97 = vector.extract_strided_slice %91 {offsets = [0, 1024], sizes = [8, 512], strides = [1, 1]} : vector<8x1536xf32> to vector<8x512xf32>
    %98 = arith.mulf %97, %53 : vector<8x512xf32>
    %99 = arith.addf %96, %98 : vector<8x512xf32>
    %cst_42 = arith.constant 0.000000e+00 : f32
    %100 = vector.broadcast %cst_42 : f32 to vector<8x512xf32>
    %101 = arith.maximumf %99, %100 : vector<8x512xf32>
    %102 = arith.truncf %101 : vector<8x512xf32> to vector<8x512xbf16>
    %c0_43 = arith.constant 0 : index
    %c0_44 = arith.constant 0 : index
    %103 = vector.load %arg14[%c0_43, %c0_44] : memref<512x128xbf16, #tpu.memory_space<vmem>>, vector<512x128xbf16>
    %cst_45 = arith.constant dense<0.000000e+00> : vector<8x128xf32>
    %104 = tpu.matmul %102, %103, %cst_45 {dimension_numbers = #tpu.dot_dimension_numbers<[1], [0], [0], [1], [0, 0, 1, 1], [], []>} : vector<8x512xbf16>, vector<512x128xbf16>, vector<8x128xf32> -> vector<8x128xf32>
    %c0_46 = arith.constant 0 : index
    %c0_47 = arith.constant 0 : index
    %105 = vector.load %arg15[%c0_46, %c0_47] : memref<1x128xf32, #tpu.memory_space<vmem>>, vector<1x128xf32>
    %106 = vector.broadcast %105 : vector<1x128xf32> to vector<8x128xf32>
    %107 = arith.addf %104, %106 : vector<8x128xf32>
    %108 = tpu.iota {dimensions = array<i32: 1>} : vector<8x128xi32>
    %c8_i32 = arith.constant 8 : i32
    %109 = vector.broadcast %c8_i32 : i32 to vector<8x128xi32>
    %110 = arith.cmpi slt, %108, %109 : vector<8x128xi32>
    %111 = vector.extract_strided_slice %43 {offsets = [0, 0], sizes = [8, 1], strides = [1, 1]} : vector<8x128xf32> to vector<8x1xf32>
    %c16_i32 = arith.constant 16 : i32
    %112 = vector.broadcast %c16_i32 : i32 to vector<8x128xi32>
    %113 = arith.cmpi slt, %108, %112 : vector<8x128xi32>
    %114 = vector.extract_strided_slice %43 {offsets = [0, 1], sizes = [8, 1], strides = [1, 1]} : vector<8x128xf32> to vector<8x1xf32>
    %c24_i32 = arith.constant 24 : i32
    %115 = vector.broadcast %c24_i32 : i32 to vector<8x128xi32>
    %116 = arith.cmpi slt, %108, %115 : vector<8x128xi32>
    %117 = vector.extract_strided_slice %43 {offsets = [0, 2], sizes = [8, 1], strides = [1, 1]} : vector<8x128xf32> to vector<8x1xf32>
    %cst_48 = arith.constant 0.000000e+00 : f32
    %118 = vector.shape_cast %117 : vector<8x1xf32> to vector<8x1xf32>
    %119 = vector.broadcast %118 : vector<8x1xf32> to vector<8x128xf32>
    %120 = vector.broadcast %cst_48 : f32 to vector<8x128xf32>
    %121 = arith.select %116, %119, %120 : vector<8x128xi1>, vector<8x128xf32>
    %122 = vector.shape_cast %114 : vector<8x1xf32> to vector<8x1xf32>
    %123 = vector.broadcast %122 : vector<8x1xf32> to vector<8x128xf32>
    %124 = arith.select %113, %123, %121 : vector<8x128xi1>, vector<8x128xf32>
    %125 = vector.shape_cast %111 : vector<8x1xf32> to vector<8x1xf32>
    %126 = vector.broadcast %125 : vector<8x1xf32> to vector<8x128xf32>
    %127 = arith.select %110, %126, %124 : vector<8x128xi1>, vector<8x128xf32>
    %128 = arith.mulf %107, %127 : vector<8x128xf32>
    %129 = arith.truncf %128 : vector<8x128xf32> to vector<8x128xbf16>
    %c0_49 = arith.constant 0 : index
    %c0_50 = arith.constant 0 : index
    %130 = vector.load %arg16[%c0_49, %c0_50] : memref<128x128xbf16, #tpu.memory_space<vmem>>, vector<128x128xbf16>
    %cst_51 = arith.constant dense<0.000000e+00> : vector<8x128xf32>
    %131 = tpu.matmul %129, %130, %cst_51 {dimension_numbers = #tpu.dot_dimension_numbers<[1], [0], [0], [1], [0, 0, 1, 1], [], []>} : vector<8x128xbf16>, vector<128x128xbf16>, vector<8x128xf32> -> vector<8x128xf32>
    %c0_52 = arith.constant 0 : index
    %c0_53 = arith.constant 0 : index
    %132 = vector.load %arg17[%c0_52, %c0_53] : memref<8x128xf32, #tpu.memory_space<vmem>>, vector<8x128xf32>
    tpu.vector_store %arg17[%c0_52, %c0_53], %131 {strides = array<i32>} : memref<8x128xf32, #tpu.memory_space<vmem>>, vector<8x128xf32>,
    return
  }
  func.func @transform_0(%arg0: i32) -> (i32, i32) {
    %c0_i32 = arith.constant 0 : i32
    %c0_i32_0 = arith.constant 0 : i32
    return %arg0, %c0_i32 : i32, i32
  }
  func.func @transform_1(%arg0: i32) -> (i32, i32) {
    %c0_i32 = arith.constant 0 : i32
    %c0_i32_0 = arith.constant 0 : i32
    %c0_i32_1 = arith.constant 0 : i32
    return %c0_i32, %c0_i32_0 : i32, i32
  }
  func.func @transform_2(%arg0: i32) -> (i32, i32) {
    %c0_i32 = arith.constant 0 : i32
    %c0_i32_0 = arith.constant 0 : i32
    %c0_i32_1 = arith.constant 0 : i32
    return %c0_i32, %c0_i32_0 : i32, i32
  }
  func.func @transform_3(%arg0: i32) -> (i32, i32) {
    %c0_i32 = arith.constant 0 : i32
    %c0_i32_0 = arith.constant 0 : i32
    %c0_i32_1 = arith.constant 0 : i32
    return %c0_i32, %c0_i32_0 : i32, i32
  }
  func.func @transform_4(%arg0: i32) -> (i32, i32) {
    %c0_i32 = arith.constant 0 : i32
    %c0_i32_0 = arith.constant 0 : i32
    %c0_i32_1 = arith.constant 0 : i32
    return %c0_i32, %c0_i32_0 : i32, i32
  }
  func.func @transform_5(%arg0: i32) -> (i32, i32) {
    %c0_i32 = arith.constant 0 : i32
    %c0_i32_0 = arith.constant 0 : i32
    %c0_i32_1 = arith.constant 0 : i32
    return %c0_i32, %c0_i32_0 : i32, i32
  }
  func.func @transform_6(%arg0: i32) -> (i32, i32) {
    %c0_i32 = arith.constant 0 : i32
    %c0_i32_0 = arith.constant 0 : i32
    %c0_i32_1 = arith.constant 0 : i32
    return %c0_i32, %c0_i32_0 : i32, i32
  }
  func.func @transform_7(%arg0: i32) -> (i32, i32) {
    %c0_i32 = arith.constant 0 : i32
    %c0_i32_0 = arith.constant 0 : i32
    %c0_i32_1 = arith.constant 0 : i32
    return %c0_i32, %c0_i32_0 : i32, i32
  }
  func.func @transform_8(%arg0: i32) -> (i32, i32) {
    %c0_i32 = arith.constant 0 : i32
    %c0_i32_0 = arith.constant 0 : i32
    %c0_i32_1 = arith.constant 0 : i32
    return %c0_i32, %c0_i32_0 : i32, i32
  }
  func.func @transform_9(%arg0: i32) -> (i32, i32) {
    %c0_i32 = arith.constant 0 : i32
    %c0_i32_0 = arith.constant 0 : i32
    %c0_i32_1 = arith.constant 0 : i32
    return %c0_i32, %c0_i32_0 : i32, i32
  }
  func.func @transform_10(%arg0: i32) -> (i32, i32) {
    %c0_i32 = arith.constant 0 : i32
    %c0_i32_0 = arith.constant 0 : i32
    %c0_i32_1 = arith.constant 0 : i32
    return %c0_i32, %c0_i32_0 : i32, i32
  }
  func.func @transform_11(%arg0: i32) -> (i32, i32) {
    %c0_i32 = arith.constant 0 : i32
    %c0_i32_0 = arith.constant 0 : i32
    %c0_i32_1 = arith.constant 0 : i32
    return %c0_i32, %c0_i32_0 : i32, i32
  }
  func.func @transform_12(%arg0: i32) -> (i32, i32) {
    %c0_i32 = arith.constant 0 : i32
    %c0_i32_0 = arith.constant 0 : i32
    %c0_i32_1 = arith.constant 0 : i32
    return %c0_i32, %c0_i32_0 : i32, i32
  }
  func.func @transform_13(%arg0: i32) -> (i32, i32) {
    %c0_i32 = arith.constant 0 : i32
    %c0_i32_0 = arith.constant 0 : i32
    %c0_i32_1 = arith.constant 0 : i32
    return %c0_i32, %c0_i32_0 : i32, i32
  }
  func.func @transform_14(%arg0: i32) -> (i32, i32) {
    %c0_i32 = arith.constant 0 : i32
    %c0_i32_0 = arith.constant 0 : i32
    %c0_i32_1 = arith.constant 0 : i32
    return %c0_i32, %c0_i32_0 : i32, i32
  }
  func.func @transform_15(%arg0: i32) -> (i32, i32) {
    %c0_i32 = arith.constant 0 : i32
    %c0_i32_0 = arith.constant 0 : i32
    %c0_i32_1 = arith.constant 0 : i32
    return %c0_i32, %c0_i32_0 : i32, i32
  }
  func.func @transform_16(%arg0: i32) -> (i32, i32) {
    %c0_i32 = arith.constant 0 : i32
    %c0_i32_0 = arith.constant 0 : i32
    return %arg0, %c0_i32 : i32, i32
  }
  func.func @transform_17(%arg0: i32) -> (i32, i32) {
    %c0_i32 = arith.constant 0 : i32
    %c0_i32_0 = arith.constant 0 : i32
    return %arg0, %c0_i32 : i32, i32
  }
}

</mosaic_0001>

<bundles_post_ra>
// kernel: tpu_custom_call.1
= control target key start
LH: loop header
LB: loop body
LE: loop exit
PB: predicated region body
PF: predicated region fallthrough
CT: control target
= control target key end

     0   :  { %s11482_s0 = inlined_call_operand.hbm [shape: f32[8,128], index: 0, kind: input, shape index: {}]   ;;  %s11483_s1 = inlined_call_operand.hbm [shape: bf16[128,128], index: 1, kind: input, shape index: {}]   ;;  %s11484_s2 = inlined_call_operand.hbm [shape: f32[1,128], index: 2, kind: input, shape index: {}]   ;;  %s11485_s3 = inlined_call_operand.hbm [shape: bf16[128,128], index: 3, kind: input, shape index: {}]   ;;  %s11486_s4 = inlined_call_operand.hbm [shape: f32[1,128], index: 4, kind: input, shape index: {}]   ;;  %s11487_s5 = inlined_call_operand.hbm [shape: bf16[128,128], index: 5, kind: input, shape index: {}]   ;;  %s11488_s6 = inlined_call_operand.hbm [shape: f32[1,128], index: 6, kind: input, shape index: {}]   ;;  %s11489_s7 = inlined_call_operand.hbm [shape: bf16[128,1536], index: 7, kind: input, shape index: {}]   ;;  %s11490_s8 = inlined_call_operand.hbm [shape: f32[1,1536], index: 8, kind: input, shape index: {}]   ;;  %s11491_s9 = inlined_call_operand.hbm [shape: bf16[512,1536], index: 9, kind: input, shape index: {}]   ;;  %s11492_s10 = inlined_call_operand.hbm [shape: f32[1,1536], index: 10, kind: input, shape index: {}]   ;;  %s11493_s11 = inlined_call_operand.hbm [shape: bf16[512,1536], index: 11, kind: input, shape index: {}]   ;;  %s11494_s12 = inlined_call_operand.hbm [shape: f32[1,1536], index: 12, kind: input, shape index: {}]   ;;  %s11495_s13 = inlined_call_operand.hbm [shape: bf16[512,128], index: 13, kind: input, shape index: {}]   ;;  %s11496_s14 = inlined_call_operand.hbm [shape: f32[1,128], index: 14, kind: input, shape index: {}]   ;;  %s11497_s15 = inlined_call_operand.hbm [shape: bf16[128,128], index: 15, kind: input, shape index: {}]   ;;  %s11498_s16 = inlined_call_operand.hbm [shape: f32[8,128], index: 16, kind: output, shape index: {0}]   ;;  %s11499_s17 = inlined_call_operand.hbm [shape: f32[8,128], index: 17, kind: output, shape index: {1}]  }
   0x1   :  { %11504 = sst [smem:[#allocation42_spill]] %s11482_s0 }
   0x2   :  { %11505 = sst [smem:[#allocation43_spill]] %s11483_s1 }
   0x3   :  { %11506 = sst [smem:[#allocation44_spill]] %s11498_s16 }
   0x4   :  { %11507 = sst [smem:[#allocation45_spill]] %s11499_s17 }
   0x5   :  { %23 = vsyncpa [#allocation3], 0 }
   0x6   :  { %24 = vsyncpa [#allocation6], 0 }
   0x7   :  { %25 = vsyncpa [#allocation9], 0 }
   0x8   :  { %26 = vsyncpa [#allocation12], 0 }
   0x9   :  { %27 = vsyncpa [#allocation15], 0 }
   0xa   :  { %28 = vsyncpa [#allocation18], 0 }
   0xb   :  { %29 = vsyncpa [#allocation21], 0 }
   0xc   :  { %30 = vsyncpa [#allocation24], 0 }
   0xd   :  { %31 = vsyncpa [#allocation27], 0 }
   0xe   :  { %32 = vsyncpa [#allocation4], 0 }
   0xf   :  { %33 = vsyncpa [#allocation30], 0  ;;  %s10798_s24 = smov [#allocation5]   ;;  %s11508_s28 = sld [smem:[#allocation43_spill]] }
  0x10   :  { %s49_s25 = sshll.u32 %s10798_s24, 4  ;;  %s50_s25 = int_to_ptr.vmem [resolvable:$true] %s49_s25 }
  0x15   :  { %s10380_s29 = scalar_lea.hbm %s11508_s28, 1024 }
  0x16   :  { %p10381_p0 = scmp.ne.s32.totalorder %s11508_s28, %s10380_s29  ;;  %p10384_p1 = scmp.lt.u32.totalorder %s10380_s29, %s11508_s28 }
  0x18   :  { %p10386_p2 = pnand %p10384_p1, %p10381_p0 }
  0x1a   :  { %10389 = shalt.err (!%p10386_p2)
}
  0x1b   :  { %s10390_s1 = scalar_lea.vmem %s50_s25, 1024  ;;  %p10395_p4 = scmp.lt.s32.totalorder %s50_s25, %s50_s25 }
  0x1c   :  { %p10391_p3 = scmp.ne.s32.totalorder %s50_s25, %s10390_s1  ;;  %p10396_p5 = scmp.lt.s32.totalorder %s10390_s1, %s10390_s1 }
  0x1e   :  { %p10397_p6 = por %p10396_p5, %p10395_p4 }
  0x20   :  { %p10398_p7 = pnand %p10397_p6, %p10391_p3 }
  0x22   :  { %10401 = shalt.err (!%p10398_p7)
}
  0x23   :  { %s10799_s20 = smov 64   ;;  %s10800_s21 = smov 4  }
  0x24   :  { %55 = dma.hbm_to_vmem [thread:$0]  %s11508_s28, 1024, %s50_s25, [#allocation6], %s10799_s20, %s10799_s20, %s10800_s21  }
  0x25   :  { %s10801_s24 = smov [#allocation8]   ;;  %s10802_s27 = smov [#allocation11]  }
  0x26   :  { %s71_s26 = sshll.u32 %s10801_s24, 4  ;;  %s93_s29 = sshll.u32 %s10802_s27, 4  ;;  %s72_s26 = int_to_ptr.vmem [resolvable:$true] %s71_s26  ;;  %s94_s29 = int_to_ptr.vmem [resolvable:$true] %s93_s29 }
  0x27   :  { %s10402_s18 = scalar_lea.hbm %s11485_s3, 1024 }
  0x28   :  { %p10403_p8 = scmp.ne.s32.totalorder %s11485_s3, %s10402_s18  ;;  %p10406_p9 = scmp.lt.u32.totalorder %s10402_s18, %s11485_s3 }
  0x2a   :  { %p10408_p10 = pnand %p10406_p9, %p10403_p8 }
  0x2c   :  { %10411 = shalt.err (!%p10408_p10)
}
  0x2d   :  { %s10412_s25 = scalar_lea.vmem %s72_s26, 1024  ;;  %p10417_p12 = scmp.lt.s32.totalorder %s72_s26, %s72_s26 }
  0x2e   :  { %p10413_p11 = scmp.ne.s32.totalorder %s72_s26, %s10412_s25  ;;  %p10418_p13 = scmp.lt.s32.totalorder %s10412_s25, %s10412_s25 }
  0x30   :  { %p10419_p0 = por %p10418_p13, %p10417_p12 }
  0x32   :  { %p10420_p1 = pnand %p10419_p0, %p10413_p11 }
  0x34   :  { %10423 = shalt.err (!%p10420_p1)
}
  0x35   :  { %77 = dma.hbm_to_vmem [thread:$0]  %s11485_s3, 1024, %s72_s26, [#allocation9], %s10799_s20, %s10799_s20, %s10800_s21  }
  0x36   :  { %s10424_s17 = scalar_lea.hbm %s11487_s5, 1024 }
  0x37   :  { %p10425_p2 = scmp.ne.s32.totalorder %s11487_s5, %s10424_s17  ;;  %p10428_p3 = scmp.lt.u32.totalorder %s10424_s17, %s11487_s5 }
  0x39   :  { %p10430_p4 = pnand %p10428_p3, %p10425_p2 }
  0x3b   :  { %10433 = shalt.err (!%p10430_p4)
}
  0x3c   :  { %s10434_s18 = scalar_lea.vmem %s94_s29, 1024  ;;  %p10439_p6 = scmp.lt.s32.totalorder %s94_s29, %s94_s29 }
  0x3d   :  { %p10435_p5 = scmp.ne.s32.totalorder %s94_s29, %s10434_s18  ;;  %p10440_p7 = scmp.lt.s32.totalorder %s10434_s18, %s10434_s18 }
  0x3f   :  { %p10441_p8 = por %p10440_p7, %p10439_p6 }
  0x41   :  { %p10442_p9 = pnand %p10441_p8, %p10435_p5 }
  0x43   :  { %10445 = shalt.err (!%p10442_p9)
}
  0x44   :  { %99 = dma.hbm_to_vmem [thread:$0]  %s11487_s5, 1024, %s94_s29, [#allocation12], %s10799_s20, %s10799_s20, %s10800_s21  }
  0x45   :  { %s10803_s19 = smov [#allocation14]   ;;  %s10446_s22 = scalar_lea.hbm %s11489_s7, 12288 }
  0x46   :  { %s115_s1 = sshll.u32 %s10803_s19, 4  ;;  %p10447_p10 = scmp.ne.s32.totalorder %s11489_s7, %s10446_s22  ;;  %s116_s1 = int_to_ptr.vmem [resolvable:$true] %s115_s1 }
  0x47   :  { %p10450_p11 = scmp.lt.u32.totalorder %s10446_s22, %s11489_s7 }
  0x49   :  { %p10452_p12 = pnand %p10450_p11, %p10447_p10 }
  0x4b   :  { %10455 = shalt.err (!%p10452_p12)
}
  0x4c   :  { %s10456_s27 = scalar_lea.vmem %s116_s1, 12288  ;;  %p10461_p0 = scmp.lt.s32.totalorder %s116_s1, %s116_s1 }
  0x4d   :  { %p10457_p13 = scmp.ne.s32.totalorder %s116_s1, %s10456_s27  ;;  %p10462_p1 = scmp.lt.s32.totalorder %s10456_s27, %s10456_s27 }
  0x4f   :  { %p10463_p2 = por %p10462_p1, %p10461_p0 }
  0x51   :  { %p10464_p3 = pnand %p10463_p2, %p10457_p13 }
  0x53   :  { %10467 = shalt.err (!%p10464_p3)
}
  0x54   :  { %s10804_s5 = smov 768   ;;  %s10805_s29 = smov 48  }
  0x55   :  { %121 = dma.hbm_to_vmem [thread:$0]  %s11489_s7, 12288, %s116_s1, [#allocation15], %s10804_s5, %s10804_s5, %s10805_s29  }
  0x56   :  { %s10806_s18 = smov [#allocation17]   ;;  %s10807_s26 = smov [#allocation20]  }
  0x57   :  { %s137_s3 = sshll.u32 %s10806_s18, 4  ;;  %s159_s19 = sshll.u32 %s10807_s26, 4  ;;  %s138_s3 = int_to_ptr.vmem [resolvable:$true] %s137_s3  ;;  %s10975_s19 = int_to_ptr.vmem [resolvable:$true] %s159_s19 }
  0x58   :  { %s10468_s22 = scalar_lea.hbm %s11491_s9, 49152 }
  0x59   :  { %p10469_p4 = scmp.ne.s32.totalorder %s11491_s9, %s10468_s22  ;;  %p10472_p5 = scmp.lt.u32.totalorder %s10468_s22, %s11491_s9 }
  0x5b   :  { %p10474_p6 = pnand %p10472_p5, %p10469_p4 }
  0x5d   :  { %10477 = shalt.err (!%p10474_p6)
}
  0x5e   :  { %s10478_s7 = scalar_lea.vmem %s138_s3, 49152  ;;  %p10483_p8 = scmp.lt.s32.totalorder %s138_s3, %s138_s3 }
  0x5f   :  { %p10479_p7 = scmp.ne.s32.totalorder %s138_s3, %s10478_s7  ;;  %p10484_p9 = scmp.lt.s32.totalorder %s10478_s7, %s10478_s7 }
  0x61   :  { %p10485_p10 = por %p10484_p9, %p10483_p8 }
  0x63   :  { %p10486_p11 = pnand %p10485_p10, %p10479_p7 }
  0x65   :  { %10489 = shalt.err (!%p10486_p11)
}
  0x66   :  { %143 = dma.hbm_to_vmem [thread:$0]  %s11491_s9, 49152, %s138_s3, [#allocation18], %s10804_s5, %s10804_s5, %s10805_s29  }
  0x67   :  { %s10490_s18 = scalar_lea.hbm %s11493_s11, 49152 }
  0x68   :  { %p10491_p12 = scmp.ne.s32.totalorder %s11493_s11, %s10490_s18  ;;  %p10494_p13 = scmp.lt.u32.totalorder %s10490_s18, %s11493_s11 }
  0x6a   :  { %p10496_p0 = pnand %p10494_p13, %p10491_p12 }
  0x6c   :  { %10499 = shalt.err (!%p10496_p0)
}
  0x6d   :  { %s10500_s23 = scalar_lea.vmem %s10975_s19, 49152  ;;  %p10505_p2 = scmp.lt.s32.totalorder %s10975_s19, %s10975_s19 }
  0x6e   :  { %p10501_p1 = scmp.ne.s32.totalorder %s10975_s19, %s10500_s23  ;;  %p10506_p3 = scmp.lt.s32.totalorder %s10500_s23, %s10500_s23 }
  0x70   :  { %p10507_p4 = por %p10506_p3, %p10505_p2 }
  0x72   :  { %p10508_p5 = pnand %p10507_p4, %p10501_p1 }
  0x74   :  { %10511 = shalt.err (!%p10508_p5)
}
  0x75   :  { %165 = dma.hbm_to_vmem [thread:$0]  %s11493_s11, 49152, %s10975_s19, [#allocation21], %s10804_s5, %s10804_s5, %s10805_s29  }
  0x76   :  { %s10808_s16 = smov [#allocation23]   ;;  %s10809_s24 = smov [#allocation2]  }
  0x77   :  { %s181_s17 = sshll.u32 %s10808_s16, 4  ;;  %s40_s7 = sshll.u32 %s10809_s24, 4  ;;  %s182_s17 = int_to_ptr.vmem [resolvable:$true] %s181_s17  ;;  %s41_s7 = int_to_ptr.vmem [resolvable:$true] %s40_s7 }
  0x78   :  { %s10512_s0 = scalar_lea.hbm %s11495_s13, 4096 }
  0x79   :  { %p10513_p6 = scmp.ne.s32.totalorder %s11495_s13, %s10512_s0  ;;  %p10516_p7 = scmp.lt.u32.totalorder %s10512_s0, %s11495_s13 }
  0x7b   :  { %p10518_p8 = pnand %p10516_p7, %p10513_p6 }
  0x7d   :  { %10521 = shalt.err (!%p10518_p8)
}
  0x7e   :  { %s10522_s11 = scalar_lea.vmem %s182_s17, 4096  ;;  %p10527_p10 = scmp.lt.s32.totalorder %s182_s17, %s182_s17 }
  0x7f   :  { %p10523_p9 = scmp.ne.s32.totalorder %s182_s17, %s10522_s11  ;;  %p10528_p11 = scmp.lt.s32.totalorder %s10522_s11, %s10522_s11 }
  0x81   :  { %p10529_p12 = por %p10528_p11, %p10527_p10 }
  0x83   :  { %p10530_p13 = pnand %p10529_p12, %p10523_p9 }
  0x85   :  { %10533 = shalt.err (!%p10530_p13)
}
  0x86   :  { %187 = dma.hbm_to_vmem [thread:$0]  %s11495_s13, 4096, %s182_s17, [#allocation24], %s10799_s20, %s10799_s20, %s10800_s21  }
  0x87   :  { %s11509_s22 = sld [smem:[#allocation42_spill]] }
  0x8d   :  { %s10534_s23 = scalar_lea.hbm %s11509_s22, 128 }
  0x8e   :  { %p10535_p0 = scmp.ne.s32.totalorder %s11509_s22, %s10534_s23  ;;  %p10538_p1 = scmp.lt.u32.totalorder %s10534_s23, %s11509_s22 }
  0x90   :  { %p10540_p2 = pnand %p10538_p1, %p10535_p0 }
  0x92   :  { %10543 = shalt.err (!%p10540_p2)
}
  0x93   :  { %s10544_s1 = scalar_lea.vmem %s41_s7, 128  ;;  %p10549_p4 = scmp.lt.s32.totalorder %s41_s7, %s41_s7 }
  0x94   :  { %p10545_p3 = scmp.ne.s32.totalorder %s41_s7, %s10544_s1  ;;  %p10550_p5 = scmp.lt.s32.totalorder %s10544_s1, %s10544_s1 }
  0x96   :  { %p10551_p6 = por %p10550_p5, %p10549_p4 }
  0x98   :  { %p10552_p7 = pnand %p10551_p6, %p10545_p3 }
  0x9a   :  { %10555 = shalt.err (!%p10552_p7)
}
  0x9b   :  { %43 = dma.hbm_to_vmem [thread:$0]  %s11509_s22, 128, %s41_s7, [#allocation3]  }
  0x9c   :  { %s10810_s27 = smov [#allocation7]   ;;  %s10811_s30 = smov [#allocation10]  }
  0x9d   :  { %s62_s0 = sshll.u32 %s10810_s27, 4  ;;  %s84_s18 = sshll.u32 %s10811_s30, 4  ;;  %s63_s0 = int_to_ptr.vmem [resolvable:$true] %s62_s0  ;;  %s85_s18 = int_to_ptr.vmem [resolvable:$true] %s84_s18 }
  0x9e   :  { %s10556_s11 = scalar_lea.hbm %s11484_s2, 16 }
  0x9f   :  { %p10557_p8 = scmp.ne.s32.totalorder %s11484_s2, %s10556_s11  ;;  %p10560_p9 = scmp.lt.u32.totalorder %s10556_s11, %s11484_s2 }
  0xa1   :  { %p10562_p10 = pnand %p10560_p9, %p10557_p8 }
  0xa3   :  { %10565 = shalt.err (!%p10562_p10)
}
  0xa4   :  { %s10566_s7 = scalar_lea.vmem %s63_s0, 16  ;;  %s10570_s22 = scalar_lea.vmem %s63_s0, 32 }
  0xa5   :  { %p10567_p11 = scmp.ne.s32.totalorder %s63_s0, %s10566_s7  ;;  %p10571_p12 = scmp.lt.s32.totalorder %s63_s0, %s63_s0 }
  0xa6   :  { %p10572_p13 = scmp.lt.s32.totalorder %s10570_s22, %s10566_s7 }
  0xa8   :  { %p10573_p0 = por %p10572_p13, %p10571_p12 }
  0xaa   :  { %p10574_p1 = pnand %p10573_p0, %p10567_p11 }
  0xac   :  { %10577 = shalt.err (!%p10574_p1)
}
  0xad   :  { %65 = dma.hbm_to_vmem [thread:$0]  %s11484_s2, 16, %s63_s0, [#allocation6]  }
  0xae   :  { %s10578_s24 = scalar_lea.hbm %s11486_s4, 16 }
  0xaf   :  { %p10579_p2 = scmp.ne.s32.totalorder %s11486_s4, %s10578_s24  ;;  %p10582_p3 = scmp.lt.u32.totalorder %s10578_s24, %s11486_s4 }
  0xb1   :  { %p10584_p4 = pnand %p10582_p3, %p10579_p2 }
  0xb3   :  { %10587 = shalt.err (!%p10584_p4)
}
  0xb4   :  { %s10588_s30 = scalar_lea.vmem %s85_s18, 16  ;;  %s10592_s26 = scalar_lea.vmem %s85_s18, 32 }
  0xb5   :  { %p10589_p5 = scmp.ne.s32.totalorder %s85_s18, %s10588_s30  ;;  %p10593_p6 = scmp.lt.s32.totalorder %s85_s18, %s85_s18 }
  0xb6   :  { %p10594_p7 = scmp.lt.s32.totalorder %s10592_s26, %s10588_s30 }
  0xb8   :  { %p10595_p8 = por %p10594_p7, %p10593_p6 }
  0xba   :  { %p10596_p9 = pnand %p10595_p8, %p10589_p5 }
  0xbc   :  { %10599 = shalt.err (!%p10596_p9)
}
  0xbd   :  { %87 = dma.hbm_to_vmem [thread:$0]  %s11486_s4, 16, %s85_s18, [#allocation9]  }
  0xbe   :  { %s10812_s25 = smov [#allocation13]   ;;  %s10813_s5 = smov [#allocation16]  }
  0xbf   :  { %s106_s11 = sshll.u32 %s10812_s25, 4  ;;  %s128_s29 = sshll.u32 %s10813_s5, 4  ;;  %s107_s11 = int_to_ptr.vmem [resolvable:$true] %s106_s11  ;;  %s129_s29 = int_to_ptr.vmem [resolvable:$true] %s128_s29 }
  0xc0   :  { %s10600_s7 = scalar_lea.hbm %s11488_s6, 16 }
  0xc1   :  { %p10601_p10 = scmp.ne.s32.totalorder %s11488_s6, %s10600_s7  ;;  %p10604_p11 = scmp.lt.u32.totalorder %s10600_s7, %s11488_s6 }
  0xc3   :  { %p10606_p12 = pnand %p10604_p11, %p10601_p10 }
  0xc5   :  { %10609 = shalt.err (!%p10606_p12)
}
  0xc6   :  { %s10610_s4 = scalar_lea.vmem %s107_s11, 16  ;;  %s10614_s18 = scalar_lea.vmem %s107_s11, 32 }
  0xc7   :  { %p10611_p13 = scmp.ne.s32.totalorder %s107_s11, %s10610_s4  ;;  %p10615_p0 = scmp.lt.s32.totalorder %s107_s11, %s107_s11 }
  0xc8   :  { %p10616_p1 = scmp.lt.s32.totalorder %s10614_s18, %s10610_s4 }
  0xca   :  { %p10617_p2 = por %p10616_p1, %p10615_p0 }
  0xcc   :  { %p10618_p3 = pnand %p10617_p2, %p10611_p13 }
  0xce   :  { %10621 = shalt.err (!%p10618_p3)
}
  0xcf   :  { %109 = dma.hbm_to_vmem [thread:$0]  %s11488_s6, 16, %s107_s11, [#allocation12]  }
  0xd0   :  { %s10622_s17 = scalar_lea.hbm %s11490_s8, 192 }
  0xd1   :  { %p10623_p4 = scmp.ne.s32.totalorder %s11490_s8, %s10622_s17  ;;  %p10626_p5 = scmp.lt.u32.totalorder %s10622_s17, %s11490_s8 }
  0xd3   :  { %p10628_p6 = pnand %p10626_p5, %p10623_p4 }
  0xd5   :  { %10631 = shalt.err (!%p10628_p6)
}
  0xd6   :  { %s10632_s0 = scalar_lea.vmem %s129_s29, 192  ;;  %p10637_p8 = scmp.lt.s32.totalorder %s129_s29, %s129_s29 }
  0xd7   :  { %p10633_p7 = scmp.ne.s32.totalorder %s129_s29, %s10632_s0  ;;  %p10638_p9 = scmp.lt.s32.totalorder %s10632_s0, %s10632_s0 }
  0xd9   :  { %p10639_p10 = por %p10638_p9, %p10637_p8 }
  0xdb   :  { %p10640_p11 = pnand %p10639_p10, %p10633_p7 }
  0xdd   :  { %10643 = shalt.err (!%p10640_p11)
}
  0xde   :  { %131 = dma.hbm_to_vmem [thread:$0]  %s11490_s8, 192, %s129_s29, [#allocation15]  }
  0xdf   :  { %s10814_s11 = smov [#allocation19]   ;;  %s10815_s19 = smov [#allocation22]  }
  0xe0   :  { %s150_s5 = sshll.u32 %s10814_s11, 4  ;;  %s172_s28 = sshll.u32 %s10815_s19, 4  ;;  %s151_s5 = int_to_ptr.vmem [resolvable:$true] %s150_s5  ;;  %s173_s28 = int_to_ptr.vmem [resolvable:$true] %s172_s28 }
  0xe1   :  { %s10644_s23 = scalar_lea.hbm %s11492_s10, 192 }
  0xe2   :  { %p10645_p12 = scmp.ne.s32.totalorder %s11492_s10, %s10644_s23  ;;  %p10648_p13 = scmp.lt.u32.totalorder %s10644_s23, %s11492_s10 }
  0xe4   :  { %p10650_p0 = pnand %p10648_p13, %p10645_p12 }
  0xe6   :  { %10653 = shalt.err (!%p10650_p0)
}
  0xe7   :  { %s10654_s8 = scalar_lea.vmem %s151_s5, 192  ;;  %p10659_p2 = scmp.lt.s32.totalorder %s151_s5, %s151_s5 }
  0xe8   :  { %p10655_p1 = scmp.ne.s32.totalorder %s151_s5, %s10654_s8  ;;  %p10660_p3 = scmp.lt.s32.totalorder %s10654_s8, %s10654_s8 }
  0xea   :  { %p10661_p4 = por %p10660_p3, %p10659_p2 }
  0xec   :  { %p10662_p5 = pnand %p10661_p4, %p10655_p1 }
  0xee   :  { %10665 = shalt.err (!%p10662_p5)
}
  0xef   :  { %153 = dma.hbm_to_vmem [thread:$0]  %s11492_s10, 192, %s151_s5, [#allocation18]  }
  0xf0   :  { %s10666_s13 = scalar_lea.hbm %s11494_s12, 192 }
  0xf1   :  { %p10667_p6 = scmp.ne.s32.totalorder %s11494_s12, %s10666_s13  ;;  %p10670_p7 = scmp.lt.u32.totalorder %s10666_s13, %s11494_s12 }
  0xf3   :  { %p10672_p8 = pnand %p10670_p7, %p10667_p6 }
  0xf5   :  { %10675 = shalt.err (!%p10672_p8)
}
  0xf6   :  { %s10676_s2 = scalar_lea.vmem %s173_s28, 192  ;;  %p10681_p10 = scmp.lt.s32.totalorder %s173_s28, %s173_s28 }
  0xf7   :  { %p10677_p9 = scmp.ne.s32.totalorder %s173_s28, %s10676_s2  ;;  %p10682_p11 = scmp.lt.s32.totalorder %s10676_s2, %s10676_s2 }
  0xf9   :  { %p10683_p12 = por %p10682_p11, %p10681_p10 }
  0xfb   :  { %p10684_p13 = pnand %p10683_p12, %p10677_p9 }
  0xfd   :  { %10687 = shalt.err (!%p10684_p13)
}
  0xfe   :  { %175 = dma.hbm_to_vmem [thread:$0]  %s11494_s12, 192, %s173_s28, [#allocation21]  }
  0xff   :  { %s10816_s6 = smov [#allocation25]   ;;  %s10817_s11 = smov [#allocation26]  }
 0x100   :  { %s194_s25 = sshll.u32 %s10816_s6, 4  ;;  %s203_s5 = sshll.u32 %s10817_s11, 4  ;;  %s195_s25 = int_to_ptr.vmem [resolvable:$true] %s194_s25  ;;  %s11111_s5 = int_to_ptr.vmem [resolvable:$true] %s203_s5 }
 0x101   :  { %s10688_s22 = scalar_lea.hbm %s11496_s14, 16 }
 0x102   :  { %p10689_p0 = scmp.ne.s32.totalorder %s11496_s14, %s10688_s22  ;;  %p10692_p1 = scmp.lt.u32.totalorder %s10688_s22, %s11496_s14 }
 0x104   :  { %p10694_p2 = pnand %p10692_p1, %p10689_p0 }
 0x106   :  { %10697 = shalt.err (!%p10694_p2)
}
 0x107   :  { %s10698_s12 = scalar_lea.vmem %s195_s25, 16  ;;  %s10702_s28 = scalar_lea.vmem %s195_s25, 32 }
 0x108   :  { %p10699_p3 = scmp.ne.s32.totalorder %s195_s25, %s10698_s12  ;;  %p10703_p4 = scmp.lt.s32.totalorder %s195_s25, %s195_s25 }
 0x109   :  { %p10704_p5 = scmp.lt.s32.totalorder %s10702_s28, %s10698_s12 }
 0x10b   :  { %p10705_p6 = por %p10704_p5, %p10703_p4 }
 0x10d   :  { %p10706_p7 = pnand %p10705_p6, %p10699_p3 }
 0x10f   :  { %10709 = shalt.err (!%p10706_p7)
}
 0x110   :  { %197 = dma.hbm_to_vmem [thread:$0]  %s11496_s14, 16, %s195_s25, [#allocation24]  }
 0x111   :  { %s10710_s24 = scalar_lea.hbm %s11497_s15, 1024 }
 0x112   :  { %p10711_p8 = scmp.ne.s32.totalorder %s11497_s15, %s10710_s24  ;;  %p10714_p9 = scmp.lt.u32.totalorder %s10710_s24, %s11497_s15 }
 0x114   :  { %p10716_p10 = pnand %p10714_p9, %p10711_p8 }
 0x116   :  { %10719 = shalt.err (!%p10716_p10)
}
 0x117   :  { %s10720_s30 = scalar_lea.vmem %s11111_s5, 1024  ;;  %p10725_p12 = scmp.lt.s32.totalorder %s11111_s5, %s11111_s5 }
 0x118   :  { %p10721_p11 = scmp.ne.s32.totalorder %s11111_s5, %s10720_s30  ;;  %p10726_p13 = scmp.lt.s32.totalorder %s10720_s30, %s10720_s30 }
 0x11a   :  { %p10727_p0 = por %p10726_p13, %p10725_p12 }
 0x11c   :  { %p10728_p1 = pnand %p10727_p0, %p10721_p11 }
 0x11e   :  { %10731 = shalt.err (!%p10728_p1)
}
 0x11f   :  { %209 = dma.hbm_to_vmem [thread:$0]  %s11497_s15, 1024, %s11111_s5, [#allocation27], %s10799_s20, %s10799_s20, %s10800_s21  }
 0x120   :  { %10776 = dma.done.wait [#allocation3], 128  }
 0x121   :  { %10777 = vsyncadd [#allocation3], 4294967168 }
 0x122   :  { %10778 = dma.done.wait [#allocation6], 1040  }
 0x123   :  { %10779 = vsyncadd [#allocation6], 4294966256 }
 0x124   :  { %10780 = dma.done.wait [#allocation9], 1040  }
 0x125   :  { %10781 = vsyncadd [#allocation9], 4294966256 }
 0x126   :  { %10782 = dma.done.wait [#allocation12], 1040  }
 0x127   :  { %10783 = vsyncadd [#allocation12], 4294966256 }
 0x128   :  { %10784 = dma.done.wait [#allocation15], 12480  }
 0x129   :  { %10785 = vsyncadd [#allocation15], 4294954816 }
 0x12a   :  { %10786 = dma.done.wait [#allocation18], 49344  }
 0x12b   :  { %10787 = vsyncadd [#allocation18], 4294917952 }
 0x12c   :  { %10788 = dma.done.wait [#allocation21], 49344  }
 0x12d   :  { %10789 = vsyncadd [#allocation21], 4294917952 }
 0x12e   :  { %10790 = dma.done.wait [#allocation24], 4112  }
 0x12f   :  { %10791 = vsyncadd [#allocation24], 4294963184 }
 0x130   :  { %10792 = dma.done.wait [#allocation27], 1024  }
 0x131   :  { %10793 = vsyncadd [#allocation27], 4294966272  ;;  %v10818_v0 = vmov 0.0   ;;  %vm10819_vm0 = vmmov 0   ;;  %v9012_v1 = vld [vmem:[#allocation5] sm:$0xff]   ;;  %v9013_v2 = vld [vmem:[#allocation5 + $0x8] sm:$0xff]  }
 0x132   :  { %8830 = vmatprep.subr.bf16.mxu0 %v10818_v0  ;;  %8846 = vmatprep.mubr.msk.bf16.mxu0 %vm10819_vm0, %v10818_v0  ;;  %v9014_v3 = vld [vmem:[#allocation5 + $0x10] sm:$0xff]   ;;  %v9020_v4 = vld [vmem:[#allocation8] sm:$0xff]   ;;  %v9015_v5 = vld [vmem:[#allocation5 + $0x18] sm:$0xff]   ;;  %s10823_s15 = smov [#allocation29]  }
 0x133   :  { %8850 = vmatprep.subr.bf16.mxu1 %v10818_v0  ;;  %8866 = vmatprep.mubr.msk.bf16.mxu1 %vm10819_vm0, %v10818_v0  ;;  %v9021_v6 = vld [vmem:[#allocation8 + $0x8] sm:$0xff]   ;;  %v9016_v7 = vld [vmem:[#allocation5 + $0x20] sm:$0xff]   ;;  %v9019_v10 = vld [vmem:[#allocation5 + $0x38] sm:$0xff]   ;;  %s7795_s20 = sshll.u32 %s10823_s15, 4  ;;  %s7796_s20 = int_to_ptr.vmem [resolvable:$true] %s7795_s20 }
 0x134   :  { %8831 = vmatpush3.bf16.msra.mxu0 %v9012_v1  ;;  %8851 = vmatpush3.bf16.msra.mxu1 %v9020_v4  ;;  %v9017_v8 = vld [vmem:[#allocation5 + $0x28] sm:$0xff]   ;;  %v9018_v9 = vld [vmem:[#allocation5 + $0x30] sm:$0xff]   ;;  %v259_v11 = vld [vmem:[#allocation2] sm:$0xff]  ;;  %s10732_s21 = scalar_lea.vmem %s7796_s20, 128  ;;  %p10737_p3 = scmp.lt.s32.totalorder %s7796_s20, %s7796_s20 }
 0x135   :  { %8832 = vmatprep.subr.bf16.mxu0 %v10818_v0  ;;  %8852 = vmatprep.subr.bf16.mxu1 %v10818_v0  ;;  %v11160_v12 = vpack.c.bf16 %v259_v11, %v259_v11  ;;  %v9022_v13 = vld [vmem:[#allocation8 + $0x10] sm:$0xff]   ;;  %v9023_v14 = vld [vmem:[#allocation8 + $0x18] sm:$0xff]   ;;  %v9024_v15 = vld [vmem:[#allocation8 + $0x20] sm:$0xff]   ;;  %p10733_p2 = scmp.ne.s32.totalorder %s7796_s20, %s10732_s21  ;;  %p10738_p4 = scmp.lt.s32.totalorder %s10732_s21, %s10732_s21 }
 0x136   :  { %v9025_v16 = vld [vmem:[#allocation8 + $0x28] sm:$0xff]   ;;  %v9026_v17 = vld [vmem:[#allocation8 + $0x30] sm:$0xff]   ;;  %v9027_v18 = vld [vmem:[#allocation8 + $0x38] sm:$0xff]  }
 0x137   :  { %v9028_v19 = vld [vmem:[#allocation11] sm:$0xff]   ;;  %v9029_v20 = vld [vmem:[#allocation11 + $0x8] sm:$0xff]   ;;  %v7816_v21 = vld [vmem:[#allocation7] ss:$0 sm:$0xff]  ;;  %p10739_p5 = por %p10738_p4, %p10737_p3 }
 0x138   :  { %8833 = vmatpush3.bf16.msra.mxu0 %v9013_v2  ;;  %8853 = vmatpush3.bf16.msra.mxu1 %v9021_v6  ;;  %v9030_v33 = vld [vmem:[#allocation11 + $0x10] sm:$0xff]   ;;  %v9031_v34 = vld [vmem:[#allocation11 + $0x18] sm:$0xff]   ;;  %v9032_v35 = vld [vmem:[#allocation11 + $0x20] sm:$0xff]  }
 0x139   :  { %8834 = vmatprep.subr.bf16.mxu0 %v10818_v0  ;;  %8854 = vmatprep.subr.bf16.mxu1 %v10818_v0  ;;  %v9033_v36 = vld [vmem:[#allocation11 + $0x28] sm:$0xff]   ;;  %v9034_v37 = vld [vmem:[#allocation11 + $0x30] sm:$0xff]   ;;  %v9035_v38 = vld [vmem:[#allocation11 + $0x38] sm:$0xff]   ;;  %p10740_p6 = pnand %p10739_p5, %p10733_p2 }
 0x13a   :  { %v7826_v39 = vld [vmem:[#allocation10] ss:$0 sm:$0xff]  ;;  %v9036_v51 = vld [vmem:[#allocation14] ss:$48 sps:$4 sm:$0xff]   ;;  %v9038_v52 = vld [vmem:[#allocation14 + $0x4] ss:$48 sps:$4 sm:$0xff]  }
 0x13b   :  { %v9039_v53 = vld [vmem:[#allocation14 + $0x8] ss:$48 sps:$4 sm:$0xff]   ;;  %v9041_v54 = vld [vmem:[#allocation14 + $0xc] ss:$48 sps:$4 sm:$0xff]   ;;  %v9044_v55 = vld [vmem:[#allocation14 + $0x64] ss:$48 sps:$4 sm:$0xff]  }
 0x13c   :  { %8835 = vmatpush3.bf16.msra.mxu0 %v9014_v3  ;;  %8855 = vmatpush3.bf16.msra.mxu1 %v9022_v13  ;;  %v9047_v56 = vld [vmem:[#allocation14 + $0x6c] ss:$48 sps:$4 sm:$0xff]   ;;  %v9042_v57 = vld [vmem:[#allocation14 + $0x60] ss:$48 sps:$4 sm:$0xff]   ;;  %v9045_v58 = vld [vmem:[#allocation14 + $0x68] ss:$48 sps:$4 sm:$0xff]  }
 0x13d   :  { %8836 = vmatprep.subr.bf16.mxu0 %v10818_v0  ;;  %8856 = vmatprep.subr.bf16.mxu1 %v10818_v0  ;;  %v9050_v59 = vld [vmem:[#allocation14 + $0xc4] ss:$48 sps:$4 sm:$0xff]   ;;  %v9053_v60 = vld [vmem:[#allocation14 + $0xcc] ss:$48 sps:$4 sm:$0xff]   ;;  %v9048_v61 = vld [vmem:[#allocation14 + $0xc0] ss:$48 sps:$4 sm:$0xff]  }
 0x13e   :  { %v9051_v62 = vld [vmem:[#allocation14 + $0xc8] ss:$48 sps:$4 sm:$0xff]   ;;  %v9056_v63 = vld [vmem:[#allocation14 + $0x124] ss:$48 sps:$4 sm:$0xff]   ;;  %v9059_v1 = vld [vmem:[#allocation14 + $0x12c] ss:$48 sps:$4 sm:$0xff]  }
 0x13f   :  { %v9054_v2 = vld [vmem:[#allocation14 + $0x120] ss:$48 sps:$4 sm:$0xff]   ;;  %v9057_v3 = vld [vmem:[#allocation14 + $0x128] ss:$48 sps:$4 sm:$0xff]   ;;  %v7836_v4 = vld [vmem:[#allocation13] ss:$0 sm:$0xff] }
 0x140   :  { %8837 = vmatpush3.bf16.msra.mxu0 %v9015_v5  ;;  %8857 = vmatpush3.bf16.msra.mxu1 %v9023_v14  ;;  %v9065_v11 = vld [vmem:[#allocation14 + $0x18c] ss:$48 sps:$4 sm:$0xff]   ;;  %v9060_v13 = vld [vmem:[#allocation14 + $0x180] ss:$48 sps:$4 sm:$0xff]   ;;  %v9063_v14 = vld [vmem:[#allocation14 + $0x188] ss:$48 sps:$4 sm:$0xff]  }
 0x141   :  { %8838 = vmatprep.subr.bf16.mxu0 %v10818_v0  ;;  %8858 = vmatprep.subr.bf16.mxu1 %v10818_v0 }
 0x144   :  { %8839 = vmatpush3.bf16.msra.mxu0 %v9016_v7  ;;  %8859 = vmatpush3.bf16.msra.mxu1 %v9024_v15  ;;  %v9066_v15 = vld [vmem:[#allocation14 + $0x1e0] ss:$48 sps:$4 sm:$0xff]  }
 0x145   :  { %8840 = vmatprep.subr.bf16.mxu0 %v10818_v0  ;;  %8860 = vmatprep.subr.bf16.mxu1 %v10818_v0 }
 0x148   :  { %8841 = vmatpush3.bf16.msra.mxu0 %v9017_v8  ;;  %8861 = vmatpush3.bf16.msra.mxu1 %v9025_v16  ;;  %v9068_v16 = vld [vmem:[#allocation14 + $0x1e4] ss:$48 sps:$4 sm:$0xff]  }
 0x149   :  { %8842 = vmatprep.subr.bf16.mxu0 %v10818_v0  ;;  %8862 = vmatprep.subr.bf16.mxu1 %v10818_v0 }
 0x14c   :  { %8843 = vmatpush3.bf16.msra.mxu0 %v9018_v9  ;;  %8863 = vmatpush3.bf16.msra.mxu1 %v9026_v17  ;;  %v9069_v17 = vld [vmem:[#allocation14 + $0x1e8] ss:$48 sps:$4 sm:$0xff]  }
 0x14d   :  { %8844 = vmatprep.subr.bf16.mxu0 %v10818_v0  ;;  %8864 = vmatprep.subr.bf16.mxu1 %v10818_v0 }
 0x150   :  { %8845 = vmatpush3.bf16.msra.mxu0 %v9019_v10  ;;  %8865 = vmatpush3.bf16.msra.mxu1 %v9027_v18  ;;  %v9062_v10 = vld [vmem:[#allocation14 + $0x184] ss:$48 sps:$4 sm:$0xff]   ;;  %v9071_v18 = vld [vmem:[#allocation14 + $0x1ec] ss:$48 sps:$4 sm:$0xff]  }
 0x151   :  { %8870 = vmatprep.subr.bf16.mxu0 %v10818_v0  ;;  %1271 = vmatprep.subr.bf16.mxu1 %v9038_v52  ;;  %v9122_v52 = vld [vmem:[#allocation14 + $0x254] ss:$48 sps:$4 sm:$0xff]  }
 0x153   :  { %8847 = vmatmul.mubr.bf16.vlgmr.msra.gmra.mrb[0].mxu0 %v11160_v12 }
 0x154   :  { %8886 = vmatprep.mubr.msk.bf16.mxu0 %vm10819_vm0, %v10818_v0  ;;  %8871 = vmatpush3.bf16.msra.mxu0 %v9028_v19  ;;  %v9074_v19 = vld [vmem:[#allocation14 + $0x244] ss:$48 sps:$4 sm:$0xff]  }
 0x155   :  { %8872 = vmatprep.subr.bf16.mxu0 %v10818_v0 }
 0x158   :  { %8873 = vmatpush3.bf16.msra.mxu0 %v9029_v20  ;;  %v9077_v20 = vld [vmem:[#allocation14 + $0x24c] ss:$48 sps:$4 sm:$0xff]  }
 0x159   :  { %8874 = vmatprep.subr.bf16.mxu0 %v10818_v0 }
 0x15c   :  { %8875 = vmatpush3.bf16.msra.mxu0 %v9030_v33  ;;  %v9095_v33 = vld [vmem:[#allocation14 + $0x7c] ss:$48 sps:$4 sm:$0xff]  }
 0x15d   :  { %8876 = vmatprep.subr.bf16.mxu0 %v10818_v0 }
 0x160   :  { %8877 = vmatpush3.bf16.msra.mxu0 %v9031_v34  ;;  %v9090_v34 = vld [vmem:[#allocation14 + $0x70] ss:$48 sps:$4 sm:$0xff]  }
 0x161   :  { %8878 = vmatprep.subr.bf16.mxu0 %v10818_v0 }
 0x164   :  { %8879 = vmatpush3.bf16.msra.mxu0 %v9032_v35  ;;  %v9093_v35 = vld [vmem:[#allocation14 + $0x78] ss:$48 sps:$4 sm:$0xff]  }
 0x165   :  { %8880 = vmatprep.subr.bf16.mxu0 %v10818_v0 }
 0x168   :  { %8881 = vmatpush3.bf16.msra.mxu0 %v9033_v36  ;;  %v9098_v36 = vld [vmem:[#allocation14 + $0xd4] ss:$48 sps:$4 sm:$0xff]  }
 0x169   :  { %8882 = vmatprep.subr.bf16.mxu0 %v10818_v0 }
 0x16c   :  { %8883 = vmatpush3.bf16.msra.mxu0 %v9034_v37  ;;  %v9101_v37 = vld [vmem:[#allocation14 + $0xdc] ss:$48 sps:$4 sm:$0xff]  }
 0x16d   :  { %8884 = vmatprep.subr.bf16.mxu0 %v10818_v0 }
 0x170   :  { %8885 = vmatpush3.bf16.msra.mxu0 %v9035_v38  ;;  %v9096_v38 = vld [vmem:[#allocation14 + $0xd0] ss:$48 sps:$4 sm:$0xff]  }
 0x171   :  { %1312 = vmatprep.subr.bf16.mxu0 %v9041_v54  ;;  %v9120_v54 = vld [vmem:[#allocation14 + $0x250] ss:$48 sps:$4 sm:$0xff]  }
 0x226   :  { %v366_v22 = vpop.f32.mrb[0].mxu0 }
 0x227   :  { %v367_v23 = vadd.f32 %v7816_v21, %v366_v22  ;;  %v8848_v24 = vpop.f32.mrb[1].mxu0  ;;  %v9072_v21 = vld [vmem:[#allocation14 + $0x240] ss:$48 sps:$4 sm:$0xff]   ;;  %v9075_v22 = vld [vmem:[#allocation14 + $0x248] ss:$48 sps:$4 sm:$0xff]  }
 0x228   :  { %v369_v25 = vpop.f32.mrb[2].mxu0  ;;  %v9083_v24 = vld [vmem:[#allocation14 + $0x2ac] ss:$48 sps:$4 sm:$0xff]  }
 0x229   :  { %v373_v26 = vmin.f32 %v367_v23, 0.0  ;;  %v8849_v27 = vpop.f32.mrb[3].mxu0  ;;  %vm372_vm1 = vcmp.gt.f32.partialorder %v367_v23, 0.0  ;;  %v9078_v25 = vld [vmem:[#allocation14 + $0x2a0] ss:$48 sps:$4 sm:$0xff]  }
 0x22a   :  { %v9086_v27 = vld [vmem:[#allocation14 + $0x14] ss:$48 sps:$4 sm:$0xff]  }
 0x22b   :  { %v374_v28 = vmul.f32 1.442695, %v373_v26  ;;  %v9081_v26 = vld [vmem:[#allocation14 + $0x2a8] ss:$48 sps:$4 sm:$0xff]  }
 0x22d   :  { %10372 = vpow2.f32 %v374_v28  ;;  %v9084_v28 = vld [vmem:[#allocation14 + $0x10] ss:$48 sps:$4 sm:$0xff]  }
 0x237   :  { %v10373_v29 = vpop.eup %10372 }
 0x238   :  { %v7825_v30 = vadd.f32 -1.0, %v10373_v29  ;;  %v9087_v29 = vld [vmem:[#allocation14 + $0x18] ss:$48 sps:$4 sm:$0xff]  }
 0x23a   :  { %v377_v31 = vsel %vm372_vm1, %v367_v23, %v7825_v30  ;;  %v9080_v23 = vld [vmem:[#allocation14 + $0x2a4] ss:$48 sps:$4 sm:$0xff]   ;;  %v9089_v30 = vld [vmem:[#allocation14 + $0x1c] ss:$48 sps:$4 sm:$0xff]  }
 0x23b   :  { %v378_v32 = vpack.c.bf16 %v377_v31, %v377_v31  ;;  %v10820_v31 = vmov 0  }
 0x23c   :  { %9009 = vset.pattern.permute.xlu1 %v10820_v31 }
 0x23d   :  { %8867 = vmatmul.mubr.bf16.vlgmr.msra.gmra.mrb[0].mxu1 %v378_v32  ;;  %v9092_v32 = vld [vmem:[#allocation14 + $0x74] ss:$48 sps:$4 sm:$0xff]  }
 0x23e   :  { %1272 = vmatpush1.bf16.msra.mxu1 %v9036_v51  ;;  %1303 = vmatprep.mubr.bf16.mxu1 %v10820_v31  ;;  %v9117_v51 = vld [vmem:[#allocation14 + $0x1f8] ss:$48 sps:$4 sm:$0xff]  }
 0x23f   :  { %1273 = vmatprep.subr.bf16.mxu1 %v9044_v55  ;;  %v9123_v55 = vld [vmem:[#allocation14 + $0x258] ss:$48 sps:$4 sm:$0xff]  }
 0x242   :  { %1274 = vmatpush1.bf16.msra.mxu1 %v9042_v57  ;;  %v9131_v57 = vld [vmem:[#allocation14 + $0x2bc] ss:$48 sps:$4 sm:$0xff]  }
 0x243   :  { %1275 = vmatprep.subr.bf16.mxu1 %v9050_v59  ;;  %v9129_v59 = vld [vmem:[#allocation14 + $0x2b8] ss:$48 sps:$4 sm:$0xff]  }
 0x246   :  { %1276 = vmatpush1.bf16.msra.mxu1 %v9048_v61  ;;  %v9137_v61 = vld [vmem:[#allocation14 + $0x2c] ss:$48 sps:$4 sm:$0xff]  }
 0x247   :  { %1277 = vmatprep.subr.bf16.mxu1 %v9056_v63  ;;  %v9135_v63 = vld [vmem:[#allocation14 + $0x28] ss:$48 sps:$4 sm:$0xff]  }
 0x24a   :  { %1278 = vmatpush1.bf16.msra.mxu1 %v9054_v2  ;;  %v9143_v2 = vld [vmem:[#allocation14 + $0x8c] ss:$48 sps:$4 sm:$0xff]  }
 0x24b   :  { %1279 = vmatprep.subr.bf16.mxu1 %v9062_v10  ;;  %v9152_v10 = vld [vmem:[#allocation14 + $0x144] ss:$48 sps:$4 sm:$0xff]  }
 0x24e   :  { %1280 = vmatpush1.bf16.msra.mxu1 %v9060_v13  ;;  %v9150_v13 = vld [vmem:[#allocation14 + $0x140] ss:$48 sps:$4 sm:$0xff]  }
 0x24f   :  { %1281 = vmatprep.subr.bf16.mxu1 %v9068_v16  ;;  %v9161_v16 = vld [vmem:[#allocation14 + $0x1ac] ss:$48 sps:$4 sm:$0xff]  }
 0x252   :  { %1282 = vmatpush1.bf16.msra.mxu1 %v9066_v15  ;;  %v9158_v15 = vld [vmem:[#allocation14 + $0x1a4] ss:$48 sps:$4 sm:$0xff]  }
 0x253   :  { %1283 = vmatprep.subr.bf16.mxu1 %v9074_v19  ;;  %v9164_v19 = vld [vmem:[#allocation14 + $0x204] ss:$48 sps:$4 sm:$0xff]  }
 0x256   :  { %1284 = vmatpush1.bf16.msra.mxu1 %v9072_v21  ;;  %v9162_v21 = vld [vmem:[#allocation14 + $0x200] ss:$48 sps:$4 sm:$0xff]  }
 0x257   :  { %1285 = vmatprep.subr.bf16.mxu1 %v9080_v23  ;;  %v9170_v23 = vld [vmem:[#allocation14 + $0x264] ss:$48 sps:$4 sm:$0xff]  }
 0x25a   :  { %1286 = vmatpush1.bf16.msra.mxu1 %v9078_v25  ;;  %v9168_v25 = vld [vmem:[#allocation14 + $0x260] ss:$48 sps:$4 sm:$0xff]  }
 0x25b   :  { %1353 = vmatprep.subr.bf16.mxu1 %v9086_v27  ;;  %v9176_v27 = vld [vmem:[#allocation14 + $0x2c4] ss:$48 sps:$4 sm:$0xff]  }
 0x25d   :  { %1304 = vmatmul.mubr.bf16.vlgmr.msra.gmra.mrb[4].mxu1 %v11160_v12 }
 0x25e   :  { %1354 = vmatpush1.bf16.msra.mxu1 %v9084_v28  ;;  %1385 = vmatprep.mubr.bf16.mxu1 %v10820_v31  ;;  %v9179_v28 = vld [vmem:[#allocation14 + $0x2cc] ss:$48 sps:$4 sm:$0xff]  }
 0x25f   :  { %1355 = vmatprep.subr.bf16.mxu1 %v9092_v32 }
 0x262   :  { %1356 = vmatpush1.bf16.msra.mxu1 %v9090_v34 }
 0x263   :  { %1357 = vmatprep.subr.bf16.mxu1 %v9098_v36  ;;  %v9180_v36 = vld [vmem:[#allocation17] ss:$48 sps:$4 sm:$0xff]  }
 0x266   :  { %1358 = vmatpush1.bf16.msra.mxu1 %v9096_v38  ;;  %v9183_v38 = vld [vmem:[#allocation17 + $0x8] ss:$48 sps:$4 sm:$0xff]  }
 0x310   :  { %v484_v40 = vpop.f32.mrb[0].mxu1 }
 0x311   :  { %v485_v41 = vadd.f32 %v7826_v39, %v484_v40  ;;  %v8868_v42 = vpop.f32.mrb[1].mxu1  ;;  %v9099_v39 = vld [vmem:[#allocation14 + $0xd8] ss:$48 sps:$4 sm:$0xff]   ;;  %v9104_v40 = vld [vmem:[#allocation14 + $0x134] ss:$48 sps:$4 sm:$0xff]  }
 0x312   :  { %v487_v43 = vpop.f32.mrb[2].mxu1  ;;  %v9102_v42 = vld [vmem:[#allocation14 + $0x130] ss:$48 sps:$4 sm:$0xff]   ;;  %1359 = vmatprep.subr.bf16.mxu1 %v9104_v40 }
 0x313   :  { %v491_v44 = vmin.f32 %v485_v41, 0.0  ;;  %v8869_v45 = vpop.f32.mrb[3].mxu1  ;;  %vm490_vm2 = vcmp.gt.f32.partialorder %v485_v41, 0.0  ;;  %v9105_v43 = vld [vmem:[#allocation14 + $0x138] ss:$48 sps:$4 sm:$0xff]   ;;  %1360 = vmatpush1.bf16.msra.mxu1 %v9102_v42 }
 0x314   :  { %v9113_v45 = vld [vmem:[#allocation14 + $0x19c] ss:$48 sps:$4 sm:$0xff]   ;;  %v9188_v40 = vld [vmem:[#allocation17 + $0x64] ss:$48 sps:$4 sm:$0xff]  }
 0x315   :  { %v492_v46 = vmul.f32 1.442695, %v491_v44  ;;  %v9110_v44 = vld [vmem:[#allocation14 + $0x194] ss:$48 sps:$4 sm:$0xff]   ;;  %v9194_v42 = vld [vmem:[#allocation17 + $0xc4] ss:$48 sps:$4 sm:$0xff]  }
 0x316   :  { %1361 = vmatprep.subr.bf16.mxu1 %v9110_v44  ;;  %v9192_v44 = vld [vmem:[#allocation17 + $0xc0] ss:$48 sps:$4 sm:$0xff]  }
 0x317   :  { %10374 = vpow2.f32 %v492_v46  ;;  %v9108_v46 = vld [vmem:[#allocation14 + $0x190] ss:$48 sps:$4 sm:$0xff]  }
 0x318   :  { %1362 = vmatpush1.bf16.msra.mxu1 %v9108_v46  ;;  %v9200_v46 = vld [vmem:[#allocation17 + $0x124] ss:$48 sps:$4 sm:$0xff]  }
 0x321   :  { %v10375_v47 = vpop.eup %10374 }
 0x322   :  { %v7835_v48 = vadd.f32 -1.0, %v10375_v47  ;;  %v9111_v47 = vld [vmem:[#allocation14 + $0x198] ss:$48 sps:$4 sm:$0xff]  }
 0x324   :  { %v495_v49 = vsel %vm490_vm2, %v485_v41, %v7835_v48  ;;  %v9107_v41 = vld [vmem:[#allocation14 + $0x13c] ss:$48 sps:$4 sm:$0xff]   ;;  %v9116_v48 = vld [vmem:[#allocation14 + $0x1f4] ss:$48 sps:$4 sm:$0xff]  }
 0x325   :  { %v496_v50 = vpack.c.bf16 %v495_v49, %v495_v49  ;;  %v9119_v49 = vld [vmem:[#allocation14 + $0x1fc] ss:$48 sps:$4 sm:$0xff]   ;;  %1363 = vmatprep.subr.bf16.mxu1 %v9116_v48 }
 0x326   :  { %v9198_v48 = vld [vmem:[#allocation17 + $0x120] ss:$48 sps:$4 sm:$0xff]  }
 0x327   :  { %8887 = vmatmul.mubr.bf16.vlgmr.msra.gmra.mrb[4].mxu0 %v496_v50  ;;  %v9114_v50 = vld [vmem:[#allocation14 + $0x1f0] ss:$48 sps:$4 sm:$0xff]  }
 0x328   :  { %1313 = vmatpush1.bf16.msra.mxu0 %v9039_v53  ;;  %1344 = vmatprep.mubr.bf16.mxu0 %v10820_v31  ;;  %v9125_v53 = vld [vmem:[#allocation14 + $0x25c] ss:$48 sps:$4 sm:$0xff]  }
 0x329   :  { %1314 = vmatprep.subr.bf16.mxu0 %v9047_v56  ;;  %1364 = vmatpush1.bf16.msra.mxu1 %v9114_v50  ;;  %v9128_v56 = vld [vmem:[#allocation14 + $0x2b4] ss:$48 sps:$4 sm:$0xff]   ;;  %v9206_v50 = vld [vmem:[#allocation17 + $0x184] ss:$48 sps:$4 sm:$0xff]  }
 0x32a   :  { %1365 = vmatprep.subr.bf16.mxu1 %v9122_v52  ;;  %v9204_v52 = vld [vmem:[#allocation17 + $0x180] ss:$48 sps:$4 sm:$0xff]  }
 0x32c   :  { %1315 = vmatpush1.bf16.msra.mxu0 %v9045_v58  ;;  %v9126_v58 = vld [vmem:[#allocation14 + $0x2b0] ss:$48 sps:$4 sm:$0xff]  }
 0x32d   :  { %1316 = vmatprep.subr.bf16.mxu0 %v9053_v60  ;;  %1366 = vmatpush1.bf16.msra.mxu1 %v9120_v54  ;;  %v9134_v60 = vld [vmem:[#allocation14 + $0x24] ss:$48 sps:$4 sm:$0xff]   ;;  %v9212_v54 = vld [vmem:[#allocation17 + $0x1e4] ss:$48 sps:$4 sm:$0xff]  }
 0x32e   :  { %1367 = vmatprep.subr.bf16.mxu1 %v9128_v56  ;;  %v9210_v56 = vld [vmem:[#allocation17 + $0x1e0] ss:$48 sps:$4 sm:$0xff]  }
 0x330   :  { %1317 = vmatpush1.bf16.msra.mxu0 %v9051_v62  ;;  %v9132_v62 = vld [vmem:[#allocation14 + $0x20] ss:$48 sps:$4 sm:$0xff]  }
 0x331   :  { %1318 = vmatprep.subr.bf16.mxu0 %v9059_v1  ;;  %1368 = vmatpush1.bf16.msra.mxu1 %v9126_v58  ;;  %v9140_v1 = vld [vmem:[#allocation14 + $0x84] ss:$48 sps:$4 sm:$0xff]   ;;  %v9218_v58 = vld [vmem:[#allocation17 + $0x244] ss:$48 sps:$4 sm:$0xff]  }
 0x332   :  { %1435 = vmatprep.subr.bf16.mxu1 %v9134_v60  ;;  %v9216_v60 = vld [vmem:[#allocation17 + $0x240] ss:$48 sps:$4 sm:$0xff]  }
 0x334   :  { %1319 = vmatpush1.bf16.msra.mxu0 %v9057_v3  ;;  %1386 = vmatmul.mubr.bf16.vlgmr.msra.gmra.mrb[8].mxu1 %v11160_v12  ;;  %v9138_v3 = vld [vmem:[#allocation14 + $0x80] ss:$48 sps:$4 sm:$0xff]  }
 0x335   :  { %1320 = vmatprep.subr.bf16.mxu0 %v9065_v11  ;;  %1436 = vmatpush1.bf16.msra.mxu1 %v9132_v62  ;;  %v9155_v11 = vld [vmem:[#allocation14 + $0x14c] ss:$48 sps:$4 sm:$0xff]   ;;  %v9224_v62 = vld [vmem:[#allocation17 + $0x2a4] ss:$48 sps:$4 sm:$0xff]  }
 0x336   :  { %1437 = vmatprep.subr.bf16.mxu1 %v9140_v1  ;;  %1467 = vmatprep.mubr.bf16.mxu1 %v10820_v31  ;;  %v9222_v1 = vld [vmem:[#allocation17 + $0x2a0] ss:$48 sps:$4 sm:$0xff]  }
 0x338   :  { %1321 = vmatpush1.bf16.msra.mxu0 %v9063_v14  ;;  %v9153_v14 = vld [vmem:[#allocation14 + $0x148] ss:$48 sps:$4 sm:$0xff]  }
 0x339   :  { %1322 = vmatprep.subr.bf16.mxu0 %v9071_v18  ;;  %1438 = vmatpush1.bf16.msra.mxu1 %v9138_v3  ;;  %v9159_v18 = vld [vmem:[#allocation14 + $0x1a8] ss:$48 sps:$4 sm:$0xff]   ;;  %v9230_v3 = vld [vmem:[#allocation17 + $0x304] ss:$48 sps:$4 sm:$0xff]  }
 0x33c   :  { %1323 = vmatpush1.bf16.msra.mxu0 %v9069_v17  ;;  %v9156_v17 = vld [vmem:[#allocation14 + $0x1a0] ss:$48 sps:$4 sm:$0xff]  }
 0x33d   :  { %1324 = vmatprep.subr.bf16.mxu0 %v9077_v20  ;;  %v9167_v20 = vld [vmem:[#allocation14 + $0x20c] ss:$48 sps:$4 sm:$0xff]  }
 0x340   :  { %1325 = vmatpush1.bf16.msra.mxu0 %v9075_v22  ;;  %v9165_v22 = vld [vmem:[#allocation14 + $0x208] ss:$48 sps:$4 sm:$0xff]  }
 0x341   :  { %1326 = vmatprep.subr.bf16.mxu0 %v9083_v24  ;;  %v9173_v24 = vld [vmem:[#allocation14 + $0x26c] ss:$48 sps:$4 sm:$0xff]  }
 0x344   :  { %1327 = vmatpush1.bf16.msra.mxu0 %v9081_v26  ;;  %v9171_v26 = vld [vmem:[#allocation14 + $0x268] ss:$48 sps:$4 sm:$0xff]  }
 0x345   :  { %1394 = vmatprep.subr.bf16.mxu0 %v9089_v30  ;;  %v9177_v30 = vld [vmem:[#allocation14 + $0x2c8] ss:$48 sps:$4 sm:$0xff]  }
 0x347   :  { %1345 = vmatmul.mubr.bf16.vlgmr.msra.gmra.mrb[8].mxu0 %v11160_v12 }
 0x348   :  { %1395 = vmatpush1.bf16.msra.mxu0 %v9087_v29  ;;  %1426 = vmatprep.mubr.bf16.mxu0 %v10820_v31  ;;  %v9174_v29 = vld [vmem:[#allocation14 + $0x2c0] ss:$48 sps:$4 sm:$0xff]  }
 0x349   :  { %1396 = vmatprep.subr.bf16.mxu0 %v9095_v33 }
 0x34c   :  { %1397 = vmatpush1.bf16.msra.mxu0 %v9093_v35  ;;  %v10821_v35 = vmov 2  }
 0x34d   :  { %1398 = vmatprep.subr.bf16.mxu0 %v9101_v37  ;;  %9011 = vset.pattern.permute.xlu0 %v10821_v35  ;;  %v9182_v37 = vld [vmem:[#allocation17 + $0x4] ss:$48 sps:$4 sm:$0xff]  }
 0x350   :  { %1399 = vmatpush1.bf16.msra.mxu0 %v9099_v39  ;;  %v9185_v39 = vld [vmem:[#allocation17 + $0xc] ss:$48 sps:$4 sm:$0xff]  }
 0x351   :  { %1400 = vmatprep.subr.bf16.mxu0 %v9107_v41  ;;  %v9191_v41 = vld [vmem:[#allocation17 + $0x6c] ss:$48 sps:$4 sm:$0xff]  }
 0x354   :  { %1401 = vmatpush1.bf16.msra.mxu0 %v9105_v43  ;;  %v9197_v43 = vld [vmem:[#allocation17 + $0xcc] ss:$48 sps:$4 sm:$0xff]  }
 0x355   :  { %1402 = vmatprep.subr.bf16.mxu0 %v9113_v45  ;;  %v9195_v45 = vld [vmem:[#allocation17 + $0xc8] ss:$48 sps:$4 sm:$0xff]  }
 0x358   :  { %1403 = vmatpush1.bf16.msra.mxu0 %v9111_v47  ;;  %v9203_v47 = vld [vmem:[#allocation17 + $0x12c] ss:$48 sps:$4 sm:$0xff]  }
 0x359   :  { %1404 = vmatprep.subr.bf16.mxu0 %v9119_v49  ;;  %v9201_v49 = vld [vmem:[#allocation17 + $0x128] ss:$48 sps:$4 sm:$0xff]  }
 0x35c   :  { %1405 = vmatpush1.bf16.msra.mxu0 %v9117_v51  ;;  %v9209_v51 = vld [vmem:[#allocation17 + $0x18c] ss:$48 sps:$4 sm:$0xff]  }
 0x35d   :  { %1406 = vmatprep.subr.bf16.mxu0 %v9125_v53  ;;  %v9207_v53 = vld [vmem:[#allocation17 + $0x188] ss:$48 sps:$4 sm:$0xff]  }
 0x360   :  { %1407 = vmatpush1.bf16.msra.mxu0 %v9123_v55  ;;  %v9215_v55 = vld [vmem:[#allocation17 + $0x1ec] ss:$48 sps:$4 sm:$0xff]  }
 0x361   :  { %1408 = vmatprep.subr.bf16.mxu0 %v9131_v57  ;;  %v9213_v57 = vld [vmem:[#allocation17 + $0x1e8] ss:$48 sps:$4 sm:$0xff]  }
 0x364   :  { %1409 = vmatpush1.bf16.msra.mxu0 %v9129_v59  ;;  %v9221_v59 = vld [vmem:[#allocation17 + $0x24c] ss:$48 sps:$4 sm:$0xff]  }
 0x365   :  { %1476 = vmatprep.subr.bf16.mxu0 %v9137_v61  ;;  %v9219_v61 = vld [vmem:[#allocation17 + $0x248] ss:$48 sps:$4 sm:$0xff]  }
 0x367   :  { %1427 = vmatmul.mubr.bf16.vlgmr.msra.gmra.mrb[12].mxu0 %v11160_v12 }
 0x368   :  { %1477 = vmatpush1.bf16.msra.mxu0 %v9135_v63  ;;  %1508 = vmatprep.mubr.bf16.mxu0 %v10820_v31  ;;  %v9227_v63 = vld [vmem:[#allocation17 + $0x2ac] ss:$48 sps:$4 sm:$0xff]  }
 0x369   :  { %1478 = vmatprep.subr.bf16.mxu0 %v9143_v2  ;;  %v9225_v2 = vld [vmem:[#allocation17 + $0x2a8] ss:$48 sps:$4 sm:$0xff]  }
 0x3fa   :  { %v602_v5 = vpop.f32.mrb[4].mxu0 }
 0x3fb   :  { %v11178_v6 = vadd.f32 %v7836_v4, %v602_v5  ;;  %v8888_v7 = vpop.f32.mrb[5].mxu0  ;;  %v9141_v4 = vld [vmem:[#allocation14 + $0x88] ss:$48 sps:$4 sm:$0xff]   ;;  %v9146_v5 = vld [vmem:[#allocation14 + $0xe4] ss:$48 sps:$4 sm:$0xff]  }
 0x3fc   :  { %v605_v8 = vpop.f32.mrb[6].mxu0  ;;  %v9149_v7 = vld [vmem:[#allocation14 + $0xec] ss:$48 sps:$4 sm:$0xff]   ;;  %1479 = vmatpush1.bf16.msra.mxu0 %v9141_v4  ;;  %1439 = vmatprep.subr.bf16.mxu1 %v9146_v5  ;;  %v9233_v4 = vld [vmem:[#allocation17 + $0x30c] ss:$48 sps:$4 sm:$0xff]  }
 0x3fd   :  { %608 = vmax.xlane.f32.xlu0 %v11178_v6  ;;  %v8889_v9 = vpop.f32.mrb[7].mxu0  ;;  %v9144_v8 = vld [vmem:[#allocation14 + $0xe0] ss:$48 sps:$4 sm:$0xff]   ;;  %1480 = vmatprep.subr.bf16.mxu0 %v9149_v7  ;;  %v9228_v5 = vld [vmem:[#allocation17 + $0x300] ss:$48 sps:$4 sm:$0xff]  }
 0x3fe   :  { %v9147_v9 = vld [vmem:[#allocation14 + $0xe8] ss:$48 sps:$4 sm:$0xff]   ;;  %1440 = vmatpush1.bf16.msra.mxu1 %v9144_v8  ;;  %v9231_v7 = vld [vmem:[#allocation17 + $0x308] ss:$48 sps:$4 sm:$0xff]   ;;  %v9236_v8 = vld [vmem:[#allocation17 + $0x364] ss:$48 sps:$4 sm:$0xff]  }
 0x3ff   :  { %1441 = vmatprep.subr.bf16.mxu1 %v9152_v10  ;;  %v9234_v10 = vld [vmem:[#allocation17 + $0x360] ss:$48 sps:$4 sm:$0xff]  }
 0x400   :  { %1481 = vmatpush1.bf16.msra.mxu0 %v9147_v9  ;;  %v9239_v9 = vld [vmem:[#allocation17 + $0x36c] ss:$48 sps:$4 sm:$0xff]  }
 0x401   :  { %1482 = vmatprep.subr.bf16.mxu0 %v9155_v11  ;;  %v9237_v11 = vld [vmem:[#allocation17 + $0x368] ss:$48 sps:$4 sm:$0xff]  }
 0x402   :  { %1442 = vmatpush1.bf16.msra.mxu1 %v9150_v13  ;;  %v9242_v13 = vld [vmem:[#allocation17 + $0x3c4] ss:$48 sps:$4 sm:$0xff]  }
 0x403   :  { %1443 = vmatprep.subr.bf16.mxu1 %v9158_v15  ;;  %v9240_v15 = vld [vmem:[#allocation17 + $0x3c0] ss:$48 sps:$4 sm:$0xff]  }
 0x404   :  { %1483 = vmatpush1.bf16.msra.mxu0 %v9153_v14  ;;  %v9245_v14 = vld [vmem:[#allocation17 + $0x3cc] ss:$48 sps:$4 sm:$0xff]  }
 0x405   :  { %1484 = vmatprep.subr.bf16.mxu0 %v9161_v16  ;;  %v9243_v16 = vld [vmem:[#allocation17 + $0x3c8] ss:$48 sps:$4 sm:$0xff]  }
 0x406   :  { %1444 = vmatpush1.bf16.msra.mxu1 %v9156_v17  ;;  %v9248_v17 = vld [vmem:[#allocation17 + $0x424] ss:$48 sps:$4 sm:$0xff]  }
 0x407   :  { %1445 = vmatprep.subr.bf16.mxu1 %v9164_v19  ;;  %v731_v19 = vlaneseq }
 0x408   :  { %1485 = vmatpush1.bf16.msra.mxu0 %v9159_v18  ;;  %v9251_v18 = vld [vmem:[#allocation17 + $0x42c] ss:$48 sps:$4 sm:$0xff]  }
 0x409   :  { %1486 = vmatprep.subr.bf16.mxu0 %v9167_v20  ;;  %v9246_v20 = vld [vmem:[#allocation17 + $0x420] ss:$48 sps:$4 sm:$0xff]  }
 0x40a   :  { %1446 = vmatpush1.bf16.msra.mxu1 %v9162_v21  ;;  %v9249_v21 = vld [vmem:[#allocation17 + $0x428] ss:$48 sps:$4 sm:$0xff]  }
 0x40b   :  { %1447 = vmatprep.subr.bf16.mxu1 %v9170_v23  ;;  %v9257_v23 = vld [vmem:[#allocation17 + $0x48c] ss:$48 sps:$4 sm:$0xff]  }
 0x40c   :  { %1487 = vmatpush1.bf16.msra.mxu0 %v9165_v22  ;;  %v9254_v22 = vld [vmem:[#allocation17 + $0x484] ss:$48 sps:$4 sm:$0xff]  }
 0x40d   :  { %1488 = vmatprep.subr.bf16.mxu0 %v9173_v24  ;;  %v11199_v24 = vshrl.u32 %v731_v19, 7 }
 0x40e   :  { %1448 = vmatpush1.bf16.msra.mxu1 %v9168_v25  ;;  %v9252_v25 = vld [vmem:[#allocation17 + $0x480] ss:$48 sps:$4 sm:$0xff]  }
 0x40f   :  { %1449 = vmatprep.subr.bf16.mxu1 %v9176_v27  ;;  %v9255_v27 = vld [vmem:[#allocation17 + $0x488] ss:$48 sps:$4 sm:$0xff]  }
 0x410   :  { %1489 = vmatpush1.bf16.msra.mxu0 %v9171_v26  ;;  %v11202_v26 = vsub.s32 2, %v11199_v24 }
 0x411   :  { %1490 = vmatprep.subr.bf16.mxu0 %v9179_v28  ;;  %v11204_v28 = vld [vmem:[#allocation16] sm:$0xff] }
 0x412   :  { %1450 = vmatpush1.bf16.msra.mxu1 %v9174_v29  ;;  %v742_v29 = vrot.slane %v11204_v28, %v11202_v26 }
 0x413   :  { %3913 = vmatprep.subr.bf16.mxu1 %v9182_v37 }
 0x414   :  { %1491 = vmatpush1.bf16.msra.mxu0 %v9177_v30  ;;  %v11208_v30 = vpop.f32.mrb[4].mxu1 }
 0x415   :  { %1468 = vmatmul.mubr.bf16.vlgmr.msra.gmra.mrb[12].mxu1 %v11160_v12  ;;  %3995 = vmatprep.subr.bf16.mxu0 %v9185_v39 }
 0x416   :  { %3914 = vmatpush1.bf16.msra.mxu1 %v9180_v36 }
 0x417   :  { %1509 = vmatmul.mubr.bf16.vlgmr.msra.gmra.mrb[16].mxu0 %v11160_v12  ;;  %v9186_v12 = vld [vmem:[#allocation17 + $0x60] ss:$48 sps:$4 sm:$0xff]   ;;  %3915 = vmatprep.subr.bf16.mxu1 %v9188_v40  ;;  %v11217_v40 = vsub.s32 6, %v11199_v24 }
 0x418   :  { %3996 = vmatpush1.bf16.msra.mxu0 %v9183_v38 }
 0x419   :  { %3997 = vmatprep.subr.bf16.mxu0 %v9191_v41 }
 0x41a   :  { %3916 = vmatpush1.bf16.msra.mxu1 %v9186_v12  ;;  %v758_v12 = vrot.slane %v11204_v28, %v11217_v40 }
 0x41b   :  { %3917 = vmatprep.subr.bf16.mxu1 %v9194_v42 }
 0x41e   :  { %3918 = vmatpush1.bf16.msra.mxu1 %v9192_v44 }
 0x41f   :  { %3919 = vmatprep.subr.bf16.mxu1 %v9200_v46 }
 0x422   :  { %3920 = vmatpush1.bf16.msra.mxu1 %v9198_v48 }
 0x423   :  { %3921 = vmatprep.subr.bf16.mxu1 %v9206_v50  ;;  %v11229_v50 = vld [vmem:[#allocation16 + $0x8] sm:$0xf] }
 0x426   :  { %3922 = vmatpush1.bf16.msra.mxu1 %v9204_v52 }
 0x427   :  { %3923 = vmatprep.subr.bf16.mxu1 %v9212_v54 }
 0x42a   :  { %3924 = vmatpush1.bf16.msra.mxu1 %v9210_v56 }
 0x42b   :  { %3925 = vmatprep.subr.bf16.mxu1 %v9218_v58 }
 0x42e   :  { %3926 = vmatpush1.bf16.msra.mxu1 %v9216_v60 }
 0x42f   :  { %3927 = vmatprep.subr.bf16.mxu1 %v9224_v62  ;;  %v9258_v62 = vld [vmem:[#allocation17 + $0x4e0] ss:$48 sps:$4 sm:$0xff]  }
 0x432   :  { %3928 = vmatpush1.bf16.msra.mxu1 %v9222_v1 }
 0x433   :  { %3929 = vmatprep.subr.bf16.mxu1 %v9230_v3  ;;  %v9263_v3 = vld [vmem:[#allocation17 + $0x4ec] ss:$48 sps:$4 sm:$0xff]  }
 0x436   :  { %3930 = vmatpush1.bf16.msra.mxu1 %v9228_v5  ;;  %v9264_v5 = vld [vmem:[#allocation17 + $0x540] ss:$48 sps:$4 sm:$0xff]  }
 0x437   :  { %3931 = vmatprep.subr.bf16.mxu1 %v9236_v8  ;;  %v9269_v8 = vld [vmem:[#allocation17 + $0x54c] ss:$48 sps:$4 sm:$0xff]  }
 0x43a   :  { %3932 = vmatpush1.bf16.msra.mxu1 %v9234_v10  ;;  %v9275_v10 = vld [vmem:[#allocation17 + $0x5ac] ss:$48 sps:$4 sm:$0xff]  }
 0x43b   :  { %3933 = vmatprep.subr.bf16.mxu1 %v9242_v13  ;;  %v9273_v13 = vld [vmem:[#allocation17 + $0x5a8] ss:$48 sps:$4 sm:$0xff]  }
 0x43e   :  { %3934 = vmatpush1.bf16.msra.mxu1 %v9240_v15  ;;  %v9281_v15 = vld [vmem:[#allocation17 + $0x60c] ss:$48 sps:$4 sm:$0xff]  }
 0x43f   :  { %3935 = vmatprep.subr.bf16.mxu1 %v9248_v17  ;;  %v11242_v17 = vsub.s32 0, %v11199_v24 }
 0x442   :  { %3936 = vmatpush1.bf16.msra.mxu1 %v9246_v20  ;;  %v11248_v20 = vsub.s32 1, %v11199_v24 }
 0x443   :  { %3937 = vmatprep.subr.bf16.mxu1 %v9254_v22  ;;  %v11254_v22 = vsub.s32 5, %v11199_v24 }
 0x446   :  { %3938 = vmatpush1.bf16.msra.mxu1 %v9252_v25  ;;  %v734_v25 = vrot.slane %v11204_v28, %v11242_v17 }
 0x48a   :  { %v609_v31 = vpop.xlane.xlu0 %608 }
 0x48b   :  { %v610_v32 = vsub.f32 %v11178_v6, %v609_v31  ;;  %v9189_v6 = vld [vmem:[#allocation17 + $0x68] ss:$48 sps:$4 sm:$0xff]   ;;  %v1346_v31 = vpop.f32.mrb[8].mxu0 }
 0x48c   :  { %3998 = vmatpush1.bf16.msra.mxu0 %v9189_v6  ;;  %v11214_v35 = vpop.f32.mrb[9].mxu0 }
 0x48d   :  { %v611_v33 = vmul.f32 1.442695, %v610_v32  ;;  %3999 = vmatprep.subr.bf16.mxu0 %v9197_v43  ;;  %v11210_v32 = vpop.f32.mrb[5].mxu1  ;;  %v1350_v37 = vpop.f32.mrb[10].mxu0 }
 0x48e   :  { %v1309_v36 = vpop.f32.mrb[6].mxu1  ;;  %v1351_v39 = vpop.f32.mrb[11].mxu0 }
 0x48f   :  { %10376 = vpow2.f32 %v611_v33  ;;  %v11212_v33 = vadd.f32 %v1346_v31, %v742_v29  ;;  %v1310_v38 = vpop.f32.mrb[7].mxu1  ;;  %v1428_v6 = vpop.f32.mrb[12].mxu0  ;;  %v738_v29 = vrot.slane %v11204_v28, %v11248_v20  ;;  %v766_v31 = vrot.slane %v11229_v50, %v11242_v17 }
 0x490   :  { %4000 = vmatpush1.bf16.msra.mxu0 %v9195_v45  ;;  %v11221_v41 = vpop.f32.mrb[8].mxu1  ;;  %v11225_v43 = vadd.f32 %v1428_v6, %v758_v12  ;;  %v11227_v44 = vpop.f32.mrb[13].mxu0  ;;  %v770_v36 = vrot.slane %v11229_v50, %v11248_v20  ;;  %v754_v38 = vrot.slane %v11204_v28, %v11254_v22  ;;  %v1306_v6 = vadd.f32 %v11208_v30, %v734_v25  ;;  %v9288_v25 = vld [vmem:[#allocation17 + $0x6c0] ss:$48 sps:$4 sm:$0xff]  }
 0x491   :  { %4001 = vmatprep.subr.bf16.mxu0 %v9203_v47  ;;  %v11223_v42 = vpop.f32.mrb[9].mxu1  ;;  %v1432_v46 = vpop.f32.mrb[14].mxu0 }
 0x492   :  { %v1391_v45 = vpop.f32.mrb[10].mxu1  ;;  %v1433_v48 = vpop.f32.mrb[15].mxu0  ;;  %v1308_v46 = vadd.f32 %v11210_v32, %v738_v29  ;;  %v9296_v29 = vld [vmem:[#allocation17 + $0x724] ss:$48 sps:$4 sm:$0xff]  }
 0x493   :  { %v1392_v47 = vpop.f32.mrb[11].mxu1 }
 0x494   :  { %4002 = vmatpush1.bf16.msra.mxu0 %v9201_v49 }
 0x495   :  { %4003 = vmatprep.subr.bf16.mxu0 %v9209_v51  ;;  %v774_v51 = vrot.slane %v11229_v50, %v11202_v26 }
 0x498   :  { %4004 = vmatpush1.bf16.msra.mxu0 %v9207_v53 }
 0x499   :  { %v11195_v34 = vpop.eup %10376  ;;  %4005 = vmatprep.subr.bf16.mxu0 %v9215_v55 }
 0x49a   :  { %613 = vadd.xlane.f32.xlu0 %v11195_v34 }
 0x49c   :  { %4006 = vmatpush1.bf16.msra.mxu0 %v9213_v57 }
 0x49d   :  { %4007 = vmatprep.subr.bf16.mxu0 %v9221_v59 }
 0x4a0   :  { %4008 = vmatpush1.bf16.msra.mxu0 %v9219_v61 }
 0x4a1   :  { %4009 = vmatprep.subr.bf16.mxu0 %v9227_v63  ;;  %v9260_v63 = vld [vmem:[#allocation17 + $0x4e4] ss:$48 sps:$4 sm:$0xff]  }
 0x4a2   :  { %3939 = vmatprep.subr.bf16.mxu1 %v9260_v63 }
 0x4a3   :  { %3940 = vmatpush1.bf16.msra.mxu1 %v9258_v62 }
 0x4a4   :  { %4010 = vmatpush1.bf16.msra.mxu0 %v9225_v2  ;;  %v9261_v2 = vld [vmem:[#allocation17 + $0x4e8] ss:$48 sps:$4 sm:$0xff]  }
 0x4a5   :  { %4011 = vmatprep.subr.bf16.mxu0 %v9233_v4  ;;  %v10822_v4 = vmov 1  }
 0x4a8   :  { %4012 = vmatpush1.bf16.msra.mxu0 %v9231_v7  ;;  %v9266_v7 = vld [vmem:[#allocation17 + $0x544] ss:$48 sps:$4 sm:$0xff]  }
 0x4a9   :  { %4013 = vmatprep.subr.bf16.mxu0 %v9239_v9  ;;  %v9272_v9 = vld [vmem:[#allocation17 + $0x5a4] ss:$48 sps:$4 sm:$0xff]   ;;  %3941 = vmatprep.subr.bf16.mxu1 %v9266_v7 }
 0x4aa   :  { %3942 = vmatpush1.bf16.msra.mxu1 %v9264_v5 }
 0x4ab   :  { %3943 = vmatprep.subr.bf16.mxu1 %v9272_v9 }
 0x4ac   :  { %4014 = vmatpush1.bf16.msra.mxu0 %v9237_v11  ;;  %v9270_v11 = vld [vmem:[#allocation17 + $0x5a0] ss:$48 sps:$4 sm:$0xff]  }
 0x4ad   :  { %4015 = vmatprep.subr.bf16.mxu0 %v9245_v14  ;;  %v9278_v14 = vld [vmem:[#allocation17 + $0x604] ss:$48 sps:$4 sm:$0xff]  }
 0x4ae   :  { %3944 = vmatpush1.bf16.msra.mxu1 %v9270_v11 }
 0x4af   :  { %3954 = vmatprep.subr.bf16.mxu1 %v9278_v14  ;;  %v9285_v14 = vld [vmem:[#allocation17 + $0x668] ss:$48 sps:$4 sm:$0xff]  }
 0x4b0   :  { %4016 = vmatpush1.bf16.msra.mxu0 %v9243_v16  ;;  %v11239_v16 = vsub.s32 3, %v11199_v24 }
 0x4b1   :  { %4017 = vmatprep.subr.bf16.mxu0 %v9251_v18  ;;  %v11245_v18 = vsub.s32 7, %v11199_v24 }
 0x4b4   :  { %4018 = vmatpush1.bf16.msra.mxu0 %v9249_v21  ;;  %v11251_v21 = vsub.s32 4, %v11199_v24  ;;  %v778_v24 = vrot.slane %v11229_v50, %v11239_v16 }
 0x4b5   :  { %4019 = vmatprep.subr.bf16.mxu0 %v9257_v23  ;;  %v746_v23 = vrot.slane %v11204_v28, %v11239_v16 }
 0x4b6   :  { %v750_v37 = vrot.slane %v11204_v28, %v11251_v21 }
 0x4b7   :  { %v1349_v12 = vadd.f32 %v11214_v35, %v746_v23  ;;  %v9293_v23 = vld [vmem:[#allocation17 + $0x6cc] ss:$48 sps:$4 sm:$0xff]  }
 0x4b8   :  { %4020 = vmatpush1.bf16.msra.mxu0 %v9255_v27  ;;  %v762_v27 = vrot.slane %v11204_v28, %v11245_v18  ;;  %v1388_v50 = vadd.f32 %v11221_v41, %v750_v37  ;;  %v9302_v37 = vld [vmem:[#allocation17 + $0x784] ss:$48 sps:$4 sm:$0xff]  }
 0x4b9   :  { %4021 = vmatprep.subr.bf16.mxu0 %v9263_v3 }
 0x4ba   :  { %v1431_v45 = vadd.f32 %v11227_v44, %v762_v27  ;;  %v9291_v27 = vld [vmem:[#allocation17 + $0x6c8] ss:$48 sps:$4 sm:$0xff]  }
 0x4bc   :  { %4022 = vmatpush1.bf16.msra.mxu0 %v9261_v2 }
 0x4bd   :  { %4023 = vmatprep.subr.bf16.mxu0 %v9269_v8  ;;  %v9279_v8 = vld [vmem:[#allocation17 + $0x608] ss:$48 sps:$4 sm:$0xff]  }
 0x4e8   :  { %v11233_v52 = vpop.f32.mrb[12].mxu1 }
 0x4e9   :  { %v1471_v56 = vpop.f32.mrb[13].mxu1  ;;  %v1470_v47 = vadd.f32 %v11233_v52, %v766_v31  ;;  %v9299_v31 = vld [vmem:[#allocation17 + $0x72c] ss:$48 sps:$4 sm:$0xff]  }
 0x4ea   :  { %v1510_v53 = vpop.f32.mrb[16].mxu0  ;;  %v1473_v59 = vpop.f32.mrb[14].mxu1  ;;  %v1472_v48 = vadd.f32 %v1471_v56, %v770_v36  ;;  %v9294_v36 = vld [vmem:[#allocation17 + $0x720] ss:$48 sps:$4 sm:$0xff]  }
 0x4eb   :  { %v11235_v55 = vadd.f32 %v1510_v53, %v774_v51  ;;  %v1512_v57 = vpop.f32.mrb[17].mxu0  ;;  %v1474_v61 = vpop.f32.mrb[15].mxu1  ;;  %v1390_v51 = vadd.f32 %v11223_v42, %v754_v38  ;;  %v9305_v38 = vld [vmem:[#allocation17 + $0x78c] ss:$48 sps:$4 sm:$0xff]  }
 0x4ec   :  { %v1514_v60 = vpop.f32.mrb[18].mxu0 }
 0x4ed   :  { %v1515_v1 = vpop.f32.mrb[19].mxu0 }
 0x527   :  { %v614_v49 = vpop.xlane.xlu0 %613 }
 0x528   :  { %10378 = vrcp.f32 %v614_v49  ;;  %v1513_v49 = vadd.f32 %v1512_v57, %v778_v24  ;;  %v9297_v24 = vld [vmem:[#allocation17 + $0x728] ss:$48 sps:$4 sm:$0xff]  }
 0x532   :  { %v10379_v54 = vpop.eup %10378 }
 0x533   :  { %v616_v58 = vmul.f32 %v10379_v54, %v11195_v34  ;;  %v9267_v34 = vld [vmem:[#allocation17 + $0x548] ss:$48 sps:$4 sm:$0xff]  }
 0x534   :  { %4024 = vmatpush1.bf16.msra.mxu0 %v9267_v34  ;;  %v9276_v34 = vld [vmem:[#allocation17 + $0x600] ss:$48 sps:$4 sm:$0xff]  }
 0x535   :  { %628 = vperm.xlu0 %9011, %v616_v58   ;;  %617 = vst [vmem:[#allocation29] sm:$0xff] %v616_v58  ;;  %620 = vperm.xlu1 %9009, %v616_v58  }
 0x536   :  { %4025 = vmatprep.subr.bf16.mxu0 %v9275_v10  ;;  %v9287_v10 = vld [vmem:[#allocation17 + $0x66c] ss:$48 sps:$4 sm:$0xff]  }
 0x538   :  { %4026 = vmatpush1.bf16.msra.mxu0 %v9273_v13  ;;  %v9282_v13 = vld [vmem:[#allocation17 + $0x660] ss:$48 sps:$4 sm:$0xff]  }
 0x539   :  { %9010 = vset.pattern.permute.xlu1 %v10822_v4  ;;  %4036 = vmatprep.subr.bf16.mxu0 %v9281_v15  ;;  %v9290_v15 = vld [vmem:[#allocation17 + $0x6c4] ss:$48 sps:$4 sm:$0xff]  }
 0x53a   :  { %624 = vperm.xlu1 %9010, %v616_v58  }
 0x5b4   :  { %v11274_v39 = vpop.permute.xlu1 %620  ;;  %v11283_v53 = vpop.permute.xlu0 %628 }
 0x5b5   :  { %v1518_v35 = vmul.f32 %v1308_v46, %v11274_v39  ;;  %v1517_v30 = vmul.f32 %v1306_v6, %v11274_v39  ;;  %v1520_v44 = vmul.f32 %v1349_v12, %v11274_v39  ;;  %v1519_v32 = vmul.f32 %v11212_v33, %v11274_v39  ;;  %v9300_v12 = vld [vmem:[#allocation17 + $0x780] ss:$48 sps:$4 sm:$0xff]   ;;  %v9303_v6 = vld [vmem:[#allocation17 + $0x788] ss:$48 sps:$4 sm:$0xff]   ;;  %v9311_v46 = vld [vmem:[#allocation17 + $0x7ec] ss:$48 sps:$4 sm:$0xff]  }
 0x5b6   :  { %v1530_v56 = vmul.f32 %v1472_v48, %v11283_v53  ;;  %v1529_v57 = vmul.f32 %v1470_v47, %v11283_v53  ;;  %v1532_v58 = vmul.f32 %v1513_v49, %v11283_v53  ;;  %v1531_v59 = vmul.f32 %v11235_v55, %v11283_v53  ;;  %v9284_v55 = vld [vmem:[#allocation17 + $0x664] ss:$48 sps:$4 sm:$0xff]   ;;  %v9306_v47 = vld [vmem:[#allocation17 + $0x7e0] ss:$48 sps:$4 sm:$0xff]   ;;  %v9309_v48 = vld [vmem:[#allocation17 + $0x7e8] ss:$48 sps:$4 sm:$0xff]  }
 0x5b7   :  { %v9314_v49 = vld [vmem:[#allocation17 + $0x844] ss:$48 sps:$4 sm:$0xff]  }
 0x5b9   :  { %v11285_v28 = vpop.permute.xlu1 %624 }
 0x5ba   :  { %v1522_v52 = vmul.f32 %v1390_v51, %v11285_v28  ;;  %v1521_v54 = vmul.f32 %v1388_v50, %v11285_v28  ;;  %v1524_v41 = vmul.f32 %v1431_v45, %v11285_v28  ;;  %v1523_v42 = vmul.f32 %v11225_v43, %v11285_v28  ;;  %v9308_v45 = vld [vmem:[#allocation17 + $0x7e4] ss:$48 sps:$4 sm:$0xff]   ;;  %v9317_v50 = vld [vmem:[#allocation17 + $0x84c] ss:$48 sps:$4 sm:$0xff]   ;;  %v9312_v51 = vld [vmem:[#allocation17 + $0x840] ss:$48 sps:$4 sm:$0xff]  }
 0x5bc   :  { %v1526_v60 = vadd.f32 %v1522_v52, %v1518_v35  ;;  %v1525_v33 = vadd.f32 %v1521_v54, %v1517_v30  ;;  %v1528_v61 = vadd.f32 %v1524_v41, %v1520_v44  ;;  %v1527_v62 = vadd.f32 %v1523_v42, %v1519_v32  ;;  %v9315_v35 = vld [vmem:[#allocation17 + $0x848] ss:$48 sps:$4 sm:$0xff]   ;;  %v9320_v30 = vld [vmem:[#allocation17 + $0x8a4] ss:$48 sps:$4 sm:$0xff]   ;;  %v9323_v44 = vld [vmem:[#allocation17 + $0x8ac] ss:$48 sps:$4 sm:$0xff]  }
 0x5bd   :  { %v9318_v32 = vld [vmem:[#allocation17 + $0x8a0] ss:$48 sps:$4 sm:$0xff]   ;;  %v9321_v52 = vld [vmem:[#allocation17 + $0x8a8] ss:$48 sps:$4 sm:$0xff]   ;;  %v9326_v54 = vld [vmem:[#allocation17 + $0x904] ss:$48 sps:$4 sm:$0xff]  }
 0x5be   :  { %v1534_v63 = vadd.f32 %v1530_v56, %v1526_v60  ;;  %v1533_v1 = vadd.f32 %v1529_v57, %v1525_v33  ;;  %v1536_v2 = vadd.f32 %v1532_v58, %v1528_v61  ;;  %v11302_v3 = vadd.f32 %v1531_v59, %v1527_v62  ;;  %v9329_v41 = vld [vmem:[#allocation17 + $0x90c] ss:$48 sps:$4 sm:$0xff]   ;;  %v9324_v42 = vld [vmem:[#allocation17 + $0x900] ss:$48 sps:$4 sm:$0xff]   ;;  %v9327_v56 = vld [vmem:[#allocation17 + $0x908] ss:$48 sps:$4 sm:$0xff]  }
 0x5bf   :  { %v9332_v57 = vld [vmem:[#allocation17 + $0x964] ss:$48 sps:$4 sm:$0xff]   ;;  %v9335_v58 = vld [vmem:[#allocation17 + $0x96c] ss:$48 sps:$4 sm:$0xff]   ;;  %v9330_v59 = vld [vmem:[#allocation17 + $0x960] ss:$48 sps:$4 sm:$0xff]  }
 0x5c0   :  { %v1538_v4 = vmax.f32 %v1534_v63, 0.0  ;;  %v1537_v43 = vmax.f32 %v1533_v1, 0.0  ;;  %v1540_v5 = vmax.f32 %v1536_v2, 0.0  ;;  %v9333_v60 = vld [vmem:[#allocation17 + $0x968] ss:$48 sps:$4 sm:$0xff]  }
 0x5c1   :  { %v9338_v33 = vld [vmem:[#allocation17 + $0x9c4] ss:$48 sps:$4 sm:$0xff]   ;;  %v9341_v61 = vld [vmem:[#allocation17 + $0x9cc] ss:$48 sps:$4 sm:$0xff]   ;;  %v9336_v62 = vld [vmem:[#allocation17 + $0x9c0] ss:$48 sps:$4 sm:$0xff]  }
 0x5c2   :  { %v11304_v7 = vpack.c.bf16 %v1538_v4, %v1538_v4  ;;  %v11306_v9 = vpack.c.bf16 %v1537_v43, %v1537_v43  ;;  %v11312_v11 = vpack.c.bf16 %v1540_v5, %v1540_v5  ;;  %v9339_v63 = vld [vmem:[#allocation17 + $0x9c8] ss:$48 sps:$4 sm:$0xff]   ;;  %v9344_v1 = vld [vmem:[#allocation17 + $0xa24] ss:$48 sps:$4 sm:$0xff]   ;;  %v9347_v2 = vld [vmem:[#allocation17 + $0xa2c] ss:$48 sps:$4 sm:$0xff]  }
 0x5c3   :  { %v9342_v4 = vld [vmem:[#allocation17 + $0xa20] ss:$48 sps:$4 sm:$0xff]   ;;  %v9345_v43 = vld [vmem:[#allocation17 + $0xa28] ss:$48 sps:$4 sm:$0xff]   ;;  %v9350_v5 = vld [vmem:[#allocation17 + $0xa84] ss:$48 sps:$4 sm:$0xff]  }
 0x5c4   :  { %3945 = vmatprep.mubr.bf16.mxu1 %v11304_v7  ;;  %4027 = vmatprep.mubr.bf16.mxu0 %v11304_v7 }
 0x5c5   :  { %3946 = vmatmul.mubr.bf16.vlgmr.msra.gmra.mrb[16].mxu1 %v11306_v9  ;;  %4028 = vmatmul.mubr.bf16.vlgmr.msra.gmra.mrb[20].mxu0 %v11306_v9 }
 0x5c6   :  { %3955 = vmatpush1.bf16.msra.mxu1 %v9276_v34  ;;  %4037 = vmatpush1.bf16.msra.mxu0 %v9279_v8  ;;  %v9353_v34 = vld [vmem:[#allocation17 + $0xa8c] ss:$48 sps:$4 sm:$0xff]   ;;  %v9348_v8 = vld [vmem:[#allocation17 + $0xa80] ss:$48 sps:$4 sm:$0xff]  }
 0x5c7   :  { %3986 = vmatprep.mubr.bf16.mxu1 %v11312_v11  ;;  %4068 = vmatprep.mubr.bf16.mxu0 %v11312_v11 }
 0x5c8   :  { %3956 = vmatprep.subr.bf16.mxu1 %v9284_v55  ;;  %4038 = vmatprep.subr.bf16.mxu0 %v9287_v10  ;;  %v9351_v55 = vld [vmem:[#allocation17 + $0xa88] ss:$48 sps:$4 sm:$0xff]   ;;  %v9356_v10 = vld [vmem:[#allocation17 + $0xae4] ss:$48 sps:$4 sm:$0xff]  }
 0x5ca   :  { %3957 = vmatpush1.bf16.msra.mxu1 %v9282_v13  ;;  %4039 = vmatpush1.bf16.msra.mxu0 %v9285_v14  ;;  %v9359_v13 = vld [vmem:[#allocation17 + $0xaec] ss:$48 sps:$4 sm:$0xff]   ;;  %v9354_v14 = vld [vmem:[#allocation17 + $0xae0] ss:$48 sps:$4 sm:$0xff]  }
 0x5cb   :  { %3958 = vmatprep.subr.bf16.mxu1 %v9290_v15  ;;  %4040 = vmatprep.subr.bf16.mxu0 %v9293_v23  ;;  %v9357_v15 = vld [vmem:[#allocation17 + $0xae8] ss:$48 sps:$4 sm:$0xff]   ;;  %v9362_v23 = vld [vmem:[#allocation17 + $0xb44] ss:$48 sps:$4 sm:$0xff]  }
 0x5ce   :  { %3959 = vmatpush1.bf16.msra.mxu1 %v9288_v25  ;;  %4041 = vmatpush1.bf16.msra.mxu0 %v9291_v27  ;;  %v9365_v25 = vld [vmem:[#allocation17 + $0xb4c] ss:$48 sps:$4 sm:$0xff]   ;;  %v9360_v27 = vld [vmem:[#allocation17 + $0xb40] ss:$48 sps:$4 sm:$0xff]  }
 0x5cf   :  { %3960 = vmatprep.subr.bf16.mxu1 %v9296_v29  ;;  %4042 = vmatprep.subr.bf16.mxu0 %v9299_v31  ;;  %v9363_v29 = vld [vmem:[#allocation17 + $0xb48] ss:$48 sps:$4 sm:$0xff]   ;;  %v9368_v31 = vld [vmem:[#allocation17 + $0xba4] ss:$48 sps:$4 sm:$0xff]  }
 0x5d2   :  { %3961 = vmatpush1.bf16.msra.mxu1 %v9294_v36  ;;  %4043 = vmatpush1.bf16.msra.mxu0 %v9297_v24  ;;  %v9371_v36 = vld [vmem:[#allocation17 + $0xbac] ss:$48 sps:$4 sm:$0xff]   ;;  %v9366_v24 = vld [vmem:[#allocation17 + $0xba0] ss:$48 sps:$4 sm:$0xff]  }
 0x5d3   :  { %3962 = vmatprep.subr.bf16.mxu1 %v9302_v37  ;;  %4044 = vmatprep.subr.bf16.mxu0 %v9305_v38  ;;  %v9369_v37 = vld [vmem:[#allocation17 + $0xba8] ss:$48 sps:$4 sm:$0xff]   ;;  %v1539_v38 = vmax.f32 %v11302_v3, 0.0  ;;  %v9378_v3 = vld [vmem:[#allocation17 + $0x70] ss:$48 sps:$4 sm:$0xff]  }
 0x5d6   :  { %3963 = vmatpush1.bf16.msra.mxu1 %v9300_v12  ;;  %4045 = vmatpush1.bf16.msra.mxu0 %v9303_v6  ;;  %v9374_v12 = vld [vmem:[#allocation17 + $0x14] ss:$48 sps:$4 sm:$0xff]   ;;  %v9377_v6 = vld [vmem:[#allocation17 + $0x1c] ss:$48 sps:$4 sm:$0xff]  }
 0x5d7   :  { %3964 = vmatprep.subr.bf16.mxu1 %v9308_v45  ;;  %4046 = vmatprep.subr.bf16.mxu0 %v9311_v46  ;;  %v9372_v45 = vld [vmem:[#allocation17 + $0x10] ss:$48 sps:$4 sm:$0xff]   ;;  %v11317_v46 = vpack.c.bf16 %v1539_v38, %v1539_v38 }
 0x5d8   :  { %v9438_v38 = vld [vmem:[#allocation17 + $0x430] ss:$48 sps:$4 sm:$0xff]  }
 0x5da   :  { %3965 = vmatpush1.bf16.msra.mxu1 %v9306_v47  ;;  %4047 = vmatpush1.bf16.msra.mxu0 %v9309_v48  ;;  %v9375_v47 = vld [vmem:[#allocation17 + $0x18] ss:$48 sps:$4 sm:$0xff]   ;;  %v9380_v48 = vld [vmem:[#allocation17 + $0x74] ss:$48 sps:$4 sm:$0xff]  }
 0x5db   :  { %3966 = vmatprep.subr.bf16.mxu1 %v9314_v49  ;;  %4048 = vmatprep.subr.bf16.mxu0 %v9317_v50  ;;  %v9383_v49 = vld [vmem:[#allocation17 + $0x7c] ss:$48 sps:$4 sm:$0xff]   ;;  %v9381_v50 = vld [vmem:[#allocation17 + $0x78] ss:$48 sps:$4 sm:$0xff]  }
 0x5de   :  { %3967 = vmatpush1.bf16.msra.mxu1 %v9312_v51  ;;  %4049 = vmatpush1.bf16.msra.mxu0 %v9315_v35  ;;  %v9386_v51 = vld [vmem:[#allocation17 + $0xd4] ss:$48 sps:$4 sm:$0xff]   ;;  %v9389_v35 = vld [vmem:[#allocation17 + $0xdc] ss:$48 sps:$4 sm:$0xff]  }
 0x5df   :  { %3968 = vmatprep.subr.bf16.mxu1 %v9320_v30  ;;  %4050 = vmatprep.subr.bf16.mxu0 %v9323_v44  ;;  %v9384_v30 = vld [vmem:[#allocation17 + $0xd0] ss:$48 sps:$4 sm:$0xff]   ;;  %v9387_v44 = vld [vmem:[#allocation17 + $0xd8] ss:$48 sps:$4 sm:$0xff]  }
 0x5e2   :  { %3969 = vmatpush1.bf16.msra.mxu1 %v9318_v32  ;;  %4051 = vmatpush1.bf16.msra.mxu0 %v9321_v52  ;;  %v9392_v32 = vld [vmem:[#allocation17 + $0x134] ss:$48 sps:$4 sm:$0xff]   ;;  %v9395_v52 = vld [vmem:[#allocation17 + $0x13c] ss:$48 sps:$4 sm:$0xff]  }
 0x5e3   :  { %3970 = vmatprep.subr.bf16.mxu1 %v9326_v54  ;;  %4052 = vmatprep.subr.bf16.mxu0 %v9329_v41  ;;  %v9390_v54 = vld [vmem:[#allocation17 + $0x130] ss:$48 sps:$4 sm:$0xff]   ;;  %v9393_v41 = vld [vmem:[#allocation17 + $0x138] ss:$48 sps:$4 sm:$0xff]  }
 0x5e6   :  { %3971 = vmatpush1.bf16.msra.mxu1 %v9324_v42  ;;  %4053 = vmatpush1.bf16.msra.mxu0 %v9327_v56  ;;  %v9398_v42 = vld [vmem:[#allocation17 + $0x194] ss:$48 sps:$4 sm:$0xff]   ;;  %v9401_v56 = vld [vmem:[#allocation17 + $0x19c] ss:$48 sps:$4 sm:$0xff]  }
 0x5e7   :  { %3972 = vmatprep.subr.bf16.mxu1 %v9332_v57  ;;  %4054 = vmatprep.subr.bf16.mxu0 %v9335_v58  ;;  %v9396_v57 = vld [vmem:[#allocation17 + $0x190] ss:$48 sps:$4 sm:$0xff]   ;;  %v9399_v58 = vld [vmem:[#allocation17 + $0x198] ss:$48 sps:$4 sm:$0xff]  }
 0x5ea   :  { %3973 = vmatpush1.bf16.msra.mxu1 %v9330_v59  ;;  %4055 = vmatpush1.bf16.msra.mxu0 %v9333_v60  ;;  %v9404_v59 = vld [vmem:[#allocation17 + $0x1f4] ss:$48 sps:$4 sm:$0xff]   ;;  %v9407_v60 = vld [vmem:[#allocation17 + $0x1fc] ss:$48 sps:$4 sm:$0xff]  }
 0x5eb   :  { %3974 = vmatprep.subr.bf16.mxu1 %v9338_v33  ;;  %4056 = vmatprep.subr.bf16.mxu0 %v9341_v61  ;;  %v9402_v33 = vld [vmem:[#allocation17 + $0x1f0] ss:$48 sps:$4 sm:$0xff]   ;;  %v9405_v61 = vld [vmem:[#allocation17 + $0x1f8] ss:$48 sps:$4 sm:$0xff]  }
 0x5ee   :  { %3975 = vmatpush1.bf16.msra.mxu1 %v9336_v62  ;;  %4057 = vmatpush1.bf16.msra.mxu0 %v9339_v63  ;;  %v9410_v62 = vld [vmem:[#allocation17 + $0x254] ss:$48 sps:$4 sm:$0xff]   ;;  %v9413_v63 = vld [vmem:[#allocation17 + $0x25c] ss:$48 sps:$4 sm:$0xff]  }
 0x5ef   :  { %3976 = vmatprep.subr.bf16.mxu1 %v9344_v1  ;;  %4058 = vmatprep.subr.bf16.mxu0 %v9347_v2  ;;  %v9408_v1 = vld [vmem:[#allocation17 + $0x250] ss:$48 sps:$4 sm:$0xff]   ;;  %v9411_v2 = vld [vmem:[#allocation17 + $0x258] ss:$48 sps:$4 sm:$0xff]  }
 0x5f2   :  { %3977 = vmatpush1.bf16.msra.mxu1 %v9342_v4  ;;  %4059 = vmatpush1.bf16.msra.mxu0 %v9345_v43  ;;  %v9416_v4 = vld [vmem:[#allocation17 + $0x2b4] ss:$48 sps:$4 sm:$0xff]   ;;  %v9419_v43 = vld [vmem:[#allocation17 + $0x2bc] ss:$48 sps:$4 sm:$0xff]  }
 0x5f3   :  { %3978 = vmatprep.subr.bf16.mxu1 %v9350_v5  ;;  %4060 = vmatprep.subr.bf16.mxu0 %v9353_v34  ;;  %v9414_v5 = vld [vmem:[#allocation17 + $0x2b0] ss:$48 sps:$4 sm:$0xff]   ;;  %v9417_v34 = vld [vmem:[#allocation17 + $0x2b8] ss:$48 sps:$4 sm:$0xff]  }
 0x5f6   :  { %3979 = vmatpush1.bf16.msra.mxu1 %v9348_v8  ;;  %4061 = vmatpush1.bf16.msra.mxu0 %v9351_v55  ;;  %v9422_v8 = vld [vmem:[#allocation17 + $0x314] ss:$48 sps:$4 sm:$0xff]   ;;  %v9425_v55 = vld [vmem:[#allocation17 + $0x31c] ss:$48 sps:$4 sm:$0xff]  }
 0x5f7   :  { %3980 = vmatprep.subr.bf16.mxu1 %v9356_v10  ;;  %4062 = vmatprep.subr.bf16.mxu0 %v9359_v13  ;;  %v9420_v10 = vld [vmem:[#allocation17 + $0x310] ss:$48 sps:$4 sm:$0xff]   ;;  %v9423_v13 = vld [vmem:[#allocation17 + $0x318] ss:$48 sps:$4 sm:$0xff]  }
 0x5fa   :  { %3981 = vmatpush1.bf16.msra.mxu1 %v9354_v14  ;;  %4063 = vmatpush1.bf16.msra.mxu0 %v9357_v15  ;;  %v9428_v14 = vld [vmem:[#allocation17 + $0x374] ss:$48 sps:$4 sm:$0xff]   ;;  %v9431_v15 = vld [vmem:[#allocation17 + $0x37c] ss:$48 sps:$4 sm:$0xff]  }
 0x5fb   :  { %3982 = vmatprep.subr.bf16.mxu1 %v9362_v23  ;;  %4064 = vmatprep.subr.bf16.mxu0 %v9365_v25  ;;  %v9426_v23 = vld [vmem:[#allocation17 + $0x370] ss:$48 sps:$4 sm:$0xff]   ;;  %v9429_v25 = vld [vmem:[#allocation17 + $0x378] ss:$48 sps:$4 sm:$0xff]  }
 0x5fe   :  { %3983 = vmatpush1.bf16.msra.mxu1 %v9360_v27  ;;  %4065 = vmatpush1.bf16.msra.mxu0 %v9363_v29  ;;  %v9434_v27 = vld [vmem:[#allocation17 + $0x3d4] ss:$48 sps:$4 sm:$0xff]   ;;  %v9437_v29 = vld [vmem:[#allocation17 + $0x3dc] ss:$48 sps:$4 sm:$0xff]  }
 0x5ff   :  { %3984 = vmatprep.subr.bf16.mxu1 %v9368_v31  ;;  %4066 = vmatprep.subr.bf16.mxu0 %v9371_v36  ;;  %v9432_v31 = vld [vmem:[#allocation17 + $0x3d0] ss:$48 sps:$4 sm:$0xff]   ;;  %v9435_v36 = vld [vmem:[#allocation17 + $0x3d8] ss:$48 sps:$4 sm:$0xff]  }
 0x602   :  { %3985 = vmatpush1.bf16.msra.mxu1 %v9366_v24  ;;  %4067 = vmatpush1.bf16.msra.mxu0 %v9369_v37  ;;  %v9440_v24 = vld [vmem:[#allocation17 + $0x434] ss:$48 sps:$4 sm:$0xff]   ;;  %v9443_v37 = vld [vmem:[#allocation17 + $0x43c] ss:$48 sps:$4 sm:$0xff]  }
 0x603   :  { %4077 = vmatprep.subr.bf16.mxu1 %v9374_v12  ;;  %4159 = vmatprep.subr.bf16.mxu0 %v9377_v6  ;;  %v9441_v12 = vld [vmem:[#allocation17 + $0x438] ss:$48 sps:$4 sm:$0xff]   ;;  %v9446_v6 = vld [vmem:[#allocation17 + $0x494] ss:$48 sps:$4 sm:$0xff]  }
 0x605   :  { %3987 = vmatmul.mubr.bf16.vlgmr.msra.gmra.mrb[16].mxu1 %v11317_v46  ;;  %4069 = vmatmul.mubr.bf16.vlgmr.msra.gmra.mrb[20].mxu0 %v11317_v46 }
 0x606   :  { %4078 = vmatpush1.bf16.msra.mxu1 %v9372_v45  ;;  %4109 = vmatprep.mubr.bf16.mxu1 %v11304_v7  ;;  %v9449_v45 = vld [vmem:[#allocation17 + $0x49c] ss:$48 sps:$4 sm:$0xff]  }
 0x607   :  { %4160 = vmatpush1.bf16.msra.mxu0 %v9375_v47  ;;  %4191 = vmatprep.mubr.bf16.mxu0 %v11304_v7  ;;  %v9444_v47 = vld [vmem:[#allocation17 + $0x490] ss:$48 sps:$4 sm:$0xff]  }
 0x608   :  { %4079 = vmatprep.subr.bf16.mxu1 %v9380_v48  ;;  %4161 = vmatprep.subr.bf16.mxu0 %v9383_v49  ;;  %v9447_v48 = vld [vmem:[#allocation17 + $0x498] ss:$48 sps:$4 sm:$0xff]   ;;  %v9452_v49 = vld [vmem:[#allocation17 + $0x4f4] ss:$48 sps:$4 sm:$0xff]  }
 0x60a   :  { %4080 = vmatpush1.bf16.msra.mxu1 %v9378_v3  ;;  %v9455_v3 = vld [vmem:[#allocation17 + $0x4fc] ss:$48 sps:$4 sm:$0xff]  }
 0x60b   :  { %4162 = vmatpush1.bf16.msra.mxu0 %v9381_v50  ;;  %4081 = vmatprep.subr.bf16.mxu1 %v9386_v51  ;;  %v9450_v50 = vld [vmem:[#allocation17 + $0x4f0] ss:$48 sps:$4 sm:$0xff]   ;;  %v9453_v51 = vld [vmem:[#allocation17 + $0x4f8] ss:$48 sps:$4 sm:$0xff]  }
 0x60c   :  { %4163 = vmatprep.subr.bf16.mxu0 %v9389_v35  ;;  %v9458_v35 = vld [vmem:[#allocation17 + $0x554] ss:$48 sps:$4 sm:$0xff]  }
 0x60e   :  { %4082 = vmatpush1.bf16.msra.mxu1 %v9384_v30  ;;  %v9461_v30 = vld [vmem:[#allocation17 + $0x55c] ss:$48 sps:$4 sm:$0xff]  }
 0x60f   :  { %4164 = vmatpush1.bf16.msra.mxu0 %v9387_v44  ;;  %4083 = vmatprep.subr.bf16.mxu1 %v9392_v32  ;;  %v9456_v44 = vld [vmem:[#allocation17 + $0x550] ss:$48 sps:$4 sm:$0xff]   ;;  %v9459_v32 = vld [vmem:[#allocation17 + $0x558] ss:$48 sps:$4 sm:$0xff]  }
 0x610   :  { %4165 = vmatprep.subr.bf16.mxu0 %v9395_v52  ;;  %v9464_v52 = vld [vmem:[#allocation17 + $0x5b4] ss:$48 sps:$4 sm:$0xff]  }
 0x612   :  { %4084 = vmatpush1.bf16.msra.mxu1 %v9390_v54  ;;  %v9467_v54 = vld [vmem:[#allocation17 + $0x5bc] ss:$48 sps:$4 sm:$0xff]  }
 0x613   :  { %4166 = vmatpush1.bf16.msra.mxu0 %v9393_v41  ;;  %4085 = vmatprep.subr.bf16.mxu1 %v9398_v42  ;;  %v9462_v41 = vld [vmem:[#allocation17 + $0x5b0] ss:$48 sps:$4 sm:$0xff]   ;;  %v9465_v42 = vld [vmem:[#allocation17 + $0x5b8] ss:$48 sps:$4 sm:$0xff]  }
 0x614   :  { %4167 = vmatprep.subr.bf16.mxu0 %v9401_v56  ;;  %v9470_v56 = vld [vmem:[#allocation17 + $0x614] ss:$48 sps:$4 sm:$0xff]  }
 0x616   :  { %4086 = vmatpush1.bf16.msra.mxu1 %v9396_v57  ;;  %v9473_v57 = vld [vmem:[#allocation17 + $0x61c] ss:$48 sps:$4 sm:$0xff]  }
 0x617   :  { %4168 = vmatpush1.bf16.msra.mxu0 %v9399_v58  ;;  %4087 = vmatprep.subr.bf16.mxu1 %v9404_v59  ;;  %v9468_v58 = vld [vmem:[#allocation17 + $0x610] ss:$48 sps:$4 sm:$0xff]   ;;  %v9471_v59 = vld [vmem:[#allocation17 + $0x618] ss:$48 sps:$4 sm:$0xff]  }
 0x618   :  { %4169 = vmatprep.subr.bf16.mxu0 %v9407_v60  ;;  %v9476_v60 = vld [vmem:[#allocation17 + $0x674] ss:$48 sps:$4 sm:$0xff]  }
 0x61a   :  { %4088 = vmatpush1.bf16.msra.mxu1 %v9402_v33  ;;  %v9479_v33 = vld [vmem:[#allocation17 + $0x67c] ss:$48 sps:$4 sm:$0xff]  }
 0x61b   :  { %4170 = vmatpush1.bf16.msra.mxu0 %v9405_v61  ;;  %4089 = vmatprep.subr.bf16.mxu1 %v9410_v62  ;;  %v9474_v61 = vld [vmem:[#allocation17 + $0x670] ss:$48 sps:$4 sm:$0xff]   ;;  %v9477_v62 = vld [vmem:[#allocation17 + $0x678] ss:$48 sps:$4 sm:$0xff]  }
 0x61c   :  { %4171 = vmatprep.subr.bf16.mxu0 %v9413_v63  ;;  %v9482_v63 = vld [vmem:[#allocation17 + $0x6d4] ss:$48 sps:$4 sm:$0xff]  }
 0x61e   :  { %4090 = vmatpush1.bf16.msra.mxu1 %v9408_v1  ;;  %v9485_v1 = vld [vmem:[#allocation17 + $0x6dc] ss:$48 sps:$4 sm:$0xff]  }
 0x61f   :  { %4172 = vmatpush1.bf16.msra.mxu0 %v9411_v2  ;;  %4091 = vmatprep.subr.bf16.mxu1 %v9416_v4  ;;  %v9480_v2 = vld [vmem:[#allocation17 + $0x6d0] ss:$48 sps:$4 sm:$0xff]   ;;  %v9483_v4 = vld [vmem:[#allocation17 + $0x6d8] ss:$48 sps:$4 sm:$0xff]  }
 0x620   :  { %4173 = vmatprep.subr.bf16.mxu0 %v9419_v43  ;;  %v9488_v43 = vld [vmem:[#allocation17 + $0x734] ss:$48 sps:$4 sm:$0xff]  }
 0x622   :  { %4092 = vmatpush1.bf16.msra.mxu1 %v9414_v5  ;;  %v9491_v5 = vld [vmem:[#allocation17 + $0x73c] ss:$48 sps:$4 sm:$0xff]  }
 0x623   :  { %4174 = vmatpush1.bf16.msra.mxu0 %v9417_v34  ;;  %4093 = vmatprep.subr.bf16.mxu1 %v9422_v8  ;;  %v9486_v34 = vld [vmem:[#allocation17 + $0x730] ss:$48 sps:$4 sm:$0xff]   ;;  %v9489_v8 = vld [vmem:[#allocation17 + $0x738] ss:$48 sps:$4 sm:$0xff]  }
 0x624   :  { %4175 = vmatprep.subr.bf16.mxu0 %v9425_v55  ;;  %v9494_v55 = vld [vmem:[#allocation17 + $0x794] ss:$48 sps:$4 sm:$0xff]  }
 0x626   :  { %4094 = vmatpush1.bf16.msra.mxu1 %v9420_v10  ;;  %v9497_v10 = vld [vmem:[#allocation17 + $0x79c] ss:$48 sps:$4 sm:$0xff]  }
 0x627   :  { %4176 = vmatpush1.bf16.msra.mxu0 %v9423_v13  ;;  %4095 = vmatprep.subr.bf16.mxu1 %v9428_v14  ;;  %v9492_v13 = vld [vmem:[#allocation17 + $0x790] ss:$48 sps:$4 sm:$0xff]   ;;  %v9495_v14 = vld [vmem:[#allocation17 + $0x798] ss:$48 sps:$4 sm:$0xff]  }
 0x628   :  { %4177 = vmatprep.subr.bf16.mxu0 %v9431_v15  ;;  %v9500_v15 = vld [vmem:[#allocation17 + $0x7f4] ss:$48 sps:$4 sm:$0xff]  }
 0x62a   :  { %4096 = vmatpush1.bf16.msra.mxu1 %v9426_v23  ;;  %v9503_v23 = vld [vmem:[#allocation17 + $0x7fc] ss:$48 sps:$4 sm:$0xff]  }
 0x62b   :  { %4178 = vmatpush1.bf16.msra.mxu0 %v9429_v25  ;;  %4097 = vmatprep.subr.bf16.mxu1 %v9434_v27  ;;  %v9498_v25 = vld [vmem:[#allocation17 + $0x7f0] ss:$48 sps:$4 sm:$0xff]   ;;  %v9501_v27 = vld [vmem:[#allocation17 + $0x7f8] ss:$48 sps:$4 sm:$0xff]  }
 0x62c   :  { %4179 = vmatprep.subr.bf16.mxu0 %v9437_v29  ;;  %v9506_v29 = vld [vmem:[#allocation17 + $0x854] ss:$48 sps:$4 sm:$0xff]  }
 0x62e   :  { %4098 = vmatpush1.bf16.msra.mxu1 %v9432_v31  ;;  %v9509_v31 = vld [vmem:[#allocation17 + $0x85c] ss:$48 sps:$4 sm:$0xff]  }
 0x62f   :  { %4180 = vmatpush1.bf16.msra.mxu0 %v9435_v36  ;;  %4099 = vmatprep.subr.bf16.mxu1 %v9440_v24  ;;  %v9504_v36 = vld [vmem:[#allocation17 + $0x850] ss:$48 sps:$4 sm:$0xff]   ;;  %v9507_v24 = vld [vmem:[#allocation17 + $0x858] ss:$48 sps:$4 sm:$0xff]  }
 0x630   :  { %4181 = vmatprep.subr.bf16.mxu0 %v9443_v37  ;;  %v9512_v37 = vld [vmem:[#allocation17 + $0x8b4] ss:$48 sps:$4 sm:$0xff]  }
 0x632   :  { %4100 = vmatpush1.bf16.msra.mxu1 %v9438_v38  ;;  %v9515_v38 = vld [vmem:[#allocation17 + $0x8bc] ss:$48 sps:$4 sm:$0xff]  }
 0x633   :  { %4182 = vmatpush1.bf16.msra.mxu0 %v9441_v12  ;;  %4101 = vmatprep.subr.bf16.mxu1 %v9446_v6  ;;  %v9510_v12 = vld [vmem:[#allocation17 + $0x8b0] ss:$48 sps:$4 sm:$0xff]   ;;  %v9513_v6 = vld [vmem:[#allocation17 + $0x8b8] ss:$48 sps:$4 sm:$0xff]  }
 0x634   :  { %4183 = vmatprep.subr.bf16.mxu0 %v9449_v45  ;;  %v9518_v45 = vld [vmem:[#allocation17 + $0x914] ss:$48 sps:$4 sm:$0xff]  }
 0x636   :  { %4102 = vmatpush1.bf16.msra.mxu1 %v9444_v47  ;;  %v9521_v47 = vld [vmem:[#allocation17 + $0x91c] ss:$48 sps:$4 sm:$0xff]  }
 0x637   :  { %4184 = vmatpush1.bf16.msra.mxu0 %v9447_v48  ;;  %4103 = vmatprep.subr.bf16.mxu1 %v9452_v49  ;;  %v9516_v48 = vld [vmem:[#allocation17 + $0x910] ss:$48 sps:$4 sm:$0xff]   ;;  %v9519_v49 = vld [vmem:[#allocation17 + $0x918] ss:$48 sps:$4 sm:$0xff]  }
 0x638   :  { %4185 = vmatprep.subr.bf16.mxu0 %v9455_v3  ;;  %v9524_v3 = vld [vmem:[#allocation17 + $0x974] ss:$48 sps:$4 sm:$0xff]  }
 0x63a   :  { %4104 = vmatpush1.bf16.msra.mxu1 %v9450_v50  ;;  %v9527_v50 = vld [vmem:[#allocation17 + $0x97c] ss:$48 sps:$4 sm:$0xff]  }
 0x63b   :  { %4186 = vmatpush1.bf16.msra.mxu0 %v9453_v51  ;;  %4105 = vmatprep.subr.bf16.mxu1 %v9458_v35  ;;  %v9522_v51 = vld [vmem:[#allocation17 + $0x970] ss:$48 sps:$4 sm:$0xff]   ;;  %v9525_v35 = vld [vmem:[#allocation17 + $0x978] ss:$48 sps:$4 sm:$0xff]  }
 0x63c   :  { %4187 = vmatprep.subr.bf16.mxu0 %v9461_v30  ;;  %v9530_v30 = vld [vmem:[#allocation17 + $0x9d4] ss:$48 sps:$4 sm:$0xff]  }
 0x63e   :  { %4106 = vmatpush1.bf16.msra.mxu1 %v9456_v44  ;;  %v9533_v44 = vld [vmem:[#allocation17 + $0x9dc] ss:$48 sps:$4 sm:$0xff]  }
 0x63f   :  { %4188 = vmatpush1.bf16.msra.mxu0 %v9459_v32  ;;  %4107 = vmatprep.subr.bf16.mxu1 %v9464_v52  ;;  %v9528_v32 = vld [vmem:[#allocation17 + $0x9d0] ss:$48 sps:$4 sm:$0xff]   ;;  %v9531_v52 = vld [vmem:[#allocation17 + $0x9d8] ss:$48 sps:$4 sm:$0xff]  }
 0x640   :  { %4189 = vmatprep.subr.bf16.mxu0 %v9467_v54  ;;  %v9536_v54 = vld [vmem:[#allocation17 + $0xa34] ss:$48 sps:$4 sm:$0xff]  }
 0x642   :  { %4108 = vmatpush1.bf16.msra.mxu1 %v9462_v41  ;;  %v9539_v41 = vld [vmem:[#allocation17 + $0xa3c] ss:$48 sps:$4 sm:$0xff]  }
 0x643   :  { %4190 = vmatpush1.bf16.msra.mxu0 %v9465_v42  ;;  %4118 = vmatprep.subr.bf16.mxu1 %v9470_v56  ;;  %v9534_v42 = vld [vmem:[#allocation17 + $0xa30] ss:$48 sps:$4 sm:$0xff]   ;;  %v9537_v56 = vld [vmem:[#allocation17 + $0xa38] ss:$48 sps:$4 sm:$0xff]  }
 0x644   :  { %4200 = vmatprep.subr.bf16.mxu0 %v9473_v57  ;;  %v9542_v57 = vld [vmem:[#allocation17 + $0xa94] ss:$48 sps:$4 sm:$0xff]  }
 0x645   :  { %4110 = vmatmul.mubr.bf16.vlgmr.msra.gmra.mrb[20].mxu1 %v11306_v9 }
 0x646   :  { %4192 = vmatmul.mubr.bf16.vlgmr.msra.gmra.mrb[24].mxu0 %v11306_v9  ;;  %4119 = vmatpush1.bf16.msra.mxu1 %v9468_v58  ;;  %v9545_v58 = vld [vmem:[#allocation17 + $0xa9c] ss:$48 sps:$4 sm:$0xff]  }
 0x647   :  { %4150 = vmatprep.mubr.bf16.mxu1 %v11312_v11  ;;  %4201 = vmatpush1.bf16.msra.mxu0 %v9471_v59  ;;  %v9540_v59 = vld [vmem:[#allocation17 + $0xa90] ss:$48 sps:$4 sm:$0xff]  }
 0x648   :  { %4232 = vmatprep.mubr.bf16.mxu0 %v11312_v11  ;;  %4120 = vmatprep.subr.bf16.mxu1 %v9476_v60  ;;  %v9543_v60 = vld [vmem:[#allocation17 + $0xa98] ss:$48 sps:$4 sm:$0xff]  }
 0x649   :  { %4202 = vmatprep.subr.bf16.mxu0 %v9479_v33  ;;  %v9548_v33 = vld [vmem:[#allocation17 + $0xaf4] ss:$48 sps:$4 sm:$0xff]  }
 0x64a   :  { %4121 = vmatpush1.bf16.msra.mxu1 %v9474_v61  ;;  %v9551_v61 = vld [vmem:[#allocation17 + $0xafc] ss:$48 sps:$4 sm:$0xff]  }
 0x64b   :  { %4203 = vmatpush1.bf16.msra.mxu0 %v9477_v62  ;;  %4122 = vmatprep.subr.bf16.mxu1 %v9482_v63  ;;  %v9546_v62 = vld [vmem:[#allocation17 + $0xaf0] ss:$48 sps:$4 sm:$0xff]   ;;  %v9549_v63 = vld [vmem:[#allocation17 + $0xaf8] ss:$48 sps:$4 sm:$0xff]  }
 0x64c   :  { %4204 = vmatprep.subr.bf16.mxu0 %v9485_v1  ;;  %v9554_v1 = vld [vmem:[#allocation17 + $0xb54] ss:$48 sps:$4 sm:$0xff]  }
 0x64e   :  { %4123 = vmatpush1.bf16.msra.mxu1 %v9480_v2  ;;  %v9557_v2 = vld [vmem:[#allocation17 + $0xb5c] ss:$48 sps:$4 sm:$0xff]  }
 0x64f   :  { %4205 = vmatpush1.bf16.msra.mxu0 %v9483_v4  ;;  %4124 = vmatprep.subr.bf16.mxu1 %v9488_v43  ;;  %v9552_v4 = vld [vmem:[#allocation17 + $0xb50] ss:$48 sps:$4 sm:$0xff]   ;;  %v9555_v43 = vld [vmem:[#allocation17 + $0xb58] ss:$48 sps:$4 sm:$0xff]  }
 0x650   :  { %4206 = vmatprep.subr.bf16.mxu0 %v9491_v5  ;;  %v9560_v5 = vld [vmem:[#allocation17 + $0xbb4] ss:$48 sps:$4 sm:$0xff]  }
 0x652   :  { %4125 = vmatpush1.bf16.msra.mxu1 %v9486_v34  ;;  %v9563_v34 = vld [vmem:[#allocation17 + $0xbbc] ss:$48 sps:$4 sm:$0xff]  }
 0x653   :  { %4207 = vmatpush1.bf16.msra.mxu0 %v9489_v8  ;;  %4126 = vmatprep.subr.bf16.mxu1 %v9494_v55  ;;  %v9558_v8 = vld [vmem:[#allocation17 + $0xbb0] ss:$48 sps:$4 sm:$0xff]   ;;  %v9561_v55 = vld [vmem:[#allocation17 + $0xbb8] ss:$48 sps:$4 sm:$0xff]  }
 0x654   :  { %4208 = vmatprep.subr.bf16.mxu0 %v9497_v10  ;;  %v9566_v10 = vld [vmem:[#allocation17 + $0x24] ss:$48 sps:$4 sm:$0xff]  }
 0x656   :  { %4127 = vmatpush1.bf16.msra.mxu1 %v9492_v13  ;;  %v9569_v13 = vld [vmem:[#allocation17 + $0x2c] ss:$48 sps:$4 sm:$0xff]  }
 0x657   :  { %4209 = vmatpush1.bf16.msra.mxu0 %v9495_v14  ;;  %4128 = vmatprep.subr.bf16.mxu1 %v9500_v15  ;;  %v9564_v14 = vld [vmem:[#allocation17 + $0x20] ss:$48 sps:$4 sm:$0xff]   ;;  %v9567_v15 = vld [vmem:[#allocation17 + $0x28] ss:$48 sps:$4 sm:$0xff]  }
 0x658   :  { %4210 = vmatprep.subr.bf16.mxu0 %v9503_v23  ;;  %v9572_v23 = vld [vmem:[#allocation17 + $0x84] ss:$48 sps:$4 sm:$0xff]  }
 0x65a   :  { %4129 = vmatpush1.bf16.msra.mxu1 %v9498_v25  ;;  %v9575_v25 = vld [vmem:[#allocation17 + $0x8c] ss:$48 sps:$4 sm:$0xff]  }
 0x65b   :  { %4211 = vmatpush1.bf16.msra.mxu0 %v9501_v27  ;;  %4130 = vmatprep.subr.bf16.mxu1 %v9506_v29  ;;  %v9570_v27 = vld [vmem:[#allocation17 + $0x80] ss:$48 sps:$4 sm:$0xff]   ;;  %v9573_v29 = vld [vmem:[#allocation17 + $0x88] ss:$48 sps:$4 sm:$0xff]  }
 0x65c   :  { %4212 = vmatprep.subr.bf16.mxu0 %v9509_v31  ;;  %v9578_v31 = vld [vmem:[#allocation17 + $0xe4] ss:$48 sps:$4 sm:$0xff]  }
 0x65e   :  { %4131 = vmatpush1.bf16.msra.mxu1 %v9504_v36  ;;  %v9581_v36 = vld [vmem:[#allocation17 + $0xec] ss:$48 sps:$4 sm:$0xff]  }
 0x65f   :  { %4213 = vmatpush1.bf16.msra.mxu0 %v9507_v24  ;;  %4132 = vmatprep.subr.bf16.mxu1 %v9512_v37  ;;  %v9576_v24 = vld [vmem:[#allocation17 + $0xe0] ss:$48 sps:$4 sm:$0xff]   ;;  %v9579_v37 = vld [vmem:[#allocation17 + $0xe8] ss:$48 sps:$4 sm:$0xff]  }
 0x660   :  { %4214 = vmatprep.subr.bf16.mxu0 %v9515_v38  ;;  %v9584_v38 = vld [vmem:[#allocation17 + $0x144] ss:$48 sps:$4 sm:$0xff]  }
 0x662   :  { %4133 = vmatpush1.bf16.msra.mxu1 %v9510_v12  ;;  %v9587_v12 = vld [vmem:[#allocation17 + $0x14c] ss:$48 sps:$4 sm:$0xff]  }
 0x663   :  { %4215 = vmatpush1.bf16.msra.mxu0 %v9513_v6  ;;  %4134 = vmatprep.subr.bf16.mxu1 %v9518_v45  ;;  %v9582_v6 = vld [vmem:[#allocation17 + $0x140] ss:$48 sps:$4 sm:$0xff]   ;;  %v9585_v45 = vld [vmem:[#allocation17 + $0x148] ss:$48 sps:$4 sm:$0xff]  }
 0x664   :  { %4216 = vmatprep.subr.bf16.mxu0 %v9521_v47  ;;  %v9590_v47 = vld [vmem:[#allocation17 + $0x1a4] ss:$48 sps:$4 sm:$0xff]  }
 0x666   :  { %4135 = vmatpush1.bf16.msra.mxu1 %v9516_v48  ;;  %v9593_v48 = vld [vmem:[#allocation17 + $0x1ac] ss:$48 sps:$4 sm:$0xff]  }
 0x667   :  { %4217 = vmatpush1.bf16.msra.mxu0 %v9519_v49  ;;  %4136 = vmatprep.subr.bf16.mxu1 %v9524_v3  ;;  %v9591_v49 = vld [vmem:[#allocation17 + $0x1a8] ss:$48 sps:$4 sm:$0xff]   ;;  %v9596_v3 = vld [vmem:[#allocation17 + $0x204] ss:$48 sps:$4 sm:$0xff]  }
 0x668   :  { %4218 = vmatprep.subr.bf16.mxu0 %v9527_v50  ;;  %v9599_v50 = vld [vmem:[#allocation17 + $0x20c] ss:$48 sps:$4 sm:$0xff]  }
 0x66a   :  { %4137 = vmatpush1.bf16.msra.mxu1 %v9522_v51  ;;  %v9594_v51 = vld [vmem:[#allocation17 + $0x200] ss:$48 sps:$4 sm:$0xff]  }
 0x66b   :  { %4219 = vmatpush1.bf16.msra.mxu0 %v9525_v35  ;;  %4138 = vmatprep.subr.bf16.mxu1 %v9530_v30  ;;  %v9597_v35 = vld [vmem:[#allocation17 + $0x208] ss:$48 sps:$4 sm:$0xff]   ;;  %v9602_v30 = vld [vmem:[#allocation17 + $0x264] ss:$48 sps:$4 sm:$0xff]  }
 0x66c   :  { %4220 = vmatprep.subr.bf16.mxu0 %v9533_v44  ;;  %v9605_v44 = vld [vmem:[#allocation17 + $0x26c] ss:$48 sps:$4 sm:$0xff]  }
 0x66e   :  { %4139 = vmatpush1.bf16.msra.mxu1 %v9528_v32  ;;  %v9600_v32 = vld [vmem:[#allocation17 + $0x260] ss:$48 sps:$4 sm:$0xff]  }
 0x66f   :  { %4221 = vmatpush1.bf16.msra.mxu0 %v9531_v52  ;;  %4140 = vmatprep.subr.bf16.mxu1 %v9536_v54  ;;  %v9603_v52 = vld [vmem:[#allocation17 + $0x268] ss:$48 sps:$4 sm:$0xff]   ;;  %v9608_v54 = vld [vmem:[#allocation17 + $0x2c4] ss:$48 sps:$4 sm:$0xff]  }
 0x670   :  { %4222 = vmatprep.subr.bf16.mxu0 %v9539_v41  ;;  %v9611_v41 = vld [vmem:[#allocation17 + $0x2cc] ss:$48 sps:$4 sm:$0xff]  }
 0x672   :  { %4141 = vmatpush1.bf16.msra.mxu1 %v9534_v42  ;;  %v9606_v42 = vld [vmem:[#allocation17 + $0x2c0] ss:$48 sps:$4 sm:$0xff]  }
 0x673   :  { %4223 = vmatpush1.bf16.msra.mxu0 %v9537_v56  ;;  %4142 = vmatprep.subr.bf16.mxu1 %v9542_v57  ;;  %v9609_v56 = vld [vmem:[#allocation17 + $0x2c8] ss:$48 sps:$4 sm:$0xff]   ;;  %v9614_v57 = vld [vmem:[#allocation17 + $0x324] ss:$48 sps:$4 sm:$0xff]  }
 0x674   :  { %4224 = vmatprep.subr.bf16.mxu0 %v9545_v58  ;;  %v9617_v58 = vld [vmem:[#allocation17 + $0x32c] ss:$48 sps:$4 sm:$0xff]  }
 0x676   :  { %4143 = vmatpush1.bf16.msra.mxu1 %v9540_v59  ;;  %v9612_v59 = vld [vmem:[#allocation17 + $0x320] ss:$48 sps:$4 sm:$0xff]  }
 0x677   :  { %4225 = vmatpush1.bf16.msra.mxu0 %v9543_v60  ;;  %4144 = vmatprep.subr.bf16.mxu1 %v9548_v33  ;;  %v9615_v60 = vld [vmem:[#allocation17 + $0x328] ss:$48 sps:$4 sm:$0xff]   ;;  %v9620_v33 = vld [vmem:[#allocation17 + $0x384] ss:$48 sps:$4 sm:$0xff]  }
 0x678   :  { %4226 = vmatprep.subr.bf16.mxu0 %v9551_v61  ;;  %v9623_v61 = vld [vmem:[#allocation17 + $0x38c] ss:$48 sps:$4 sm:$0xff]  }
 0x67a   :  { %4145 = vmatpush1.bf16.msra.mxu1 %v9546_v62  ;;  %v9618_v62 = vld [vmem:[#allocation17 + $0x380] ss:$48 sps:$4 sm:$0xff]  }
 0x67b   :  { %4227 = vmatpush1.bf16.msra.mxu0 %v9549_v63  ;;  %4146 = vmatprep.subr.bf16.mxu1 %v9554_v1  ;;  %v9621_v63 = vld [vmem:[#allocation17 + $0x388] ss:$48 sps:$4 sm:$0xff]   ;;  %v9626_v1 = vld [vmem:[#allocation17 + $0x3e4] ss:$48 sps:$4 sm:$0xff]  }
 0x67c   :  { %4228 = vmatprep.subr.bf16.mxu0 %v9557_v2  ;;  %v9629_v2 = vld [vmem:[#allocation17 + $0x3ec] ss:$48 sps:$4 sm:$0xff]  }
 0x67e   :  { %4147 = vmatpush1.bf16.msra.mxu1 %v9552_v4  ;;  %v9624_v4 = vld [vmem:[#allocation17 + $0x3e0] ss:$48 sps:$4 sm:$0xff]  }
 0x67f   :  { %4229 = vmatpush1.bf16.msra.mxu0 %v9555_v43  ;;  %4148 = vmatprep.subr.bf16.mxu1 %v9560_v5  ;;  %v9627_v43 = vld [vmem:[#allocation17 + $0x3e8] ss:$48 sps:$4 sm:$0xff]   ;;  %v9632_v5 = vld [vmem:[#allocation17 + $0x444] ss:$48 sps:$4 sm:$0xff]  }
 0x680   :  { %4230 = vmatprep.subr.bf16.mxu0 %v9563_v34  ;;  %v9635_v34 = vld [vmem:[#allocation17 + $0x44c] ss:$48 sps:$4 sm:$0xff]  }
 0x682   :  { %4149 = vmatpush1.bf16.msra.mxu1 %v9558_v8  ;;  %v9630_v8 = vld [vmem:[#allocation17 + $0x440] ss:$48 sps:$4 sm:$0xff]  }
 0x683   :  { %4231 = vmatpush1.bf16.msra.mxu0 %v9561_v55  ;;  %4241 = vmatprep.subr.bf16.mxu1 %v9566_v10  ;;  %v9633_v55 = vld [vmem:[#allocation17 + $0x448] ss:$48 sps:$4 sm:$0xff]   ;;  %v9638_v10 = vld [vmem:[#allocation17 + $0x4a4] ss:$48 sps:$4 sm:$0xff]  }
 0x684   :  { %4323 = vmatprep.subr.bf16.mxu0 %v9569_v13  ;;  %v9641_v13 = vld [vmem:[#allocation17 + $0x4ac] ss:$48 sps:$4 sm:$0xff]  }
 0x685   :  { %4151 = vmatmul.mubr.bf16.vlgmr.msra.gmra.mrb[20].mxu1 %v11317_v46 }
 0x686   :  { %4233 = vmatmul.mubr.bf16.vlgmr.msra.gmra.mrb[24].mxu0 %v11317_v46  ;;  %4242 = vmatpush1.bf16.msra.mxu1 %v9564_v14  ;;  %v9636_v14 = vld [vmem:[#allocation17 + $0x4a0] ss:$48 sps:$4 sm:$0xff]  }
 0x687   :  { %4273 = vmatprep.mubr.bf16.mxu1 %v11304_v7  ;;  %4324 = vmatpush1.bf16.msra.mxu0 %v9567_v15  ;;  %v9639_v15 = vld [vmem:[#allocation17 + $0x4a8] ss:$48 sps:$4 sm:$0xff]  }
 0x688   :  { %4355 = vmatprep.mubr.bf16.mxu0 %v11304_v7  ;;  %4243 = vmatprep.subr.bf16.mxu1 %v9572_v23  ;;  %v9588_v7 = vld [vmem:[#allocation17 + $0x1a0] ss:$48 sps:$4 sm:$0xff]   ;;  %v9644_v23 = vld [vmem:[#allocation17 + $0x504] ss:$48 sps:$4 sm:$0xff]  }
 0x689   :  { %4325 = vmatprep.subr.bf16.mxu0 %v9575_v25  ;;  %v9647_v25 = vld [vmem:[#allocation17 + $0x50c] ss:$48 sps:$4 sm:$0xff]  }
 0x68a   :  { %4244 = vmatpush1.bf16.msra.mxu1 %v9570_v27  ;;  %v9642_v27 = vld [vmem:[#allocation17 + $0x500] ss:$48 sps:$4 sm:$0xff]  }
 0x68b   :  { %4326 = vmatpush1.bf16.msra.mxu0 %v9573_v29  ;;  %4245 = vmatprep.subr.bf16.mxu1 %v9578_v31  ;;  %v9645_v29 = vld [vmem:[#allocation17 + $0x508] ss:$48 sps:$4 sm:$0xff]   ;;  %v9650_v31 = vld [vmem:[#allocation17 + $0x564] ss:$48 sps:$4 sm:$0xff]  }
 0x68c   :  { %4327 = vmatprep.subr.bf16.mxu0 %v9581_v36  ;;  %v9653_v36 = vld [vmem:[#allocation17 + $0x56c] ss:$48 sps:$4 sm:$0xff]  }
 0x68e   :  { %4246 = vmatpush1.bf16.msra.mxu1 %v9576_v24  ;;  %v9648_v24 = vld [vmem:[#allocation17 + $0x560] ss:$48 sps:$4 sm:$0xff]  }
 0x68f   :  { %4328 = vmatpush1.bf16.msra.mxu0 %v9579_v37  ;;  %4247 = vmatprep.subr.bf16.mxu1 %v9584_v38  ;;  %v9651_v37 = vld [vmem:[#allocation17 + $0x568] ss:$48 sps:$4 sm:$0xff]   ;;  %v9656_v38 = vld [vmem:[#allocation17 + $0x5c4] ss:$48 sps:$4 sm:$0xff]  }
 0x690   :  { %4329 = vmatprep.subr.bf16.mxu0 %v9587_v12  ;;  %v9659_v12 = vld [vmem:[#allocation17 + $0x5cc] ss:$48 sps:$4 sm:$0xff]  }
 0x692   :  { %4248 = vmatpush1.bf16.msra.mxu1 %v9582_v6  ;;  %v9654_v6 = vld [vmem:[#allocation17 + $0x5c0] ss:$48 sps:$4 sm:$0xff]  }
 0x693   :  { %4330 = vmatpush1.bf16.msra.mxu0 %v9585_v45  ;;  %4249 = vmatprep.subr.bf16.mxu1 %v9590_v47  ;;  %v9657_v45 = vld [vmem:[#allocation17 + $0x5c8] ss:$48 sps:$4 sm:$0xff]   ;;  %v9662_v47 = vld [vmem:[#allocation17 + $0x624] ss:$48 sps:$4 sm:$0xff]  }
 0x694   :  { %4331 = vmatprep.subr.bf16.mxu0 %v9593_v48  ;;  %v9665_v48 = vld [vmem:[#allocation17 + $0x62c] ss:$48 sps:$4 sm:$0xff]  }
 0x696   :  { %4250 = vmatpush1.bf16.msra.mxu1 %v9588_v7  ;;  %v9660_v7 = vld [vmem:[#allocation17 + $0x620] ss:$48 sps:$4 sm:$0xff]  }
 0x697   :  { %4332 = vmatpush1.bf16.msra.mxu0 %v9591_v49  ;;  %4251 = vmatprep.subr.bf16.mxu1 %v9596_v3  ;;  %v9663_v49 = vld [vmem:[#allocation17 + $0x628] ss:$48 sps:$4 sm:$0xff]   ;;  %v9668_v3 = vld [vmem:[#allocation17 + $0x684] ss:$48 sps:$4 sm:$0xff]  }
 0x698   :  { %4333 = vmatprep.subr.bf16.mxu0 %v9599_v50  ;;  %v9671_v50 = vld [vmem:[#allocation17 + $0x68c] ss:$48 sps:$4 sm:$0xff]  }
 0x69a   :  { %4252 = vmatpush1.bf16.msra.mxu1 %v9594_v51  ;;  %v9666_v51 = vld [vmem:[#allocation17 + $0x680] ss:$48 sps:$4 sm:$0xff]  }
 0x69b   :  { %4334 = vmatpush1.bf16.msra.mxu0 %v9597_v35  ;;  %4253 = vmatprep.subr.bf16.mxu1 %v9602_v30  ;;  %v9669_v35 = vld [vmem:[#allocation17 + $0x688] ss:$48 sps:$4 sm:$0xff]   ;;  %v9674_v30 = vld [vmem:[#allocation17 + $0x6e4] ss:$48 sps:$4 sm:$0xff]  }
 0x69c   :  { %4335 = vmatprep.subr.bf16.mxu0 %v9605_v44  ;;  %v9677_v44 = vld [vmem:[#allocation17 + $0x6ec] ss:$48 sps:$4 sm:$0xff]  }
 0x69e   :  { %4254 = vmatpush1.bf16.msra.mxu1 %v9600_v32  ;;  %v9672_v32 = vld [vmem:[#allocation17 + $0x6e0] ss:$48 sps:$4 sm:$0xff]  }
 0x69f   :  { %4336 = vmatpush1.bf16.msra.mxu0 %v9603_v52  ;;  %4255 = vmatprep.subr.bf16.mxu1 %v9608_v54  ;;  %v9675_v52 = vld [vmem:[#allocation17 + $0x6e8] ss:$48 sps:$4 sm:$0xff]   ;;  %v9680_v54 = vld [vmem:[#allocation17 + $0x744] ss:$48 sps:$4 sm:$0xff]  }
 0x6a0   :  { %4337 = vmatprep.subr.bf16.mxu0 %v9611_v41  ;;  %v9678_v41 = vld [vmem:[#allocation17 + $0x740] ss:$48 sps:$4 sm:$0xff]  }
 0x6a2   :  { %4256 = vmatpush1.bf16.msra.mxu1 %v9606_v42  ;;  %v9681_v42 = vld [vmem:[#allocation17 + $0x748] ss:$48 sps:$4 sm:$0xff]  }
 0x6a3   :  { %4338 = vmatpush1.bf16.msra.mxu0 %v9609_v56  ;;  %4257 = vmatprep.subr.bf16.mxu1 %v9614_v57  ;;  %v9686_v56 = vld [vmem:[#allocation17 + $0x7a4] ss:$48 sps:$4 sm:$0xff]   ;;  %v9689_v57 = vld [vmem:[#allocation17 + $0x7ac] ss:$48 sps:$4 sm:$0xff]  }
 0x6a4   :  { %4339 = vmatprep.subr.bf16.mxu0 %v9617_v58  ;;  %v9687_v58 = vld [vmem:[#allocation17 + $0x7a8] ss:$48 sps:$4 sm:$0xff]  }
 0x6a6   :  { %4258 = vmatpush1.bf16.msra.mxu1 %v9612_v59  ;;  %v9692_v59 = vld [vmem:[#allocation17 + $0x804] ss:$48 sps:$4 sm:$0xff]  }
 0x6a7   :  { %4340 = vmatpush1.bf16.msra.mxu0 %v9615_v60  ;;  %4259 = vmatprep.subr.bf16.mxu1 %v9620_v33  ;;  %v9695_v60 = vld [vmem:[#allocation17 + $0x80c] ss:$48 sps:$4 sm:$0xff]   ;;  %v9690_v33 = vld [vmem:[#allocation17 + $0x800] ss:$48 sps:$4 sm:$0xff]  }
 0x6a8   :  { %4341 = vmatprep.subr.bf16.mxu0 %v9623_v61  ;;  %v9693_v61 = vld [vmem:[#allocation17 + $0x808] ss:$48 sps:$4 sm:$0xff]  }
 0x6aa   :  { %4260 = vmatpush1.bf16.msra.mxu1 %v9618_v62  ;;  %v9698_v62 = vld [vmem:[#allocation17 + $0x864] ss:$48 sps:$4 sm:$0xff]  }
 0x6ab   :  { %4342 = vmatpush1.bf16.msra.mxu0 %v9621_v63  ;;  %4261 = vmatprep.subr.bf16.mxu1 %v9626_v1 }
 0x6ac   :  { %4343 = vmatprep.subr.bf16.mxu0 %v9629_v2  ;;  %v9701_v2 = vld [vmem:[#allocation17 + $0x86c] ss:$48 sps:$4 sm:$0xff]  }
 0x6ae   :  { %4262 = vmatpush1.bf16.msra.mxu1 %v9624_v4 }
 0x6af   :  { %4344 = vmatpush1.bf16.msra.mxu0 %v9627_v43  ;;  %4263 = vmatprep.subr.bf16.mxu1 %v9632_v5 }
 0x6b0   :  { %4345 = vmatprep.subr.bf16.mxu0 %v9635_v34 }
 0x6b2   :  { %4264 = vmatpush1.bf16.msra.mxu1 %v9630_v8  ;;  %v9696_v8 = vld [vmem:[#allocation17 + $0x860] ss:$48 sps:$4 sm:$0xff]  }
 0x6b3   :  { %4346 = vmatpush1.bf16.msra.mxu0 %v9633_v55  ;;  %4265 = vmatprep.subr.bf16.mxu1 %v9638_v10 }
 0x6b4   :  { %4347 = vmatprep.subr.bf16.mxu0 %v9641_v13  ;;  %v9699_v13 = vld [vmem:[#allocation17 + $0x868] ss:$48 sps:$4 sm:$0xff]  }
 0x6b6   :  { %4266 = vmatpush1.bf16.msra.mxu1 %v9636_v14  ;;  %v9704_v14 = vld [vmem:[#allocation17 + $0x8c4] ss:$48 sps:$4 sm:$0xff]  }
 0x6b7   :  { %4348 = vmatpush1.bf16.msra.mxu0 %v9639_v15  ;;  %4267 = vmatprep.subr.bf16.mxu1 %v9644_v23  ;;  %v9707_v15 = vld [vmem:[#allocation17 + $0x8cc] ss:$48 sps:$4 sm:$0xff]   ;;  %v9702_v23 = vld [vmem:[#allocation17 + $0x8c0] ss:$48 sps:$4 sm:$0xff]  }
 0x6b8   :  { %4349 = vmatprep.subr.bf16.mxu0 %v9647_v25  ;;  %v9705_v25 = vld [vmem:[#allocation17 + $0x8c8] ss:$48 sps:$4 sm:$0xff]  }
 0x6ba   :  { %4268 = vmatpush1.bf16.msra.mxu1 %v9642_v27  ;;  %v9710_v27 = vld [vmem:[#allocation17 + $0x924] ss:$48 sps:$4 sm:$0xff]  }
 0x6bb   :  { %4350 = vmatpush1.bf16.msra.mxu0 %v9645_v29  ;;  %4269 = vmatprep.subr.bf16.mxu1 %v9650_v31  ;;  %v9713_v29 = vld [vmem:[#allocation17 + $0x92c] ss:$48 sps:$4 sm:$0xff]   ;;  %v9708_v31 = vld [vmem:[#allocation17 + $0x920] ss:$48 sps:$4 sm:$0xff]  }
 0x6bc   :  { %4351 = vmatprep.subr.bf16.mxu0 %v9653_v36  ;;  %v9711_v36 = vld [vmem:[#allocation17 + $0x928] ss:$48 sps:$4 sm:$0xff]  }
 0x6be   :  { %4270 = vmatpush1.bf16.msra.mxu1 %v9648_v24  ;;  %v9716_v24 = vld [vmem:[#allocation17 + $0x984] ss:$48 sps:$4 sm:$0xff]  }
 0x6bf   :  { %4352 = vmatpush1.bf16.msra.mxu0 %v9651_v37  ;;  %4271 = vmatprep.subr.bf16.mxu1 %v9656_v38  ;;  %v9719_v37 = vld [vmem:[#allocation17 + $0x98c] ss:$48 sps:$4 sm:$0xff]   ;;  %v9714_v38 = vld [vmem:[#allocation17 + $0x980] ss:$48 sps:$4 sm:$0xff]  }
 0x6c0   :  { %4353 = vmatprep.subr.bf16.mxu0 %v9659_v12  ;;  %v9717_v12 = vld [vmem:[#allocation17 + $0x988] ss:$48 sps:$4 sm:$0xff]  }
 0x6c2   :  { %4272 = vmatpush1.bf16.msra.mxu1 %v9654_v6  ;;  %v9722_v6 = vld [vmem:[#allocation17 + $0x9e4] ss:$48 sps:$4 sm:$0xff]  }
 0x6c3   :  { %4354 = vmatpush1.bf16.msra.mxu0 %v9657_v45  ;;  %4282 = vmatprep.subr.bf16.mxu1 %v9662_v47  ;;  %v9725_v45 = vld [vmem:[#allocation17 + $0x9ec] ss:$48 sps:$4 sm:$0xff]   ;;  %v9720_v47 = vld [vmem:[#allocation17 + $0x9e0] ss:$48 sps:$4 sm:$0xff]  }
 0x6c4   :  { %4364 = vmatprep.subr.bf16.mxu0 %v9665_v48  ;;  %v9723_v48 = vld [vmem:[#allocation17 + $0x9e8] ss:$48 sps:$4 sm:$0xff]  }
 0x6c5   :  { %4274 = vmatmul.mubr.bf16.vlgmr.msra.gmra.mrb[24].mxu1 %v11306_v9 }
 0x6c6   :  { %4356 = vmatmul.mubr.bf16.vlgmr.msra.gmra.mrb[28].mxu0 %v11306_v9  ;;  %4283 = vmatpush1.bf16.msra.mxu1 %v9660_v7  ;;  %v9683_v9 = vld [vmem:[#allocation17 + $0x74c] ss:$48 sps:$4 sm:$0xff]   ;;  %v9728_v7 = vld [vmem:[#allocation17 + $0xa44] ss:$48 sps:$4 sm:$0xff]  }
 0x6c7   :  { %4314 = vmatprep.mubr.bf16.mxu1 %v11312_v11  ;;  %4365 = vmatpush1.bf16.msra.mxu0 %v9663_v49  ;;  %v9731_v49 = vld [vmem:[#allocation17 + $0xa4c] ss:$48 sps:$4 sm:$0xff]  }
 0x6c8   :  { %4396 = vmatprep.mubr.bf16.mxu0 %v11312_v11  ;;  %4284 = vmatprep.subr.bf16.mxu1 %v9668_v3  ;;  %v9684_v11 = vld [vmem:[#allocation17 + $0x7a0] ss:$48 sps:$4 sm:$0xff]  }
 0x6c9   :  { %4366 = vmatprep.subr.bf16.mxu0 %v9671_v50  ;;  %v9726_v3 = vld [vmem:[#allocation17 + $0xa40] ss:$48 sps:$4 sm:$0xff]   ;;  %v9729_v50 = vld [vmem:[#allocation17 + $0xa48] ss:$48 sps:$4 sm:$0xff]  }
 0x6ca   :  { %4285 = vmatpush1.bf16.msra.mxu1 %v9666_v51  ;;  %v9734_v51 = vld [vmem:[#allocation17 + $0xaa4] ss:$48 sps:$4 sm:$0xff]  }
 0x6cb   :  { %4367 = vmatpush1.bf16.msra.mxu0 %v9669_v35  ;;  %4286 = vmatprep.subr.bf16.mxu1 %v9674_v30  ;;  %v9737_v35 = vld [vmem:[#allocation17 + $0xaac] ss:$48 sps:$4 sm:$0xff]   ;;  %v9732_v30 = vld [vmem:[#allocation17 + $0xaa0] ss:$48 sps:$4 sm:$0xff]  }
 0x6cc   :  { %4368 = vmatprep.subr.bf16.mxu0 %v9677_v44  ;;  %v9735_v44 = vld [vmem:[#allocation17 + $0xaa8] ss:$48 sps:$4 sm:$0xff]  }
 0x6ce   :  { %4287 = vmatpush1.bf16.msra.mxu1 %v9672_v32  ;;  %v9740_v32 = vld [vmem:[#allocation17 + $0xb04] ss:$48 sps:$4 sm:$0xff]  }
 0x6cf   :  { %4369 = vmatpush1.bf16.msra.mxu0 %v9675_v52  ;;  %4288 = vmatprep.subr.bf16.mxu1 %v9680_v54  ;;  %v9743_v52 = vld [vmem:[#allocation17 + $0xb0c] ss:$48 sps:$4 sm:$0xff]   ;;  %v9738_v54 = vld [vmem:[#allocation17 + $0xb00] ss:$48 sps:$4 sm:$0xff]  }
 0x6d0   :  { %4370 = vmatprep.subr.bf16.mxu0 %v9683_v9  ;;  %v9741_v9 = vld [vmem:[#allocation17 + $0xb08] ss:$48 sps:$4 sm:$0xff]  }
 0x6d2   :  { %4289 = vmatpush1.bf16.msra.mxu1 %v9678_v41  ;;  %v9746_v41 = vld [vmem:[#allocation17 + $0xb64] ss:$48 sps:$4 sm:$0xff]  }
 0x6d3   :  { %4371 = vmatpush1.bf16.msra.mxu0 %v9681_v42  ;;  %4290 = vmatprep.subr.bf16.mxu1 %v9686_v56  ;;  %v9749_v42 = vld [vmem:[#allocation17 + $0xb6c] ss:$48 sps:$4 sm:$0xff]   ;;  %v9744_v56 = vld [vmem:[#allocation17 + $0xb60] ss:$48 sps:$4 sm:$0xff]  }
 0x6d4   :  { %4372 = vmatprep.subr.bf16.mxu0 %v9689_v57  ;;  %v9747_v57 = vld [vmem:[#allocation17 + $0xb68] ss:$48 sps:$4 sm:$0xff]  }
 0x6d6   :  { %4291 = vmatpush1.bf16.msra.mxu1 %v9684_v11  ;;  %v9752_v11 = vld [vmem:[#allocation17 + $0xbc4] ss:$48 sps:$4 sm:$0xff]  }
 0x6d7   :  { %4373 = vmatpush1.bf16.msra.mxu0 %v9687_v58  ;;  %4292 = vmatprep.subr.bf16.mxu1 %v9692_v59  ;;  %v9755_v58 = vld [vmem:[#allocation17 + $0xbcc] ss:$48 sps:$4 sm:$0xff]   ;;  %v9750_v59 = vld [vmem:[#allocation17 + $0xbc0] ss:$48 sps:$4 sm:$0xff]  }
 0x6d8   :  { %v11335_v63 = vpop.f32.mrb[16].mxu1  ;;  %v11337_v1 = vpop.f32.mrb[20].mxu0  ;;  %4374 = vmatprep.subr.bf16.mxu0 %v9695_v60  ;;  %v9753_v60 = vld [vmem:[#allocation17 + $0xbc8] ss:$48 sps:$4 sm:$0xff]  }
 0x6d9   :  { %v11339_v4 = vpop.f32.mrb[17].mxu1  ;;  %v11341_v43 = vpop.f32.mrb[21].mxu0 }
 0x6da   :  { %v3992_v5 = vpop.f32.mrb[18].mxu1  ;;  %v4074_v34 = vpop.f32.mrb[22].mxu0  ;;  %4293 = vmatpush1.bf16.msra.mxu1 %v9690_v33  ;;  %v9758_v33 = vld [vmem:[#allocation20 + $0x4] ss:$48 sps:$4 sm:$0xff]  }
 0x6db   :  { %4375 = vmatpush1.bf16.msra.mxu0 %v9693_v61  ;;  %v3993_v55 = vpop.f32.mrb[19].mxu1  ;;  %v4075_v10 = vpop.f32.mrb[23].mxu0  ;;  %4294 = vmatprep.subr.bf16.mxu1 %v9698_v62  ;;  %v9761_v61 = vld [vmem:[#allocation20 + $0xc] ss:$48 sps:$4 sm:$0xff]   ;;  %v9756_v62 = vld [vmem:[#allocation20] ss:$48 sps:$4 sm:$0xff]  }
 0x6dc   :  { %4376 = vmatprep.subr.bf16.mxu0 %v9701_v2  ;;  %v9759_v2 = vld [vmem:[#allocation20 + $0x8] ss:$48 sps:$4 sm:$0xff]   ;;  %v9764_v5 = vld [vmem:[#allocation20 + $0x64] ss:$48 sps:$4 sm:$0xff]   ;;  %v9767_v34 = vld [vmem:[#allocation20 + $0x6c] ss:$48 sps:$4 sm:$0xff]  }
 0x6dd   :  { %v9765_v55 = vld [vmem:[#allocation20 + $0x68] ss:$48 sps:$4 sm:$0xff]   ;;  %v9770_v10 = vld [vmem:[#allocation20 + $0xc4] ss:$48 sps:$4 sm:$0xff]  }
 0x6de   :  { %4295 = vmatpush1.bf16.msra.mxu1 %v9696_v8  ;;  %v9762_v8 = vld [vmem:[#allocation20 + $0x60] ss:$48 sps:$4 sm:$0xff]  }
 0x6df   :  { %4377 = vmatpush1.bf16.msra.mxu0 %v9699_v13  ;;  %4296 = vmatprep.subr.bf16.mxu1 %v9704_v14  ;;  %v9773_v13 = vld [vmem:[#allocation20 + $0xcc] ss:$48 sps:$4 sm:$0xff]   ;;  %v9768_v14 = vld [vmem:[#allocation20 + $0xc0] ss:$48 sps:$4 sm:$0xff]  }
 0x6e0   :  { %4378 = vmatprep.subr.bf16.mxu0 %v9707_v15  ;;  %v9771_v15 = vld [vmem:[#allocation20 + $0xc8] ss:$48 sps:$4 sm:$0xff]  }
 0x6e2   :  { %4297 = vmatpush1.bf16.msra.mxu1 %v9702_v23  ;;  %v9776_v23 = vld [vmem:[#allocation20 + $0x124] ss:$48 sps:$4 sm:$0xff]  }
 0x6e3   :  { %4379 = vmatpush1.bf16.msra.mxu0 %v9705_v25  ;;  %4298 = vmatprep.subr.bf16.mxu1 %v9710_v27  ;;  %v9779_v25 = vld [vmem:[#allocation20 + $0x12c] ss:$48 sps:$4 sm:$0xff]   ;;  %v9774_v27 = vld [vmem:[#allocation20 + $0x120] ss:$48 sps:$4 sm:$0xff]  }
 0x6e4   :  { %4380 = vmatprep.subr.bf16.mxu0 %v9713_v29  ;;  %v9782_v29 = vld [vmem:[#allocation20 + $0x184] ss:$48 sps:$4 sm:$0xff]  }
 0x6e6   :  { %4299 = vmatpush1.bf16.msra.mxu1 %v9708_v31  ;;  %v9785_v31 = vld [vmem:[#allocation20 + $0x18c] ss:$48 sps:$4 sm:$0xff]  }
 0x6e7   :  { %4381 = vmatpush1.bf16.msra.mxu0 %v9711_v36  ;;  %4300 = vmatprep.subr.bf16.mxu1 %v9716_v24  ;;  %v9780_v36 = vld [vmem:[#allocation20 + $0x180] ss:$48 sps:$4 sm:$0xff]   ;;  %v9783_v24 = vld [vmem:[#allocation20 + $0x188] ss:$48 sps:$4 sm:$0xff]  }
 0x6e8   :  { %4382 = vmatprep.subr.bf16.mxu0 %v9719_v37  ;;  %v9788_v37 = vld [vmem:[#allocation20 + $0x1e4] ss:$48 sps:$4 sm:$0xff]  }
 0x6ea   :  { %4301 = vmatpush1.bf16.msra.mxu1 %v9714_v38  ;;  %v9791_v38 = vld [vmem:[#allocation20 + $0x1ec] ss:$48 sps:$4 sm:$0xff]  }
 0x6eb   :  { %4383 = vmatpush1.bf16.msra.mxu0 %v9717_v12  ;;  %4302 = vmatprep.subr.bf16.mxu1 %v9722_v6  ;;  %v9786_v12 = vld [vmem:[#allocation20 + $0x1e0] ss:$48 sps:$4 sm:$0xff]   ;;  %v9789_v6 = vld [vmem:[#allocation20 + $0x1e8] ss:$48 sps:$4 sm:$0xff]  }
 0x6ec   :  { %4384 = vmatprep.subr.bf16.mxu0 %v9725_v45  ;;  %v9794_v45 = vld [vmem:[#allocation20 + $0x244] ss:$48 sps:$4 sm:$0xff]  }
 0x6ee   :  { %4303 = vmatpush1.bf16.msra.mxu1 %v9720_v47  ;;  %v9797_v47 = vld [vmem:[#allocation20 + $0x24c] ss:$48 sps:$4 sm:$0xff]  }
 0x6ef   :  { %4385 = vmatpush1.bf16.msra.mxu0 %v9723_v48  ;;  %4304 = vmatprep.subr.bf16.mxu1 %v9728_v7  ;;  %v9792_v48 = vld [vmem:[#allocation20 + $0x240] ss:$48 sps:$4 sm:$0xff]   ;;  %v9795_v7 = vld [vmem:[#allocation20 + $0x248] ss:$48 sps:$4 sm:$0xff]  }
 0x6f0   :  { %4386 = vmatprep.subr.bf16.mxu0 %v9731_v49  ;;  %v9800_v49 = vld [vmem:[#allocation20 + $0x2a4] ss:$48 sps:$4 sm:$0xff]  }
 0x6f2   :  { %4305 = vmatpush1.bf16.msra.mxu1 %v9726_v3  ;;  %v9803_v3 = vld [vmem:[#allocation20 + $0x2ac] ss:$48 sps:$4 sm:$0xff]  }
 0x6f3   :  { %4387 = vmatpush1.bf16.msra.mxu0 %v9729_v50  ;;  %4306 = vmatprep.subr.bf16.mxu1 %v9734_v51  ;;  %v9798_v50 = vld [vmem:[#allocation20 + $0x2a0] ss:$48 sps:$4 sm:$0xff]   ;;  %v9801_v51 = vld [vmem:[#allocation20 + $0x2a8] ss:$48 sps:$4 sm:$0xff]  }
 0x6f4   :  { %4388 = vmatprep.subr.bf16.mxu0 %v9737_v35  ;;  %v9806_v35 = vld [vmem:[#allocation20 + $0x304] ss:$48 sps:$4 sm:$0xff]  }
 0x6f6   :  { %4307 = vmatpush1.bf16.msra.mxu1 %v9732_v30  ;;  %v9809_v30 = vld [vmem:[#allocation20 + $0x30c] ss:$48 sps:$4 sm:$0xff]  }
 0x6f7   :  { %4389 = vmatpush1.bf16.msra.mxu0 %v9735_v44  ;;  %4308 = vmatprep.subr.bf16.mxu1 %v9740_v32  ;;  %v9804_v44 = vld [vmem:[#allocation20 + $0x300] ss:$48 sps:$4 sm:$0xff]   ;;  %v9807_v32 = vld [vmem:[#allocation20 + $0x308] ss:$48 sps:$4 sm:$0xff]  }
 0x6f8   :  { %4390 = vmatprep.subr.bf16.mxu0 %v9743_v52  ;;  %v9812_v52 = vld [vmem:[#allocation20 + $0x364] ss:$48 sps:$4 sm:$0xff]  }
 0x6fa   :  { %4309 = vmatpush1.bf16.msra.mxu1 %v9738_v54  ;;  %v9815_v54 = vld [vmem:[#allocation20 + $0x36c] ss:$48 sps:$4 sm:$0xff]  }
 0x6fb   :  { %4391 = vmatpush1.bf16.msra.mxu0 %v9741_v9  ;;  %4310 = vmatprep.subr.bf16.mxu1 %v9746_v41  ;;  %v9810_v9 = vld [vmem:[#allocation20 + $0x360] ss:$48 sps:$4 sm:$0xff]   ;;  %v9813_v41 = vld [vmem:[#allocation20 + $0x368] ss:$48 sps:$4 sm:$0xff]  }
 0x6fc   :  { %4392 = vmatprep.subr.bf16.mxu0 %v9749_v42  ;;  %v9818_v42 = vld [vmem:[#allocation20 + $0x3c4] ss:$48 sps:$4 sm:$0xff]  }
 0x6fe   :  { %4311 = vmatpush1.bf16.msra.mxu1 %v9744_v56  ;;  %v9821_v56 = vld [vmem:[#allocation20 + $0x3cc] ss:$48 sps:$4 sm:$0xff]  }
 0x6ff   :  { %4393 = vmatpush1.bf16.msra.mxu0 %v9747_v57  ;;  %4312 = vmatprep.subr.bf16.mxu1 %v9752_v11  ;;  %v9816_v57 = vld [vmem:[#allocation20 + $0x3c0] ss:$48 sps:$4 sm:$0xff]   ;;  %v9819_v11 = vld [vmem:[#allocation20 + $0x3c8] ss:$48 sps:$4 sm:$0xff]  }
 0x700   :  { %4394 = vmatprep.subr.bf16.mxu0 %v9755_v58  ;;  %v9824_v58 = vld [vmem:[#allocation20 + $0x424] ss:$48 sps:$4 sm:$0xff]  }
 0x702   :  { %4313 = vmatpush1.bf16.msra.mxu1 %v9750_v59  ;;  %v9827_v59 = vld [vmem:[#allocation20 + $0x42c] ss:$48 sps:$4 sm:$0xff]  }
 0x703   :  { %4395 = vmatpush1.bf16.msra.mxu0 %v9753_v60  ;;  %6801 = vmatprep.subr.bf16.mxu1 %v9758_v33  ;;  %v9822_v60 = vld [vmem:[#allocation20 + $0x420] ss:$48 sps:$4 sm:$0xff]   ;;  %v9825_v33 = vld [vmem:[#allocation20 + $0x428] ss:$48 sps:$4 sm:$0xff]  }
 0x704   :  { %6883 = vmatprep.subr.bf16.mxu0 %v9761_v61  ;;  %v9830_v61 = vld [vmem:[#allocation20 + $0x484] ss:$48 sps:$4 sm:$0xff]  }
 0x705   :  { %4315 = vmatmul.mubr.bf16.vlgmr.msra.gmra.mrb[24].mxu1 %v11317_v46 }
 0x706   :  { %4397 = vmatmul.mubr.bf16.vlgmr.msra.gmra.mrb[28].mxu0 %v11317_v46  ;;  %6802 = vmatpush1.bf16.msra.mxu1 %v9756_v62  ;;  %v9777_v46 = vld [vmem:[#allocation20 + $0x128] ss:$48 sps:$4 sm:$0xff]   ;;  %v9833_v62 = vld [vmem:[#allocation20 + $0x48c] ss:$48 sps:$4 sm:$0xff]  }
 0x707   :  { %6884 = vmatpush1.bf16.msra.mxu0 %v9759_v2  ;;  %6803 = vmatprep.subr.bf16.mxu1 %v9764_v5  ;;  %v9828_v2 = vld [vmem:[#allocation20 + $0x480] ss:$48 sps:$4 sm:$0xff]   ;;  %v9831_v5 = vld [vmem:[#allocation20 + $0x488] ss:$48 sps:$4 sm:$0xff]  }
 0x708   :  { %6885 = vmatprep.subr.bf16.mxu0 %v9767_v34  ;;  %v1929_v34 = vld [vmem:[#allocation19] sm:$0xff] }
 0x70a   :  { %6804 = vmatpush1.bf16.msra.mxu1 %v9762_v8  ;;  %v1936_v8 = vrot.slane %v1929_v34, %v11242_v17 }
 0x70b   :  { %6886 = vmatpush1.bf16.msra.mxu0 %v9765_v55  ;;  %6805 = vmatprep.subr.bf16.mxu1 %v9770_v10  ;;  %v1944_v55 = vrot.slane %v1929_v34, %v11202_v26  ;;  %v1940_v10 = vrot.slane %v1929_v34, %v11248_v20 }
 0x70c   :  { %6887 = vmatprep.subr.bf16.mxu0 %v9773_v13  ;;  %v1948_v13 = vrot.slane %v1929_v34, %v11239_v16 }
 0x70e   :  { %6806 = vmatpush1.bf16.msra.mxu1 %v9768_v14  ;;  %v1952_v14 = vrot.slane %v1929_v34, %v11251_v21 }
 0x70f   :  { %6888 = vmatpush1.bf16.msra.mxu0 %v9771_v15  ;;  %6807 = vmatprep.subr.bf16.mxu1 %v9776_v23  ;;  %v1960_v15 = vrot.slane %v1929_v34, %v11217_v40  ;;  %v1956_v23 = vrot.slane %v1929_v34, %v11254_v22 }
 0x710   :  { %6889 = vmatprep.subr.bf16.mxu0 %v9779_v25  ;;  %v8910_v25 = vadd.f32 %v11335_v63, %v1936_v8 }
 0x712   :  { %6808 = vmatpush1.bf16.msra.mxu1 %v9774_v27  ;;  %v1964_v27 = vrot.slane %v1929_v34, %v11245_v18  ;;  %v1930_v34 = vld [vmem:[#allocation19 + $0x8] sm:$0xf] }
 0x713   :  { %6890 = vmatpush1.bf16.msra.mxu0 %v9777_v46  ;;  %6809 = vmatprep.subr.bf16.mxu1 %v9782_v29  ;;  %v8912_v46 = vadd.f32 %v11337_v1, %v1944_v55  ;;  %v8911_v29 = vadd.f32 %v11339_v4, %v1940_v10  ;;  %v4405_v1 = vmul.f32 %v8910_v25, %v11274_v39 }
 0x714   :  { %6891 = vmatprep.subr.bf16.mxu0 %v9785_v31  ;;  %v1968_v8 = vrot.slane %v1930_v34, %v11242_v17  ;;  %v1976_v55 = vrot.slane %v1930_v34, %v11202_v26  ;;  %v1972_v10 = vrot.slane %v1930_v34, %v11248_v20 }
 0x716   :  { %6810 = vmatpush1.bf16.msra.mxu1 %v9780_v36  ;;  %v9836_v36 = vld [vmem:[#allocation20 + $0x4e4] ss:$48 sps:$4 sm:$0xff]  }
 0x717   :  { %6892 = vmatpush1.bf16.msra.mxu0 %v9783_v24  ;;  %6811 = vmatprep.subr.bf16.mxu1 %v9788_v37  ;;  %v9839_v24 = vld [vmem:[#allocation20 + $0x4ec] ss:$48 sps:$4 sm:$0xff]   ;;  %v8913_v37 = vadd.f32 %v11341_v43, %v1948_v13  ;;  %v4407_v43 = vmul.f32 %v8912_v46, %v11274_v39  ;;  %v1980_v13 = vrot.slane %v1930_v34, %v11239_v16  ;;  %v9882_v34 = vld [vmem:[#allocation20 + $0x7e0] ss:$48 sps:$4 sm:$0xff]  }
 0x718   :  { %6893 = vmatprep.subr.bf16.mxu0 %v9791_v38 }
 0x71a   :  { %6812 = vmatpush1.bf16.msra.mxu1 %v9786_v12 }
 0x71b   :  { %6894 = vmatpush1.bf16.msra.mxu0 %v9789_v6  ;;  %6813 = vmatprep.subr.bf16.mxu1 %v9794_v45  ;;  %v9834_v45 = vld [vmem:[#allocation20 + $0x4e0] ss:$48 sps:$4 sm:$0xff]  }
 0x71c   :  { %6895 = vmatprep.subr.bf16.mxu0 %v9797_v47  ;;  %v9837_v47 = vld [vmem:[#allocation20 + $0x4e8] ss:$48 sps:$4 sm:$0xff]  }
 0x71e   :  { %6814 = vmatpush1.bf16.msra.mxu1 %v9792_v48 }
 0x71f   :  { %6896 = vmatpush1.bf16.msra.mxu0 %v9795_v7  ;;  %6815 = vmatprep.subr.bf16.mxu1 %v9800_v49 }
 0x720   :  { %6897 = vmatprep.subr.bf16.mxu0 %v9803_v3 }
 0x722   :  { %6816 = vmatpush1.bf16.msra.mxu1 %v9798_v50 }
 0x723   :  { %6898 = vmatpush1.bf16.msra.mxu0 %v9801_v51  ;;  %6817 = vmatprep.subr.bf16.mxu1 %v9806_v35  ;;  %v4406_v35 = vmul.f32 %v8911_v29, %v11274_v39 }
 0x724   :  { %6899 = vmatprep.subr.bf16.mxu0 %v9809_v30 }
 0x726   :  { %6818 = vmatpush1.bf16.msra.mxu1 %v9804_v44 }
 0x727   :  { %6900 = vmatpush1.bf16.msra.mxu0 %v9807_v32  ;;  %6819 = vmatprep.subr.bf16.mxu1 %v9812_v52  ;;  %v9842_v52 = vld [vmem:[#allocation20 + $0x544] ss:$48 sps:$4 sm:$0xff]  }
 0x728   :  { %6901 = vmatprep.subr.bf16.mxu0 %v9815_v54  ;;  %v9845_v54 = vld [vmem:[#allocation20 + $0x54c] ss:$48 sps:$4 sm:$0xff]  }
 0x72a   :  { %6820 = vmatpush1.bf16.msra.mxu1 %v9810_v9  ;;  %v4408_v9 = vmul.f32 %v8913_v37, %v11274_v39 }
 0x72b   :  { %6902 = vmatpush1.bf16.msra.mxu0 %v9813_v41  ;;  %6821 = vmatprep.subr.bf16.mxu1 %v9818_v42 }
 0x72c   :  { %6903 = vmatprep.subr.bf16.mxu0 %v9821_v56  ;;  %v9840_v56 = vld [vmem:[#allocation20 + $0x540] ss:$48 sps:$4 sm:$0xff]  }
 0x72e   :  { %6822 = vmatpush1.bf16.msra.mxu1 %v9816_v57  ;;  %v9843_v57 = vld [vmem:[#allocation20 + $0x548] ss:$48 sps:$4 sm:$0xff]  }
 0x72f   :  { %6904 = vmatpush1.bf16.msra.mxu0 %v9819_v11  ;;  %6823 = vmatprep.subr.bf16.mxu1 %v9824_v58 }
 0x730   :  { %6905 = vmatprep.subr.bf16.mxu0 %v9827_v59 }
 0x732   :  { %6824 = vmatpush1.bf16.msra.mxu1 %v9822_v60  ;;  %v9848_v60 = vld [vmem:[#allocation20 + $0x5a4] ss:$48 sps:$4 sm:$0xff]  }
 0x733   :  { %6906 = vmatpush1.bf16.msra.mxu0 %v9825_v33  ;;  %6825 = vmatprep.subr.bf16.mxu1 %v9830_v61  ;;  %v9851_v33 = vld [vmem:[#allocation20 + $0x5ac] ss:$48 sps:$4 sm:$0xff]   ;;  %v9846_v61 = vld [vmem:[#allocation20 + $0x5a0] ss:$48 sps:$4 sm:$0xff]  }
 0x734   :  { %6907 = vmatprep.subr.bf16.mxu0 %v9833_v62  ;;  %v9849_v62 = vld [vmem:[#allocation20 + $0x5a8] ss:$48 sps:$4 sm:$0xff]  }
 0x736   :  { %6826 = vmatpush1.bf16.msra.mxu1 %v9828_v2  ;;  %v9854_v2 = vld [vmem:[#allocation20 + $0x604] ss:$48 sps:$4 sm:$0xff]  }
 0x737   :  { %6908 = vmatpush1.bf16.msra.mxu0 %v9831_v5  ;;  %6827 = vmatprep.subr.bf16.mxu1 %v9836_v36  ;;  %v9857_v5 = vld [vmem:[#allocation20 + $0x60c] ss:$48 sps:$4 sm:$0xff]  }
 0x738   :  { %6909 = vmatprep.subr.bf16.mxu0 %v9839_v24 }
 0x73a   :  { %6828 = vmatpush1.bf16.msra.mxu1 %v9834_v45 }
 0x73b   :  { %6910 = vmatpush1.bf16.msra.mxu0 %v9837_v47  ;;  %6829 = vmatprep.subr.bf16.mxu1 %v9842_v52  ;;  %v9858_v52 = vld [vmem:[#allocation20 + $0x660] ss:$48 sps:$4 sm:$0xff]  }
 0x73c   :  { %6911 = vmatprep.subr.bf16.mxu0 %v9845_v54  ;;  %v9861_v54 = vld [vmem:[#allocation20 + $0x668] ss:$48 sps:$4 sm:$0xff]  }
 0x73e   :  { %6830 = vmatpush1.bf16.msra.mxu1 %v9840_v56  ;;  %v9867_v56 = vld [vmem:[#allocation20 + $0x6c8] ss:$48 sps:$4 sm:$0xff]  }
 0x73f   :  { %6912 = vmatpush1.bf16.msra.mxu0 %v9843_v57  ;;  %6831 = vmatprep.subr.bf16.mxu1 %v9848_v60  ;;  %v9872_v57 = vld [vmem:[#allocation20 + $0x724] ss:$48 sps:$4 sm:$0xff]  }
 0x740   :  { %6913 = vmatprep.subr.bf16.mxu0 %v9851_v33  ;;  %v9878_v60 = vld [vmem:[#allocation20 + $0x784] ss:$48 sps:$4 sm:$0xff]   ;;  %v9881_v33 = vld [vmem:[#allocation20 + $0x78c] ss:$48 sps:$4 sm:$0xff]  }
 0x742   :  { %6832 = vmatpush1.bf16.msra.mxu1 %v9846_v61  ;;  %v9876_v61 = vld [vmem:[#allocation20 + $0x780] ss:$48 sps:$4 sm:$0xff]  }
 0x743   :  { %6914 = vmatpush1.bf16.msra.mxu0 %v9849_v62  ;;  %6842 = vmatprep.subr.bf16.mxu1 %v9854_v2  ;;  %v9879_v62 = vld [vmem:[#allocation20 + $0x788] ss:$48 sps:$4 sm:$0xff]   ;;  %v9884_v2 = vld [vmem:[#allocation20 + $0x7e4] ss:$48 sps:$4 sm:$0xff]  }
 0x744   :  { %6924 = vmatprep.subr.bf16.mxu0 %v9857_v5  ;;  %v9887_v5 = vld [vmem:[#allocation20 + $0x7ec] ss:$48 sps:$4 sm:$0xff]  }
 0x758   :  { %v4152_v31 = vpop.f32.mrb[20].mxu1 }
 0x759   :  { %v8914_v38 = vadd.f32 %v4152_v31, %v1952_v14  ;;  %v4234_v12 = vpop.f32.mrb[24].mxu0  ;;  %v4154_v6 = vpop.f32.mrb[21].mxu1 }
 0x75a   :  { %v8916_v48 = vadd.f32 %v4234_v12, %v1960_v15  ;;  %v8915_v7 = vadd.f32 %v4154_v6, %v1956_v23  ;;  %v4236_v49 = vpop.f32.mrb[25].mxu0  ;;  %v4156_v63 = vpop.f32.mrb[22].mxu1 }
 0x75b   :  { %v4409_v4 = vmul.f32 %v8914_v38, %v11285_v28  ;;  %v8917_v3 = vadd.f32 %v4236_v49, %v1964_v27  ;;  %v4238_v50 = vpop.f32.mrb[26].mxu0  ;;  %v4157_v51 = vpop.f32.mrb[23].mxu1 }
 0x75c   :  { %v4411_v30 = vmul.f32 %v8916_v48, %v11285_v28  ;;  %v4410_v44 = vmul.f32 %v8915_v7, %v11285_v28  ;;  %v4239_v32 = vpop.f32.mrb[27].mxu0  ;;  %v9852_v51 = vld [vmem:[#allocation20 + $0x600] ss:$48 sps:$4 sm:$0xff]  }
 0x75d   :  { %v4413_v41 = vadd.f32 %v4409_v4, %v4405_v1  ;;  %v4412_v42 = vmul.f32 %v8917_v3, %v11285_v28 }
 0x75e   :  { %v4415_v11 = vadd.f32 %v4411_v30, %v4407_v43  ;;  %v4414_v58 = vadd.f32 %v4410_v44, %v4406_v35  ;;  %v9855_v43 = vld [vmem:[#allocation20 + $0x608] ss:$48 sps:$4 sm:$0xff]   ;;  %v9860_v30 = vld [vmem:[#allocation20 + $0x664] ss:$48 sps:$4 sm:$0xff]   ;;  %v9863_v44 = vld [vmem:[#allocation20 + $0x66c] ss:$48 sps:$4 sm:$0xff]  }
 0x75f   :  { %v4416_v59 = vadd.f32 %v4412_v42, %v4408_v9  ;;  %v9866_v9 = vld [vmem:[#allocation20 + $0x6c4] ss:$48 sps:$4 sm:$0xff]   ;;  %v9864_v42 = vld [vmem:[#allocation20 + $0x6c0] ss:$48 sps:$4 sm:$0xff]  }
 0x7d8   :  { %v4316_v14 = vpop.f32.mrb[24].mxu1 }
 0x7d9   :  { %v8918_v15 = vadd.f32 %v4316_v14, %v1968_v8  ;;  %v4398_v23 = vpop.f32.mrb[28].mxu0  ;;  %v4318_v25 = vpop.f32.mrb[25].mxu1  ;;  %v9885_v8 = vld [vmem:[#allocation20 + $0x7e8] ss:$48 sps:$4 sm:$0xff]  }
 0x7da   :  { %v8920_v27 = vadd.f32 %v4398_v23, %v1976_v55  ;;  %v8919_v46 = vadd.f32 %v4318_v25, %v1972_v10  ;;  %v4400_v29 = vpop.f32.mrb[29].mxu0  ;;  %v4320_v31 = vpop.f32.mrb[26].mxu1  ;;  %v9890_v55 = vld [vmem:[#allocation20 + $0x844] ss:$48 sps:$4 sm:$0xff]   ;;  %v9893_v10 = vld [vmem:[#allocation20 + $0x84c] ss:$48 sps:$4 sm:$0xff]  }
 0x7db   :  { %v4417_v36 = vmul.f32 %v8918_v15, %v11283_v53  ;;  %v8921_v24 = vadd.f32 %v4400_v29, %v1980_v13  ;;  %v4402_v37 = vpop.f32.mrb[30].mxu0  ;;  %v4321_v38 = vpop.f32.mrb[27].mxu1  ;;  %v9888_v13 = vld [vmem:[#allocation20 + $0x840] ss:$48 sps:$4 sm:$0xff]   ;;  %v9891_v14 = vld [vmem:[#allocation20 + $0x848] ss:$48 sps:$4 sm:$0xff]  }
 0x7dc   :  { %v4419_v12 = vmul.f32 %v8920_v27, %v11283_v53  ;;  %v4418_v6 = vmul.f32 %v8919_v46, %v11283_v53  ;;  %v4403_v45 = vpop.f32.mrb[31].mxu0  ;;  %v9896_v15 = vld [vmem:[#allocation20 + $0x8a4] ss:$48 sps:$4 sm:$0xff]   ;;  %v9899_v23 = vld [vmem:[#allocation20 + $0x8ac] ss:$48 sps:$4 sm:$0xff]  }
 0x7dd   :  { %v4421_v47 = vadd.f32 %v4417_v36, %v4413_v41  ;;  %v4420_v48 = vmul.f32 %v8921_v24, %v11283_v53  ;;  %v9869_v41 = vld [vmem:[#allocation20 + $0x6cc] ss:$48 sps:$4 sm:$0xff]   ;;  %v9894_v25 = vld [vmem:[#allocation20 + $0x8a0] ss:$48 sps:$4 sm:$0xff]   ;;  %v9897_v27 = vld [vmem:[#allocation20 + $0x8a8] ss:$48 sps:$4 sm:$0xff]  }
 0x7de   :  { %v11373_v7 = vadd.f32 %v4419_v12, %v4415_v11  ;;  %v4422_v49 = vadd.f32 %v4418_v6, %v4414_v58  ;;  %v9875_v11 = vld [vmem:[#allocation20 + $0x72c] ss:$48 sps:$4 sm:$0xff]   ;;  %v9870_v58 = vld [vmem:[#allocation20 + $0x720] ss:$48 sps:$4 sm:$0xff]   ;;  %v9902_v46 = vld [vmem:[#allocation20 + $0x904] ss:$48 sps:$4 sm:$0xff]  }
 0x7df   :  { %v4425_v63 = vmax.f32 %v4421_v47, 0.0  ;;  %v4424_v1 = vadd.f32 %v4420_v48, %v4416_v59  ;;  %v9873_v59 = vld [vmem:[#allocation20 + $0x728] ss:$48 sps:$4 sm:$0xff]   ;;  %v9905_v29 = vld [vmem:[#allocation20 + $0x90c] ss:$48 sps:$4 sm:$0xff]  }
 0x7e0   :  { %v4426_v4 = vmax.f32 %v4422_v49, 0.0  ;;  %v9900_v31 = vld [vmem:[#allocation20 + $0x900] ss:$48 sps:$4 sm:$0xff]   ;;  %v9903_v36 = vld [vmem:[#allocation20 + $0x908] ss:$48 sps:$4 sm:$0xff]  }
 0x7e1   :  { %v4428_v3 = vmax.f32 %v4424_v1, 0.0  ;;  %v11377_v35 = vpack.c.bf16 %v4425_v63, %v4425_v63  ;;  %v9908_v24 = vld [vmem:[#allocation20 + $0x964] ss:$48 sps:$4 sm:$0xff]   ;;  %v9911_v37 = vld [vmem:[#allocation20 + $0x96c] ss:$48 sps:$4 sm:$0xff]  }
 0x7e2   :  { %v11375_v50 = vpack.c.bf16 %v4426_v4, %v4426_v4  ;;  %v9906_v38 = vld [vmem:[#allocation20 + $0x960] ss:$48 sps:$4 sm:$0xff]   ;;  %v9909_v12 = vld [vmem:[#allocation20 + $0x968] ss:$48 sps:$4 sm:$0xff]   ;;  %v9914_v6 = vld [vmem:[#allocation20 + $0x9c4] ss:$48 sps:$4 sm:$0xff]  }
 0x7e3   :  { %v11381_v32 = vpack.c.bf16 %v4428_v3, %v4428_v3  ;;  %v9917_v45 = vld [vmem:[#allocation20 + $0x9cc] ss:$48 sps:$4 sm:$0xff]   ;;  %v9912_v47 = vld [vmem:[#allocation20 + $0x9c0] ss:$48 sps:$4 sm:$0xff]   ;;  %v9915_v48 = vld [vmem:[#allocation20 + $0x9c8] ss:$48 sps:$4 sm:$0xff]  }
 0x7e4   :  { %6833 = vmatprep.mubr.bf16.mxu1 %v11375_v50  ;;  %6915 = vmatprep.mubr.bf16.mxu0 %v11375_v50  ;;  %v9920_v49 = vld [vmem:[#allocation20 + $0xa24] ss:$48 sps:$4 sm:$0xff]   ;;  %v9923_v63 = vld [vmem:[#allocation20 + $0xa2c] ss:$48 sps:$4 sm:$0xff]   ;;  %v9918_v1 = vld [vmem:[#allocation20 + $0xa20] ss:$48 sps:$4 sm:$0xff]  }
 0x7e5   :  { %6834 = vmatmul.mubr.bf16.vlgmr.msra.gmra.mrb[28].mxu1 %v11377_v35  ;;  %6916 = vmatmul.mubr.bf16.vlgmr.msra.gmra.mrb[32].mxu0 %v11377_v35  ;;  %v9921_v4 = vld [vmem:[#allocation20 + $0xa28] ss:$48 sps:$4 sm:$0xff]   ;;  %v9926_v3 = vld [vmem:[#allocation20 + $0xa84] ss:$48 sps:$4 sm:$0xff]  }
 0x7e6   :  { %6843 = vmatpush1.bf16.msra.mxu1 %v9852_v51  ;;  %6925 = vmatpush1.bf16.msra.mxu0 %v9855_v43  ;;  %v9929_v51 = vld [vmem:[#allocation20 + $0xa8c] ss:$48 sps:$4 sm:$0xff]   ;;  %v9924_v43 = vld [vmem:[#allocation20 + $0xa80] ss:$48 sps:$4 sm:$0xff]  }
 0x7e7   :  { %6874 = vmatprep.mubr.bf16.mxu1 %v11381_v32  ;;  %6956 = vmatprep.mubr.bf16.mxu0 %v11381_v32 }
 0x7e8   :  { %6844 = vmatprep.subr.bf16.mxu1 %v9860_v30  ;;  %6926 = vmatprep.subr.bf16.mxu0 %v9863_v44  ;;  %v9927_v30 = vld [vmem:[#allocation20 + $0xa88] ss:$48 sps:$4 sm:$0xff]   ;;  %v9932_v44 = vld [vmem:[#allocation20 + $0xae4] ss:$48 sps:$4 sm:$0xff]  }
 0x7ea   :  { %6845 = vmatpush1.bf16.msra.mxu1 %v9858_v52  ;;  %6927 = vmatpush1.bf16.msra.mxu0 %v9861_v54  ;;  %v9935_v52 = vld [vmem:[#allocation20 + $0xaec] ss:$48 sps:$4 sm:$0xff]   ;;  %v9930_v54 = vld [vmem:[#allocation20 + $0xae0] ss:$48 sps:$4 sm:$0xff]  }
 0x7eb   :  { %6846 = vmatprep.subr.bf16.mxu1 %v9866_v9  ;;  %6928 = vmatprep.subr.bf16.mxu0 %v9869_v41  ;;  %v9933_v9 = vld [vmem:[#allocation20 + $0xae8] ss:$48 sps:$4 sm:$0xff]   ;;  %v9938_v41 = vld [vmem:[#allocation20 + $0xb44] ss:$48 sps:$4 sm:$0xff]  }
 0x7ee   :  { %6847 = vmatpush1.bf16.msra.mxu1 %v9864_v42  ;;  %6929 = vmatpush1.bf16.msra.mxu0 %v9867_v56  ;;  %v9941_v42 = vld [vmem:[#allocation20 + $0xb4c] ss:$48 sps:$4 sm:$0xff]   ;;  %v9936_v56 = vld [vmem:[#allocation20 + $0xb40] ss:$48 sps:$4 sm:$0xff]  }
 0x7ef   :  { %6848 = vmatprep.subr.bf16.mxu1 %v9872_v57  ;;  %6930 = vmatprep.subr.bf16.mxu0 %v9875_v11  ;;  %v9939_v57 = vld [vmem:[#allocation20 + $0xb48] ss:$48 sps:$4 sm:$0xff]   ;;  %v9944_v11 = vld [vmem:[#allocation20 + $0xba4] ss:$48 sps:$4 sm:$0xff]  }
 0x7f2   :  { %6849 = vmatpush1.bf16.msra.mxu1 %v9870_v58  ;;  %6931 = vmatpush1.bf16.msra.mxu0 %v9873_v59  ;;  %v9947_v58 = vld [vmem:[#allocation20 + $0xbac] ss:$48 sps:$4 sm:$0xff]   ;;  %v9942_v59 = vld [vmem:[#allocation20 + $0xba0] ss:$48 sps:$4 sm:$0xff]  }
 0x7f3   :  { %6850 = vmatprep.subr.bf16.mxu1 %v9878_v60  ;;  %6932 = vmatprep.subr.bf16.mxu0 %v9881_v33  ;;  %v9945_v60 = vld [vmem:[#allocation20 + $0xba8] ss:$48 sps:$4 sm:$0xff]   ;;  %v4427_v33 = vmax.f32 %v11373_v7, 0.0  ;;  %v9954_v7 = vld [vmem:[#allocation20 + $0x70] ss:$48 sps:$4 sm:$0xff]  }
 0x7f6   :  { %6851 = vmatpush1.bf16.msra.mxu1 %v9876_v61  ;;  %6933 = vmatpush1.bf16.msra.mxu0 %v9879_v62  ;;  %v9950_v61 = vld [vmem:[#allocation20 + $0x14] ss:$48 sps:$4 sm:$0xff]   ;;  %v9953_v62 = vld [vmem:[#allocation20 + $0x1c] ss:$48 sps:$4 sm:$0xff]  }
 0x7f7   :  { %6852 = vmatprep.subr.bf16.mxu1 %v9884_v2  ;;  %6934 = vmatprep.subr.bf16.mxu0 %v9887_v5  ;;  %v9948_v2 = vld [vmem:[#allocation20 + $0x10] ss:$48 sps:$4 sm:$0xff]   ;;  %v11388_v5 = vpack.c.bf16 %v4427_v33, %v4427_v33 }
 0x7f8   :  { %v10014_v33 = vld [vmem:[#allocation20 + $0x430] ss:$48 sps:$4 sm:$0xff]  }
 0x7fa   :  { %6853 = vmatpush1.bf16.msra.mxu1 %v9882_v34  ;;  %6935 = vmatpush1.bf16.msra.mxu0 %v9885_v8  ;;  %v9951_v34 = vld [vmem:[#allocation20 + $0x18] ss:$48 sps:$4 sm:$0xff]   ;;  %v9956_v8 = vld [vmem:[#allocation20 + $0x74] ss:$48 sps:$4 sm:$0xff]  }
 0x7fb   :  { %6854 = vmatprep.subr.bf16.mxu1 %v9890_v55  ;;  %6936 = vmatprep.subr.bf16.mxu0 %v9893_v10  ;;  %v9959_v55 = vld [vmem:[#allocation20 + $0x7c] ss:$48 sps:$4 sm:$0xff]   ;;  %v9957_v10 = vld [vmem:[#allocation20 + $0x78] ss:$48 sps:$4 sm:$0xff]  }
 0x7fe   :  { %6855 = vmatpush1.bf16.msra.mxu1 %v9888_v13  ;;  %6937 = vmatpush1.bf16.msra.mxu0 %v9891_v14  ;;  %v9962_v13 = vld [vmem:[#allocation20 + $0xd4] ss:$48 sps:$4 sm:$0xff]   ;;  %v9965_v14 = vld [vmem:[#allocation20 + $0xdc] ss:$48 sps:$4 sm:$0xff]  }
 0x7ff   :  { %6856 = vmatprep.subr.bf16.mxu1 %v9896_v15  ;;  %6938 = vmatprep.subr.bf16.mxu0 %v9899_v23  ;;  %v9960_v15 = vld [vmem:[#allocation20 + $0xd0] ss:$48 sps:$4 sm:$0xff]   ;;  %v9963_v23 = vld [vmem:[#allocation20 + $0xd8] ss:$48 sps:$4 sm:$0xff]  }
 0x802   :  { %6857 = vmatpush1.bf16.msra.mxu1 %v9894_v25  ;;  %6939 = vmatpush1.bf16.msra.mxu0 %v9897_v27  ;;  %v9968_v25 = vld [vmem:[#allocation20 + $0x134] ss:$48 sps:$4 sm:$0xff]   ;;  %v9971_v27 = vld [vmem:[#allocation20 + $0x13c] ss:$48 sps:$4 sm:$0xff]  }
 0x803   :  { %6858 = vmatprep.subr.bf16.mxu1 %v9902_v46  ;;  %6940 = vmatprep.subr.bf16.mxu0 %v9905_v29  ;;  %v9966_v46 = vld [vmem:[#allocation20 + $0x130] ss:$48 sps:$4 sm:$0xff]   ;;  %v9969_v29 = vld [vmem:[#allocation20 + $0x138] ss:$48 sps:$4 sm:$0xff]  }
 0x806   :  { %6859 = vmatpush1.bf16.msra.mxu1 %v9900_v31  ;;  %6941 = vmatpush1.bf16.msra.mxu0 %v9903_v36  ;;  %v9974_v31 = vld [vmem:[#allocation20 + $0x194] ss:$48 sps:$4 sm:$0xff]   ;;  %v9977_v36 = vld [vmem:[#allocation20 + $0x19c] ss:$48 sps:$4 sm:$0xff]  }
 0x807   :  { %6860 = vmatprep.subr.bf16.mxu1 %v9908_v24  ;;  %6942 = vmatprep.subr.bf16.mxu0 %v9911_v37  ;;  %v9972_v24 = vld [vmem:[#allocation20 + $0x190] ss:$48 sps:$4 sm:$0xff]   ;;  %v9975_v37 = vld [vmem:[#allocation20 + $0x198] ss:$48 sps:$4 sm:$0xff]  }
 0x80a   :  { %6861 = vmatpush1.bf16.msra.mxu1 %v9906_v38  ;;  %6943 = vmatpush1.bf16.msra.mxu0 %v9909_v12  ;;  %v9980_v38 = vld [vmem:[#allocation20 + $0x1f4] ss:$48 sps:$4 sm:$0xff]   ;;  %v9983_v12 = vld [vmem:[#allocation20 + $0x1fc] ss:$48 sps:$4 sm:$0xff]  }
 0x80b   :  { %6862 = vmatprep.subr.bf16.mxu1 %v9914_v6  ;;  %6944 = vmatprep.subr.bf16.mxu0 %v9917_v45  ;;  %v9978_v6 = vld [vmem:[#allocation20 + $0x1f0] ss:$48 sps:$4 sm:$0xff]   ;;  %v9981_v45 = vld [vmem:[#allocation20 + $0x1f8] ss:$48 sps:$4 sm:$0xff]  }
 0x80e   :  { %6863 = vmatpush1.bf16.msra.mxu1 %v9912_v47  ;;  %6945 = vmatpush1.bf16.msra.mxu0 %v9915_v48  ;;  %v9986_v47 = vld [vmem:[#allocation20 + $0x254] ss:$48 sps:$4 sm:$0xff]   ;;  %v9989_v48 = vld [vmem:[#allocation20 + $0x25c] ss:$48 sps:$4 sm:$0xff]  }
 0x80f   :  { %6864 = vmatprep.subr.bf16.mxu1 %v9920_v49  ;;  %6946 = vmatprep.subr.bf16.mxu0 %v9923_v63  ;;  %v9984_v49 = vld [vmem:[#allocation20 + $0x250] ss:$48 sps:$4 sm:$0xff]   ;;  %v9987_v63 = vld [vmem:[#allocation20 + $0x258] ss:$48 sps:$4 sm:$0xff]  }
 0x812   :  { %6865 = vmatpush1.bf16.msra.mxu1 %v9918_v1  ;;  %6947 = vmatpush1.bf16.msra.mxu0 %v9921_v4  ;;  %v9992_v1 = vld [vmem:[#allocation20 + $0x2b4] ss:$48 sps:$4 sm:$0xff]   ;;  %v9995_v4 = vld [vmem:[#allocation20 + $0x2bc] ss:$48 sps:$4 sm:$0xff]  }
 0x813   :  { %6866 = vmatprep.subr.bf16.mxu1 %v9926_v3  ;;  %6948 = vmatprep.subr.bf16.mxu0 %v9929_v51  ;;  %v9990_v3 = vld [vmem:[#allocation20 + $0x2b0] ss:$48 sps:$4 sm:$0xff]   ;;  %v9993_v51 = vld [vmem:[#allocation20 + $0x2b8] ss:$48 sps:$4 sm:$0xff]  }
 0x816   :  { %6867 = vmatpush1.bf16.msra.mxu1 %v9924_v43  ;;  %6949 = vmatpush1.bf16.msra.mxu0 %v9927_v30  ;;  %v9998_v43 = vld [vmem:[#allocation20 + $0x314] ss:$48 sps:$4 sm:$0xff]   ;;  %v10001_v30 = vld [vmem:[#allocation20 + $0x31c] ss:$48 sps:$4 sm:$0xff]  }
 0x817   :  { %6868 = vmatprep.subr.bf16.mxu1 %v9932_v44  ;;  %6950 = vmatprep.subr.bf16.mxu0 %v9935_v52  ;;  %v9996_v44 = vld [vmem:[#allocation20 + $0x310] ss:$48 sps:$4 sm:$0xff]   ;;  %v9999_v52 = vld [vmem:[#allocation20 + $0x318] ss:$48 sps:$4 sm:$0xff]  }
 0x81a   :  { %6869 = vmatpush1.bf16.msra.mxu1 %v9930_v54  ;;  %6951 = vmatpush1.bf16.msra.mxu0 %v9933_v9  ;;  %v10004_v54 = vld [vmem:[#allocation20 + $0x374] ss:$48 sps:$4 sm:$0xff]   ;;  %v10007_v9 = vld [vmem:[#allocation20 + $0x37c] ss:$48 sps:$4 sm:$0xff]  }
 0x81b   :  { %6870 = vmatprep.subr.bf16.mxu1 %v9938_v41  ;;  %6952 = vmatprep.subr.bf16.mxu0 %v9941_v42  ;;  %v10002_v41 = vld [vmem:[#allocation20 + $0x370] ss:$48 sps:$4 sm:$0xff]   ;;  %v10005_v42 = vld [vmem:[#allocation20 + $0x378] ss:$48 sps:$4 sm:$0xff]  }
 0x81e   :  { %6871 = vmatpush1.bf16.msra.mxu1 %v9936_v56  ;;  %6953 = vmatpush1.bf16.msra.mxu0 %v9939_v57  ;;  %v10010_v56 = vld [vmem:[#allocation20 + $0x3d4] ss:$48 sps:$4 sm:$0xff]   ;;  %v10013_v57 = vld [vmem:[#allocation20 + $0x3dc] ss:$48 sps:$4 sm:$0xff]  }
 0x81f   :  { %6872 = vmatprep.subr.bf16.mxu1 %v9944_v11  ;;  %6954 = vmatprep.subr.bf16.mxu0 %v9947_v58  ;;  %v10008_v11 = vld [vmem:[#allocation20 + $0x3d0] ss:$48 sps:$4 sm:$0xff]   ;;  %v10011_v58 = vld [vmem:[#allocation20 + $0x3d8] ss:$48 sps:$4 sm:$0xff]  }
 0x822   :  { %6873 = vmatpush1.bf16.msra.mxu1 %v9942_v59  ;;  %6955 = vmatpush1.bf16.msra.mxu0 %v9945_v60  ;;  %v10016_v59 = vld [vmem:[#allocation20 + $0x434] ss:$48 sps:$4 sm:$0xff]   ;;  %v10019_v60 = vld [vmem:[#allocation20 + $0x43c] ss:$48 sps:$4 sm:$0xff]  }
 0x823   :  { %6965 = vmatprep.subr.bf16.mxu1 %v9950_v61  ;;  %7047 = vmatprep.subr.bf16.mxu0 %v9953_v62  ;;  %v10017_v61 = vld [vmem:[#allocation20 + $0x438] ss:$48 sps:$4 sm:$0xff]   ;;  %v10022_v62 = vld [vmem:[#allocation20 + $0x494] ss:$48 sps:$4 sm:$0xff]  }
 0x825   :  { %6875 = vmatmul.mubr.bf16.vlgmr.msra.gmra.mrb[28].mxu1 %v11388_v5  ;;  %6957 = vmatmul.mubr.bf16.vlgmr.msra.gmra.mrb[32].mxu0 %v11388_v5 }
 0x826   :  { %6966 = vmatpush1.bf16.msra.mxu1 %v9948_v2  ;;  %6997 = vmatprep.mubr.bf16.mxu1 %v11375_v50  ;;  %v10025_v2 = vld [vmem:[#allocation20 + $0x49c] ss:$48 sps:$4 sm:$0xff]  }
 0x827   :  { %7048 = vmatpush1.bf16.msra.mxu0 %v9951_v34  ;;  %7079 = vmatprep.mubr.bf16.mxu0 %v11375_v50  ;;  %v10020_v34 = vld [vmem:[#allocation20 + $0x490] ss:$48 sps:$4 sm:$0xff]  }
 0x828   :  { %6967 = vmatprep.subr.bf16.mxu1 %v9956_v8  ;;  %7049 = vmatprep.subr.bf16.mxu0 %v9959_v55  ;;  %v10023_v8 = vld [vmem:[#allocation20 + $0x498] ss:$48 sps:$4 sm:$0xff]   ;;  %v10028_v55 = vld [vmem:[#allocation20 + $0x4f4] ss:$48 sps:$4 sm:$0xff]  }
 0x82a   :  { %6968 = vmatpush1.bf16.msra.mxu1 %v9954_v7  ;;  %v10031_v7 = vld [vmem:[#allocation20 + $0x4fc] ss:$48 sps:$4 sm:$0xff]  }
 0x82b   :  { %7050 = vmatpush1.bf16.msra.mxu0 %v9957_v10  ;;  %6969 = vmatprep.subr.bf16.mxu1 %v9962_v13  ;;  %v10026_v10 = vld [vmem:[#allocation20 + $0x4f0] ss:$48 sps:$4 sm:$0xff]   ;;  %v10029_v13 = vld [vmem:[#allocation20 + $0x4f8] ss:$48 sps:$4 sm:$0xff]  }
 0x82c   :  { %7051 = vmatprep.subr.bf16.mxu0 %v9965_v14  ;;  %v10034_v14 = vld [vmem:[#allocation20 + $0x554] ss:$48 sps:$4 sm:$0xff]  }
 0x82e   :  { %6970 = vmatpush1.bf16.msra.mxu1 %v9960_v15  ;;  %v10037_v15 = vld [vmem:[#allocation20 + $0x55c] ss:$48 sps:$4 sm:$0xff]  }
 0x82f   :  { %7052 = vmatpush1.bf16.msra.mxu0 %v9963_v23  ;;  %6971 = vmatprep.subr.bf16.mxu1 %v9968_v25  ;;  %v10032_v23 = vld [vmem:[#allocation20 + $0x550] ss:$48 sps:$4 sm:$0xff]   ;;  %v10035_v25 = vld [vmem:[#allocation20 + $0x558] ss:$48 sps:$4 sm:$0xff]  }
 0x830   :  { %7053 = vmatprep.subr.bf16.mxu0 %v9971_v27  ;;  %v10040_v27 = vld [vmem:[#allocation20 + $0x5b4] ss:$48 sps:$4 sm:$0xff]  }
 0x832   :  { %6972 = vmatpush1.bf16.msra.mxu1 %v9966_v46  ;;  %v10043_v46 = vld [vmem:[#allocation20 + $0x5bc] ss:$48 sps:$4 sm:$0xff]  }
 0x833   :  { %7054 = vmatpush1.bf16.msra.mxu0 %v9969_v29  ;;  %6973 = vmatprep.subr.bf16.mxu1 %v9974_v31  ;;  %v10038_v29 = vld [vmem:[#allocation20 + $0x5b0] ss:$48 sps:$4 sm:$0xff]   ;;  %v10041_v31 = vld [vmem:[#allocation20 + $0x5b8] ss:$48 sps:$4 sm:$0xff]  }
 0x834   :  { %7055 = vmatprep.subr.bf16.mxu0 %v9977_v36  ;;  %v10046_v36 = vld [vmem:[#allocation20 + $0x614] ss:$48 sps:$4 sm:$0xff]  }
 0x836   :  { %6974 = vmatpush1.bf16.msra.mxu1 %v9972_v24  ;;  %v10049_v24 = vld [vmem:[#allocation20 + $0x61c] ss:$48 sps:$4 sm:$0xff]  }
 0x837   :  { %7056 = vmatpush1.bf16.msra.mxu0 %v9975_v37  ;;  %6975 = vmatprep.subr.bf16.mxu1 %v9980_v38  ;;  %v10044_v37 = vld [vmem:[#allocation20 + $0x610] ss:$48 sps:$4 sm:$0xff]   ;;  %v10047_v38 = vld [vmem:[#allocation20 + $0x618] ss:$48 sps:$4 sm:$0xff]  }
 0x838   :  { %7057 = vmatprep.subr.bf16.mxu0 %v9983_v12  ;;  %v10052_v12 = vld [vmem:[#allocation20 + $0x674] ss:$48 sps:$4 sm:$0xff]  }
 0x83a   :  { %6976 = vmatpush1.bf16.msra.mxu1 %v9978_v6  ;;  %v10055_v6 = vld [vmem:[#allocation20 + $0x67c] ss:$48 sps:$4 sm:$0xff]  }
 0x83b   :  { %7058 = vmatpush1.bf16.msra.mxu0 %v9981_v45  ;;  %6977 = vmatprep.subr.bf16.mxu1 %v9986_v47  ;;  %v10050_v45 = vld [vmem:[#allocation20 + $0x670] ss:$48 sps:$4 sm:$0xff]   ;;  %v10053_v47 = vld [vmem:[#allocation20 + $0x678] ss:$48 sps:$4 sm:$0xff]  }
 0x83c   :  { %7059 = vmatprep.subr.bf16.mxu0 %v9989_v48  ;;  %v10058_v48 = vld [vmem:[#allocation20 + $0x6d4] ss:$48 sps:$4 sm:$0xff]  }
 0x83e   :  { %6978 = vmatpush1.bf16.msra.mxu1 %v9984_v49  ;;  %v10061_v49 = vld [vmem:[#allocation20 + $0x6dc] ss:$48 sps:$4 sm:$0xff]  }
 0x83f   :  { %7060 = vmatpush1.bf16.msra.mxu0 %v9987_v63  ;;  %6979 = vmatprep.subr.bf16.mxu1 %v9992_v1  ;;  %v10056_v63 = vld [vmem:[#allocation20 + $0x6d0] ss:$48 sps:$4 sm:$0xff]   ;;  %v10059_v1 = vld [vmem:[#allocation20 + $0x6d8] ss:$48 sps:$4 sm:$0xff]  }
 0x840   :  { %7061 = vmatprep.subr.bf16.mxu0 %v9995_v4  ;;  %v10064_v4 = vld [vmem:[#allocation20 + $0x734] ss:$48 sps:$4 sm:$0xff]  }
 0x842   :  { %6980 = vmatpush1.bf16.msra.mxu1 %v9990_v3  ;;  %v10067_v3 = vld [vmem:[#allocation20 + $0x73c] ss:$48 sps:$4 sm:$0xff]  }
 0x843   :  { %7062 = vmatpush1.bf16.msra.mxu0 %v9993_v51  ;;  %6981 = vmatprep.subr.bf16.mxu1 %v9998_v43  ;;  %v10062_v51 = vld [vmem:[#allocation20 + $0x730] ss:$48 sps:$4 sm:$0xff]   ;;  %v10065_v43 = vld [vmem:[#allocation20 + $0x738] ss:$48 sps:$4 sm:$0xff]  }
 0x844   :  { %7063 = vmatprep.subr.bf16.mxu0 %v10001_v30  ;;  %v10070_v30 = vld [vmem:[#allocation20 + $0x794] ss:$48 sps:$4 sm:$0xff]  }
 0x846   :  { %6982 = vmatpush1.bf16.msra.mxu1 %v9996_v44  ;;  %v10073_v44 = vld [vmem:[#allocation20 + $0x79c] ss:$48 sps:$4 sm:$0xff]  }
 0x847   :  { %7064 = vmatpush1.bf16.msra.mxu0 %v9999_v52  ;;  %6983 = vmatprep.subr.bf16.mxu1 %v10004_v54  ;;  %v10068_v52 = vld [vmem:[#allocation20 + $0x790] ss:$48 sps:$4 sm:$0xff]   ;;  %v10071_v54 = vld [vmem:[#allocation20 + $0x798] ss:$48 sps:$4 sm:$0xff]  }
 0x848   :  { %7065 = vmatprep.subr.bf16.mxu0 %v10007_v9  ;;  %v10076_v9 = vld [vmem:[#allocation20 + $0x7f4] ss:$48 sps:$4 sm:$0xff]  }
 0x84a   :  { %6984 = vmatpush1.bf16.msra.mxu1 %v10002_v41  ;;  %v10079_v41 = vld [vmem:[#allocation20 + $0x7fc] ss:$48 sps:$4 sm:$0xff]  }
 0x84b   :  { %7066 = vmatpush1.bf16.msra.mxu0 %v10005_v42  ;;  %6985 = vmatprep.subr.bf16.mxu1 %v10010_v56  ;;  %v10074_v42 = vld [vmem:[#allocation20 + $0x7f0] ss:$48 sps:$4 sm:$0xff]   ;;  %v10077_v56 = vld [vmem:[#allocation20 + $0x7f8] ss:$48 sps:$4 sm:$0xff]  }
 0x84c   :  { %7067 = vmatprep.subr.bf16.mxu0 %v10013_v57  ;;  %v10082_v57 = vld [vmem:[#allocation20 + $0x854] ss:$48 sps:$4 sm:$0xff]  }
 0x84e   :  { %6986 = vmatpush1.bf16.msra.mxu1 %v10008_v11  ;;  %v10085_v11 = vld [vmem:[#allocation20 + $0x85c] ss:$48 sps:$4 sm:$0xff]  }
 0x84f   :  { %7068 = vmatpush1.bf16.msra.mxu0 %v10011_v58  ;;  %6987 = vmatprep.subr.bf16.mxu1 %v10016_v59  ;;  %v10080_v58 = vld [vmem:[#allocation20 + $0x850] ss:$48 sps:$4 sm:$0xff]   ;;  %v10083_v59 = vld [vmem:[#allocation20 + $0x858] ss:$48 sps:$4 sm:$0xff]  }
 0x850   :  { %7069 = vmatprep.subr.bf16.mxu0 %v10019_v60  ;;  %v10088_v60 = vld [vmem:[#allocation20 + $0x8b4] ss:$48 sps:$4 sm:$0xff]  }
 0x852   :  { %6988 = vmatpush1.bf16.msra.mxu1 %v10014_v33  ;;  %v10091_v33 = vld [vmem:[#allocation20 + $0x8bc] ss:$48 sps:$4 sm:$0xff]  }
 0x853   :  { %7070 = vmatpush1.bf16.msra.mxu0 %v10017_v61  ;;  %6989 = vmatprep.subr.bf16.mxu1 %v10022_v62  ;;  %v10086_v61 = vld [vmem:[#allocation20 + $0x8b0] ss:$48 sps:$4 sm:$0xff]   ;;  %v10089_v62 = vld [vmem:[#allocation20 + $0x8b8] ss:$48 sps:$4 sm:$0xff]  }
 0x854   :  { %7071 = vmatprep.subr.bf16.mxu0 %v10025_v2  ;;  %v10094_v2 = vld [vmem:[#allocation20 + $0x914] ss:$48 sps:$4 sm:$0xff]  }
 0x856   :  { %6990 = vmatpush1.bf16.msra.mxu1 %v10020_v34  ;;  %v10097_v34 = vld [vmem:[#allocation20 + $0x91c] ss:$48 sps:$4 sm:$0xff]  }
 0x857   :  { %7072 = vmatpush1.bf16.msra.mxu0 %v10023_v8  ;;  %6991 = vmatprep.subr.bf16.mxu1 %v10028_v55  ;;  %v10092_v8 = vld [vmem:[#allocation20 + $0x910] ss:$48 sps:$4 sm:$0xff]   ;;  %v10095_v55 = vld [vmem:[#allocation20 + $0x918] ss:$48 sps:$4 sm:$0xff]  }
 0x858   :  { %7073 = vmatprep.subr.bf16.mxu0 %v10031_v7  ;;  %v10100_v7 = vld [vmem:[#allocation20 + $0x974] ss:$48 sps:$4 sm:$0xff]  }
 0x85a   :  { %6992 = vmatpush1.bf16.msra.mxu1 %v10026_v10  ;;  %v10103_v10 = vld [vmem:[#allocation20 + $0x97c] ss:$48 sps:$4 sm:$0xff]  }
 0x85b   :  { %7074 = vmatpush1.bf16.msra.mxu0 %v10029_v13  ;;  %6993 = vmatprep.subr.bf16.mxu1 %v10034_v14  ;;  %v10098_v13 = vld [vmem:[#allocation20 + $0x970] ss:$48 sps:$4 sm:$0xff]   ;;  %v10101_v14 = vld [vmem:[#allocation20 + $0x978] ss:$48 sps:$4 sm:$0xff]  }
 0x85c   :  { %7075 = vmatprep.subr.bf16.mxu0 %v10037_v15  ;;  %v10106_v15 = vld [vmem:[#allocation20 + $0x9d4] ss:$48 sps:$4 sm:$0xff]  }
 0x85e   :  { %6994 = vmatpush1.bf16.msra.mxu1 %v10032_v23  ;;  %v10109_v23 = vld [vmem:[#allocation20 + $0x9dc] ss:$48 sps:$4 sm:$0xff]  }
 0x85f   :  { %7076 = vmatpush1.bf16.msra.mxu0 %v10035_v25  ;;  %6995 = vmatprep.subr.bf16.mxu1 %v10040_v27  ;;  %v10104_v25 = vld [vmem:[#allocation20 + $0x9d0] ss:$48 sps:$4 sm:$0xff]   ;;  %v10107_v27 = vld [vmem:[#allocation20 + $0x9d8] ss:$48 sps:$4 sm:$0xff]  }
 0x860   :  { %7077 = vmatprep.subr.bf16.mxu0 %v10043_v46  ;;  %v10112_v46 = vld [vmem:[#allocation20 + $0xa34] ss:$48 sps:$4 sm:$0xff]  }
 0x862   :  { %6996 = vmatpush1.bf16.msra.mxu1 %v10038_v29  ;;  %v10115_v29 = vld [vmem:[#allocation20 + $0xa3c] ss:$48 sps:$4 sm:$0xff]  }
 0x863   :  { %7078 = vmatpush1.bf16.msra.mxu0 %v10041_v31  ;;  %7006 = vmatprep.subr.bf16.mxu1 %v10046_v36  ;;  %v10110_v31 = vld [vmem:[#allocation20 + $0xa30] ss:$48 sps:$4 sm:$0xff]   ;;  %v10113_v36 = vld [vmem:[#allocation20 + $0xa38] ss:$48 sps:$4 sm:$0xff]  }
 0x864   :  { %7088 = vmatprep.subr.bf16.mxu0 %v10049_v24  ;;  %v10118_v24 = vld [vmem:[#allocation20 + $0xa94] ss:$48 sps:$4 sm:$0xff]  }
 0x865   :  { %6998 = vmatmul.mubr.bf16.vlgmr.msra.gmra.mrb[32].mxu1 %v11377_v35 }
 0x866   :  { %7080 = vmatmul.mubr.bf16.vlgmr.msra.gmra.mrb[36].mxu0 %v11377_v35  ;;  %7007 = vmatpush1.bf16.msra.mxu1 %v10044_v37  ;;  %v10121_v37 = vld [vmem:[#allocation20 + $0xa9c] ss:$48 sps:$4 sm:$0xff]  }
 0x867   :  { %7038 = vmatprep.mubr.bf16.mxu1 %v11381_v32  ;;  %7089 = vmatpush1.bf16.msra.mxu0 %v10047_v38  ;;  %v10116_v38 = vld [vmem:[#allocation20 + $0xa90] ss:$48 sps:$4 sm:$0xff]  }
 0x868   :  { %7120 = vmatprep.mubr.bf16.mxu0 %v11381_v32  ;;  %7008 = vmatprep.subr.bf16.mxu1 %v10052_v12  ;;  %v10119_v12 = vld [vmem:[#allocation20 + $0xa98] ss:$48 sps:$4 sm:$0xff]  }
 0x869   :  { %7090 = vmatprep.subr.bf16.mxu0 %v10055_v6  ;;  %v10124_v6 = vld [vmem:[#allocation20 + $0xaf4] ss:$48 sps:$4 sm:$0xff]  }
 0x86a   :  { %7009 = vmatpush1.bf16.msra.mxu1 %v10050_v45  ;;  %v10127_v45 = vld [vmem:[#allocation20 + $0xafc] ss:$48 sps:$4 sm:$0xff]  }
 0x86b   :  { %7091 = vmatpush1.bf16.msra.mxu0 %v10053_v47  ;;  %7010 = vmatprep.subr.bf16.mxu1 %v10058_v48  ;;  %v10122_v47 = vld [vmem:[#allocation20 + $0xaf0] ss:$48 sps:$4 sm:$0xff]   ;;  %v10125_v48 = vld [vmem:[#allocation20 + $0xaf8] ss:$48 sps:$4 sm:$0xff]  }
 0x86c   :  { %7092 = vmatprep.subr.bf16.mxu0 %v10061_v49  ;;  %v10130_v49 = vld [vmem:[#allocation20 + $0xb54] ss:$48 sps:$4 sm:$0xff]  }
 0x86e   :  { %7011 = vmatpush1.bf16.msra.mxu1 %v10056_v63  ;;  %v10133_v63 = vld [vmem:[#allocation20 + $0xb5c] ss:$48 sps:$4 sm:$0xff]  }
 0x86f   :  { %7093 = vmatpush1.bf16.msra.mxu0 %v10059_v1  ;;  %7012 = vmatprep.subr.bf16.mxu1 %v10064_v4  ;;  %v10128_v1 = vld [vmem:[#allocation20 + $0xb50] ss:$48 sps:$4 sm:$0xff]   ;;  %v10131_v4 = vld [vmem:[#allocation20 + $0xb58] ss:$48 sps:$4 sm:$0xff]  }
 0x870   :  { %7094 = vmatprep.subr.bf16.mxu0 %v10067_v3  ;;  %v10136_v3 = vld [vmem:[#allocation20 + $0xbb4] ss:$48 sps:$4 sm:$0xff]  }
 0x872   :  { %7013 = vmatpush1.bf16.msra.mxu1 %v10062_v51  ;;  %v10139_v51 = vld [vmem:[#allocation20 + $0xbbc] ss:$48 sps:$4 sm:$0xff]  }
 0x873   :  { %7095 = vmatpush1.bf16.msra.mxu0 %v10065_v43  ;;  %7014 = vmatprep.subr.bf16.mxu1 %v10070_v30  ;;  %v10134_v43 = vld [vmem:[#allocation20 + $0xbb0] ss:$48 sps:$4 sm:$0xff]   ;;  %v10137_v30 = vld [vmem:[#allocation20 + $0xbb8] ss:$48 sps:$4 sm:$0xff]  }
 0x874   :  { %7096 = vmatprep.subr.bf16.mxu0 %v10073_v44  ;;  %v10142_v44 = vld [vmem:[#allocation20 + $0x24] ss:$48 sps:$4 sm:$0xff]  }
 0x876   :  { %7015 = vmatpush1.bf16.msra.mxu1 %v10068_v52  ;;  %v10145_v52 = vld [vmem:[#allocation20 + $0x2c] ss:$48 sps:$4 sm:$0xff]  }
 0x877   :  { %7097 = vmatpush1.bf16.msra.mxu0 %v10071_v54  ;;  %7016 = vmatprep.subr.bf16.mxu1 %v10076_v9  ;;  %v10140_v54 = vld [vmem:[#allocation20 + $0x20] ss:$48 sps:$4 sm:$0xff]   ;;  %v10143_v9 = vld [vmem:[#allocation20 + $0x28] ss:$48 sps:$4 sm:$0xff]  }
 0x878   :  { %7098 = vmatprep.subr.bf16.mxu0 %v10079_v41  ;;  %v10148_v41 = vld [vmem:[#allocation20 + $0x84] ss:$48 sps:$4 sm:$0xff]  }
 0x87a   :  { %7017 = vmatpush1.bf16.msra.mxu1 %v10074_v42  ;;  %v10151_v42 = vld [vmem:[#allocation20 + $0x8c] ss:$48 sps:$4 sm:$0xff]  }
 0x87b   :  { %7099 = vmatpush1.bf16.msra.mxu0 %v10077_v56  ;;  %7018 = vmatprep.subr.bf16.mxu1 %v10082_v57  ;;  %v10146_v56 = vld [vmem:[#allocation20 + $0x80] ss:$48 sps:$4 sm:$0xff]   ;;  %v10149_v57 = vld [vmem:[#allocation20 + $0x88] ss:$48 sps:$4 sm:$0xff]  }
 0x87c   :  { %7100 = vmatprep.subr.bf16.mxu0 %v10085_v11  ;;  %v10154_v11 = vld [vmem:[#allocation20 + $0xe4] ss:$48 sps:$4 sm:$0xff]  }
 0x87e   :  { %7019 = vmatpush1.bf16.msra.mxu1 %v10080_v58  ;;  %v10157_v58 = vld [vmem:[#allocation20 + $0xec] ss:$48 sps:$4 sm:$0xff]  }
 0x87f   :  { %7101 = vmatpush1.bf16.msra.mxu0 %v10083_v59  ;;  %7020 = vmatprep.subr.bf16.mxu1 %v10088_v60  ;;  %v10152_v59 = vld [vmem:[#allocation20 + $0xe0] ss:$48 sps:$4 sm:$0xff]   ;;  %v10155_v60 = vld [vmem:[#allocation20 + $0xe8] ss:$48 sps:$4 sm:$0xff]  }
 0x880   :  { %7102 = vmatprep.subr.bf16.mxu0 %v10091_v33  ;;  %v10160_v33 = vld [vmem:[#allocation20 + $0x144] ss:$48 sps:$4 sm:$0xff]  }
 0x882   :  { %7021 = vmatpush1.bf16.msra.mxu1 %v10086_v61  ;;  %v10163_v61 = vld [vmem:[#allocation20 + $0x14c] ss:$48 sps:$4 sm:$0xff]  }
 0x883   :  { %7103 = vmatpush1.bf16.msra.mxu0 %v10089_v62  ;;  %7022 = vmatprep.subr.bf16.mxu1 %v10094_v2  ;;  %v10158_v62 = vld [vmem:[#allocation20 + $0x140] ss:$48 sps:$4 sm:$0xff]   ;;  %v10161_v2 = vld [vmem:[#allocation20 + $0x148] ss:$48 sps:$4 sm:$0xff]  }
 0x884   :  { %7104 = vmatprep.subr.bf16.mxu0 %v10097_v34  ;;  %v10166_v34 = vld [vmem:[#allocation20 + $0x1a4] ss:$48 sps:$4 sm:$0xff]  }
 0x886   :  { %7023 = vmatpush1.bf16.msra.mxu1 %v10092_v8  ;;  %v10169_v8 = vld [vmem:[#allocation20 + $0x1ac] ss:$48 sps:$4 sm:$0xff]  }
 0x887   :  { %7105 = vmatpush1.bf16.msra.mxu0 %v10095_v55  ;;  %7024 = vmatprep.subr.bf16.mxu1 %v10100_v7  ;;  %v10167_v55 = vld [vmem:[#allocation20 + $0x1a8] ss:$48 sps:$4 sm:$0xff]   ;;  %v10172_v7 = vld [vmem:[#allocation20 + $0x204] ss:$48 sps:$4 sm:$0xff]  }
 0x888   :  { %7106 = vmatprep.subr.bf16.mxu0 %v10103_v10  ;;  %v10175_v10 = vld [vmem:[#allocation20 + $0x20c] ss:$48 sps:$4 sm:$0xff]  }
 0x88a   :  { %7025 = vmatpush1.bf16.msra.mxu1 %v10098_v13  ;;  %v10170_v13 = vld [vmem:[#allocation20 + $0x200] ss:$48 sps:$4 sm:$0xff]  }
 0x88b   :  { %7107 = vmatpush1.bf16.msra.mxu0 %v10101_v14  ;;  %7026 = vmatprep.subr.bf16.mxu1 %v10106_v15  ;;  %v10173_v14 = vld [vmem:[#allocation20 + $0x208] ss:$48 sps:$4 sm:$0xff]   ;;  %v10178_v15 = vld [vmem:[#allocation20 + $0x264] ss:$48 sps:$4 sm:$0xff]  }
 0x88c   :  { %7108 = vmatprep.subr.bf16.mxu0 %v10109_v23  ;;  %v10181_v23 = vld [vmem:[#allocation20 + $0x26c] ss:$48 sps:$4 sm:$0xff]  }
 0x88e   :  { %7027 = vmatpush1.bf16.msra.mxu1 %v10104_v25  ;;  %v10176_v25 = vld [vmem:[#allocation20 + $0x260] ss:$48 sps:$4 sm:$0xff]  }
 0x88f   :  { %7109 = vmatpush1.bf16.msra.mxu0 %v10107_v27  ;;  %7028 = vmatprep.subr.bf16.mxu1 %v10112_v46  ;;  %v10179_v27 = vld [vmem:[#allocation20 + $0x268] ss:$48 sps:$4 sm:$0xff]   ;;  %v10184_v46 = vld [vmem:[#allocation20 + $0x2c4] ss:$48 sps:$4 sm:$0xff]  }
 0x890   :  { %7110 = vmatprep.subr.bf16.mxu0 %v10115_v29  ;;  %v10187_v29 = vld [vmem:[#allocation20 + $0x2cc] ss:$48 sps:$4 sm:$0xff]  }
 0x892   :  { %7029 = vmatpush1.bf16.msra.mxu1 %v10110_v31  ;;  %v10182_v31 = vld [vmem:[#allocation20 + $0x2c0] ss:$48 sps:$4 sm:$0xff]  }
 0x893   :  { %7111 = vmatpush1.bf16.msra.mxu0 %v10113_v36  ;;  %7030 = vmatprep.subr.bf16.mxu1 %v10118_v24  ;;  %v10185_v36 = vld [vmem:[#allocation20 + $0x2c8] ss:$48 sps:$4 sm:$0xff]   ;;  %v10190_v24 = vld [vmem:[#allocation20 + $0x324] ss:$48 sps:$4 sm:$0xff]  }
 0x894   :  { %7112 = vmatprep.subr.bf16.mxu0 %v10121_v37  ;;  %v10193_v37 = vld [vmem:[#allocation20 + $0x32c] ss:$48 sps:$4 sm:$0xff]  }
 0x896   :  { %7031 = vmatpush1.bf16.msra.mxu1 %v10116_v38  ;;  %v10188_v38 = vld [vmem:[#allocation20 + $0x320] ss:$48 sps:$4 sm:$0xff]  }
 0x897   :  { %7113 = vmatpush1.bf16.msra.mxu0 %v10119_v12  ;;  %7032 = vmatprep.subr.bf16.mxu1 %v10124_v6  ;;  %v10191_v12 = vld [vmem:[#allocation20 + $0x328] ss:$48 sps:$4 sm:$0xff]   ;;  %v10196_v6 = vld [vmem:[#allocation20 + $0x384] ss:$48 sps:$4 sm:$0xff]  }
 0x898   :  { %7114 = vmatprep.subr.bf16.mxu0 %v10127_v45  ;;  %v10199_v45 = vld [vmem:[#allocation20 + $0x38c] ss:$48 sps:$4 sm:$0xff]  }
 0x89a   :  { %7033 = vmatpush1.bf16.msra.mxu1 %v10122_v47  ;;  %v10194_v47 = vld [vmem:[#allocation20 + $0x380] ss:$48 sps:$4 sm:$0xff]  }
 0x89b   :  { %7115 = vmatpush1.bf16.msra.mxu0 %v10125_v48  ;;  %7034 = vmatprep.subr.bf16.mxu1 %v10130_v49  ;;  %v10197_v48 = vld [vmem:[#allocation20 + $0x388] ss:$48 sps:$4 sm:$0xff]   ;;  %v10202_v49 = vld [vmem:[#allocation20 + $0x3e4] ss:$48 sps:$4 sm:$0xff]  }
 0x89c   :  { %7116 = vmatprep.subr.bf16.mxu0 %v10133_v63  ;;  %v10205_v63 = vld [vmem:[#allocation20 + $0x3ec] ss:$48 sps:$4 sm:$0xff]  }
 0x89e   :  { %7035 = vmatpush1.bf16.msra.mxu1 %v10128_v1  ;;  %v10200_v1 = vld [vmem:[#allocation20 + $0x3e0] ss:$48 sps:$4 sm:$0xff]  }
 0x89f   :  { %7117 = vmatpush1.bf16.msra.mxu0 %v10131_v4  ;;  %7036 = vmatprep.subr.bf16.mxu1 %v10136_v3  ;;  %v10203_v4 = vld [vmem:[#allocation20 + $0x3e8] ss:$48 sps:$4 sm:$0xff]   ;;  %v10208_v3 = vld [vmem:[#allocation20 + $0x444] ss:$48 sps:$4 sm:$0xff]  }
 0x8a0   :  { %7118 = vmatprep.subr.bf16.mxu0 %v10139_v51  ;;  %v10211_v51 = vld [vmem:[#allocation20 + $0x44c] ss:$48 sps:$4 sm:$0xff]  }
 0x8a2   :  { %7037 = vmatpush1.bf16.msra.mxu1 %v10134_v43  ;;  %v10206_v43 = vld [vmem:[#allocation20 + $0x440] ss:$48 sps:$4 sm:$0xff]  }
 0x8a3   :  { %7119 = vmatpush1.bf16.msra.mxu0 %v10137_v30  ;;  %7129 = vmatprep.subr.bf16.mxu1 %v10142_v44  ;;  %v10209_v30 = vld [vmem:[#allocation20 + $0x448] ss:$48 sps:$4 sm:$0xff]   ;;  %v10214_v44 = vld [vmem:[#allocation20 + $0x4a4] ss:$48 sps:$4 sm:$0xff]  }
 0x8a4   :  { %7211 = vmatprep.subr.bf16.mxu0 %v10145_v52  ;;  %v10217_v52 = vld [vmem:[#allocation20 + $0x4ac] ss:$48 sps:$4 sm:$0xff]  }
 0x8a5   :  { %7039 = vmatmul.mubr.bf16.vlgmr.msra.gmra.mrb[32].mxu1 %v11388_v5 }
 0x8a6   :  { %7121 = vmatmul.mubr.bf16.vlgmr.msra.gmra.mrb[36].mxu0 %v11388_v5  ;;  %7130 = vmatpush1.bf16.msra.mxu1 %v10140_v54  ;;  %v10212_v54 = vld [vmem:[#allocation20 + $0x4a0] ss:$48 sps:$4 sm:$0xff]  }
 0x8a7   :  { %7161 = vmatprep.mubr.bf16.mxu1 %v11375_v50  ;;  %7212 = vmatpush1.bf16.msra.mxu0 %v10143_v9  ;;  %v10215_v9 = vld [vmem:[#allocation20 + $0x4a8] ss:$48 sps:$4 sm:$0xff]  }
 0x8a8   :  { %7243 = vmatprep.mubr.bf16.mxu0 %v11375_v50  ;;  %7131 = vmatprep.subr.bf16.mxu1 %v10148_v41  ;;  %v10164_v50 = vld [vmem:[#allocation20 + $0x1a0] ss:$48 sps:$4 sm:$0xff]   ;;  %v10220_v41 = vld [vmem:[#allocation20 + $0x504] ss:$48 sps:$4 sm:$0xff]  }
 0x8a9   :  { %7213 = vmatprep.subr.bf16.mxu0 %v10151_v42  ;;  %v10223_v42 = vld [vmem:[#allocation20 + $0x50c] ss:$48 sps:$4 sm:$0xff]  }
 0x8aa   :  { %7132 = vmatpush1.bf16.msra.mxu1 %v10146_v56  ;;  %v10218_v56 = vld [vmem:[#allocation20 + $0x500] ss:$48 sps:$4 sm:$0xff]  }
 0x8ab   :  { %7214 = vmatpush1.bf16.msra.mxu0 %v10149_v57  ;;  %7133 = vmatprep.subr.bf16.mxu1 %v10154_v11  ;;  %v10221_v57 = vld [vmem:[#allocation20 + $0x508] ss:$48 sps:$4 sm:$0xff]   ;;  %v10226_v11 = vld [vmem:[#allocation20 + $0x564] ss:$48 sps:$4 sm:$0xff]  }
 0x8ac   :  { %7215 = vmatprep.subr.bf16.mxu0 %v10157_v58  ;;  %v10229_v58 = vld [vmem:[#allocation20 + $0x56c] ss:$48 sps:$4 sm:$0xff]  }
 0x8ae   :  { %7134 = vmatpush1.bf16.msra.mxu1 %v10152_v59  ;;  %v10224_v59 = vld [vmem:[#allocation20 + $0x560] ss:$48 sps:$4 sm:$0xff]  }
 0x8af   :  { %7216 = vmatpush1.bf16.msra.mxu0 %v10155_v60  ;;  %7135 = vmatprep.subr.bf16.mxu1 %v10160_v33  ;;  %v10227_v60 = vld [vmem:[#allocation20 + $0x568] ss:$48 sps:$4 sm:$0xff]   ;;  %v10232_v33 = vld [vmem:[#allocation20 + $0x5c4] ss:$48 sps:$4 sm:$0xff]  }
 0x8b0   :  { %7217 = vmatprep.subr.bf16.mxu0 %v10163_v61  ;;  %v10235_v61 = vld [vmem:[#allocation20 + $0x5cc] ss:$48 sps:$4 sm:$0xff]  }
 0x8b2   :  { %7136 = vmatpush1.bf16.msra.mxu1 %v10158_v62  ;;  %v10230_v62 = vld [vmem:[#allocation20 + $0x5c0] ss:$48 sps:$4 sm:$0xff]  }
 0x8b3   :  { %7218 = vmatpush1.bf16.msra.mxu0 %v10161_v2  ;;  %7137 = vmatprep.subr.bf16.mxu1 %v10166_v34  ;;  %v10233_v2 = vld [vmem:[#allocation20 + $0x5c8] ss:$48 sps:$4 sm:$0xff]   ;;  %v10238_v34 = vld [vmem:[#allocation20 + $0x624] ss:$48 sps:$4 sm:$0xff]  }
 0x8b4   :  { %7219 = vmatprep.subr.bf16.mxu0 %v10169_v8  ;;  %v10241_v8 = vld [vmem:[#allocation20 + $0x62c] ss:$48 sps:$4 sm:$0xff]  }
 0x8b6   :  { %7138 = vmatpush1.bf16.msra.mxu1 %v10164_v50  ;;  %v10236_v50 = vld [vmem:[#allocation20 + $0x620] ss:$48 sps:$4 sm:$0xff]  }
 0x8b7   :  { %7220 = vmatpush1.bf16.msra.mxu0 %v10167_v55  ;;  %7139 = vmatprep.subr.bf16.mxu1 %v10172_v7  ;;  %v10239_v55 = vld [vmem:[#allocation20 + $0x628] ss:$48 sps:$4 sm:$0xff]   ;;  %v10244_v7 = vld [vmem:[#allocation20 + $0x684] ss:$48 sps:$4 sm:$0xff]  }
 0x8b8   :  { %7221 = vmatprep.subr.bf16.mxu0 %v10175_v10  ;;  %v10247_v10 = vld [vmem:[#allocation20 + $0x68c] ss:$48 sps:$4 sm:$0xff]  }
 0x8ba   :  { %7140 = vmatpush1.bf16.msra.mxu1 %v10170_v13  ;;  %v10242_v13 = vld [vmem:[#allocation20 + $0x680] ss:$48 sps:$4 sm:$0xff]  }
 0x8bb   :  { %7222 = vmatpush1.bf16.msra.mxu0 %v10173_v14  ;;  %7141 = vmatprep.subr.bf16.mxu1 %v10178_v15  ;;  %v10245_v14 = vld [vmem:[#allocation20 + $0x688] ss:$48 sps:$4 sm:$0xff]   ;;  %v10250_v15 = vld [vmem:[#allocation20 + $0x6e4] ss:$48 sps:$4 sm:$0xff]  }
 0x8bc   :  { %7223 = vmatprep.subr.bf16.mxu0 %v10181_v23  ;;  %v10253_v23 = vld [vmem:[#allocation20 + $0x6ec] ss:$48 sps:$4 sm:$0xff]  }
 0x8be   :  { %7142 = vmatpush1.bf16.msra.mxu1 %v10176_v25  ;;  %v10248_v25 = vld [vmem:[#allocation20 + $0x6e0] ss:$48 sps:$4 sm:$0xff]  }
 0x8bf   :  { %7224 = vmatpush1.bf16.msra.mxu0 %v10179_v27  ;;  %7143 = vmatprep.subr.bf16.mxu1 %v10184_v46  ;;  %v10251_v27 = vld [vmem:[#allocation20 + $0x6e8] ss:$48 sps:$4 sm:$0xff]   ;;  %v10256_v46 = vld [vmem:[#allocation20 + $0x744] ss:$48 sps:$4 sm:$0xff]  }
 0x8c0   :  { %7225 = vmatprep.subr.bf16.mxu0 %v10187_v29  ;;  %v10254_v29 = vld [vmem:[#allocation20 + $0x740] ss:$48 sps:$4 sm:$0xff]  }
 0x8c2   :  { %7144 = vmatpush1.bf16.msra.mxu1 %v10182_v31  ;;  %v10257_v31 = vld [vmem:[#allocation20 + $0x748] ss:$48 sps:$4 sm:$0xff]  }
 0x8c3   :  { %7226 = vmatpush1.bf16.msra.mxu0 %v10185_v36  ;;  %7145 = vmatprep.subr.bf16.mxu1 %v10190_v24  ;;  %v10262_v36 = vld [vmem:[#allocation20 + $0x7a4] ss:$48 sps:$4 sm:$0xff]   ;;  %v10265_v24 = vld [vmem:[#allocation20 + $0x7ac] ss:$48 sps:$4 sm:$0xff]  }
 0x8c4   :  { %7227 = vmatprep.subr.bf16.mxu0 %v10193_v37  ;;  %v10263_v37 = vld [vmem:[#allocation20 + $0x7a8] ss:$48 sps:$4 sm:$0xff]  }
 0x8c6   :  { %7146 = vmatpush1.bf16.msra.mxu1 %v10188_v38  ;;  %v10268_v38 = vld [vmem:[#allocation20 + $0x804] ss:$48 sps:$4 sm:$0xff]  }
 0x8c7   :  { %7228 = vmatpush1.bf16.msra.mxu0 %v10191_v12  ;;  %7147 = vmatprep.subr.bf16.mxu1 %v10196_v6  ;;  %v10271_v12 = vld [vmem:[#allocation20 + $0x80c] ss:$48 sps:$4 sm:$0xff]   ;;  %v10266_v6 = vld [vmem:[#allocation20 + $0x800] ss:$48 sps:$4 sm:$0xff]  }
 0x8c8   :  { %7229 = vmatprep.subr.bf16.mxu0 %v10199_v45  ;;  %v10269_v45 = vld [vmem:[#allocation20 + $0x808] ss:$48 sps:$4 sm:$0xff]  }
 0x8ca   :  { %7148 = vmatpush1.bf16.msra.mxu1 %v10194_v47  ;;  %v10274_v47 = vld [vmem:[#allocation20 + $0x864] ss:$48 sps:$4 sm:$0xff]  }
 0x8cb   :  { %7230 = vmatpush1.bf16.msra.mxu0 %v10197_v48  ;;  %7149 = vmatprep.subr.bf16.mxu1 %v10202_v49 }
 0x8cc   :  { %7231 = vmatprep.subr.bf16.mxu0 %v10205_v63  ;;  %v10277_v63 = vld [vmem:[#allocation20 + $0x86c] ss:$48 sps:$4 sm:$0xff]  }
 0x8ce   :  { %7150 = vmatpush1.bf16.msra.mxu1 %v10200_v1 }
 0x8cf   :  { %7232 = vmatpush1.bf16.msra.mxu0 %v10203_v4  ;;  %7151 = vmatprep.subr.bf16.mxu1 %v10208_v3 }
 0x8d0   :  { %7233 = vmatprep.subr.bf16.mxu0 %v10211_v51 }
 0x8d2   :  { %7152 = vmatpush1.bf16.msra.mxu1 %v10206_v43  ;;  %v10272_v43 = vld [vmem:[#allocation20 + $0x860] ss:$48 sps:$4 sm:$0xff]  }
 0x8d3   :  { %7234 = vmatpush1.bf16.msra.mxu0 %v10209_v30  ;;  %7153 = vmatprep.subr.bf16.mxu1 %v10214_v44 }
 0x8d4   :  { %7235 = vmatprep.subr.bf16.mxu0 %v10217_v52  ;;  %v10275_v52 = vld [vmem:[#allocation20 + $0x868] ss:$48 sps:$4 sm:$0xff]  }
 0x8d6   :  { %7154 = vmatpush1.bf16.msra.mxu1 %v10212_v54  ;;  %v10280_v54 = vld [vmem:[#allocation20 + $0x8c4] ss:$48 sps:$4 sm:$0xff]  }
 0x8d7   :  { %7236 = vmatpush1.bf16.msra.mxu0 %v10215_v9  ;;  %7155 = vmatprep.subr.bf16.mxu1 %v10220_v41  ;;  %v10283_v9 = vld [vmem:[#allocation20 + $0x8cc] ss:$48 sps:$4 sm:$0xff]   ;;  %v10278_v41 = vld [vmem:[#allocation20 + $0x8c0] ss:$48 sps:$4 sm:$0xff]  }
 0x8d8   :  { %7237 = vmatprep.subr.bf16.mxu0 %v10223_v42  ;;  %v10281_v42 = vld [vmem:[#allocation20 + $0x8c8] ss:$48 sps:$4 sm:$0xff]  }
 0x8da   :  { %7156 = vmatpush1.bf16.msra.mxu1 %v10218_v56  ;;  %v10286_v56 = vld [vmem:[#allocation20 + $0x924] ss:$48 sps:$4 sm:$0xff]  }
 0x8db   :  { %7238 = vmatpush1.bf16.msra.mxu0 %v10221_v57  ;;  %7157 = vmatprep.subr.bf16.mxu1 %v10226_v11  ;;  %v10289_v57 = vld [vmem:[#allocation20 + $0x92c] ss:$48 sps:$4 sm:$0xff]   ;;  %v10284_v11 = vld [vmem:[#allocation20 + $0x920] ss:$48 sps:$4 sm:$0xff]  }
 0x8dc   :  { %7239 = vmatprep.subr.bf16.mxu0 %v10229_v58  ;;  %v10287_v58 = vld [vmem:[#allocation20 + $0x928] ss:$48 sps:$4 sm:$0xff]  }
 0x8de   :  { %7158 = vmatpush1.bf16.msra.mxu1 %v10224_v59  ;;  %v10292_v59 = vld [vmem:[#allocation20 + $0x984] ss:$48 sps:$4 sm:$0xff]  }
 0x8df   :  { %7240 = vmatpush1.bf16.msra.mxu0 %v10227_v60  ;;  %7159 = vmatprep.subr.bf16.mxu1 %v10232_v33  ;;  %v10295_v60 = vld [vmem:[#allocation20 + $0x98c] ss:$48 sps:$4 sm:$0xff]   ;;  %v10290_v33 = vld [vmem:[#allocation20 + $0x980] ss:$48 sps:$4 sm:$0xff]  }
 0x8e0   :  { %7241 = vmatprep.subr.bf16.mxu0 %v10235_v61  ;;  %v10293_v61 = vld [vmem:[#allocation20 + $0x988] ss:$48 sps:$4 sm:$0xff]  }
 0x8e2   :  { %7160 = vmatpush1.bf16.msra.mxu1 %v10230_v62  ;;  %v10298_v62 = vld [vmem:[#allocation20 + $0x9e4] ss:$48 sps:$4 sm:$0xff]  }
 0x8e3   :  { %7242 = vmatpush1.bf16.msra.mxu0 %v10233_v2  ;;  %7170 = vmatprep.subr.bf16.mxu1 %v10238_v34  ;;  %v10301_v2 = vld [vmem:[#allocation20 + $0x9ec] ss:$48 sps:$4 sm:$0xff]   ;;  %v10296_v34 = vld [vmem:[#allocation20 + $0x9e0] ss:$48 sps:$4 sm:$0xff]  }
 0x8e4   :  { %7252 = vmatprep.subr.bf16.mxu0 %v10241_v8  ;;  %v10299_v8 = vld [vmem:[#allocation20 + $0x9e8] ss:$48 sps:$4 sm:$0xff]  }
 0x8e5   :  { %7162 = vmatmul.mubr.bf16.vlgmr.msra.gmra.mrb[36].mxu1 %v11377_v35 }
 0x8e6   :  { %7244 = vmatmul.mubr.bf16.vlgmr.msra.gmra.mrb[40].mxu0 %v11377_v35  ;;  %7171 = vmatpush1.bf16.msra.mxu1 %v10236_v50  ;;  %v10259_v35 = vld [vmem:[#allocation20 + $0x74c] ss:$48 sps:$4 sm:$0xff]   ;;  %v10304_v50 = vld [vmem:[#allocation20 + $0xa44] ss:$48 sps:$4 sm:$0xff]  }
 0x8e7   :  { %7202 = vmatprep.mubr.bf16.mxu1 %v11381_v32  ;;  %7253 = vmatpush1.bf16.msra.mxu0 %v10239_v55  ;;  %v10307_v55 = vld [vmem:[#allocation20 + $0xa4c] ss:$48 sps:$4 sm:$0xff]  }
 0x8e8   :  { %7284 = vmatprep.mubr.bf16.mxu0 %v11381_v32  ;;  %7172 = vmatprep.subr.bf16.mxu1 %v10244_v7  ;;  %v10260_v32 = vld [vmem:[#allocation20 + $0x7a0] ss:$48 sps:$4 sm:$0xff]  }
 0x8e9   :  { %7254 = vmatprep.subr.bf16.mxu0 %v10247_v10  ;;  %v10302_v7 = vld [vmem:[#allocation20 + $0xa40] ss:$48 sps:$4 sm:$0xff]   ;;  %v10305_v10 = vld [vmem:[#allocation20 + $0xa48] ss:$48 sps:$4 sm:$0xff]  }
 0x8ea   :  { %7173 = vmatpush1.bf16.msra.mxu1 %v10242_v13  ;;  %v10310_v13 = vld [vmem:[#allocation20 + $0xaa4] ss:$48 sps:$4 sm:$0xff]  }
 0x8eb   :  { %7255 = vmatpush1.bf16.msra.mxu0 %v10245_v14  ;;  %7174 = vmatprep.subr.bf16.mxu1 %v10250_v15  ;;  %v10313_v14 = vld [vmem:[#allocation20 + $0xaac] ss:$48 sps:$4 sm:$0xff]   ;;  %v10308_v15 = vld [vmem:[#allocation20 + $0xaa0] ss:$48 sps:$4 sm:$0xff]  }
 0x8ec   :  { %7256 = vmatprep.subr.bf16.mxu0 %v10253_v23  ;;  %v10311_v23 = vld [vmem:[#allocation20 + $0xaa8] ss:$48 sps:$4 sm:$0xff]  }
 0x8ee   :  { %7175 = vmatpush1.bf16.msra.mxu1 %v10248_v25  ;;  %v10316_v25 = vld [vmem:[#allocation20 + $0xb04] ss:$48 sps:$4 sm:$0xff]  }
 0x8ef   :  { %7257 = vmatpush1.bf16.msra.mxu0 %v10251_v27  ;;  %7176 = vmatprep.subr.bf16.mxu1 %v10256_v46  ;;  %v10319_v27 = vld [vmem:[#allocation20 + $0xb0c] ss:$48 sps:$4 sm:$0xff]   ;;  %v10314_v46 = vld [vmem:[#allocation20 + $0xb00] ss:$48 sps:$4 sm:$0xff]  }
 0x8f0   :  { %7258 = vmatprep.subr.bf16.mxu0 %v10259_v35  ;;  %v10317_v35 = vld [vmem:[#allocation20 + $0xb08] ss:$48 sps:$4 sm:$0xff]  }
 0x8f2   :  { %7177 = vmatpush1.bf16.msra.mxu1 %v10254_v29  ;;  %v10322_v29 = vld [vmem:[#allocation20 + $0xb64] ss:$48 sps:$4 sm:$0xff]  }
 0x8f3   :  { %7259 = vmatpush1.bf16.msra.mxu0 %v10257_v31  ;;  %7178 = vmatprep.subr.bf16.mxu1 %v10262_v36  ;;  %v10325_v31 = vld [vmem:[#allocation20 + $0xb6c] ss:$48 sps:$4 sm:$0xff]   ;;  %v10320_v36 = vld [vmem:[#allocation20 + $0xb60] ss:$48 sps:$4 sm:$0xff]  }
 0x8f4   :  { %7260 = vmatprep.subr.bf16.mxu0 %v10265_v24  ;;  %v10323_v24 = vld [vmem:[#allocation20 + $0xb68] ss:$48 sps:$4 sm:$0xff]  }
 0x8f6   :  { %7179 = vmatpush1.bf16.msra.mxu1 %v10260_v32  ;;  %v10328_v32 = vld [vmem:[#allocation20 + $0xbc4] ss:$48 sps:$4 sm:$0xff]  }
 0x8f7   :  { %7261 = vmatpush1.bf16.msra.mxu0 %v10263_v37  ;;  %7180 = vmatprep.subr.bf16.mxu1 %v10268_v38  ;;  %v10331_v37 = vld [vmem:[#allocation20 + $0xbcc] ss:$48 sps:$4 sm:$0xff]   ;;  %v10326_v38 = vld [vmem:[#allocation20 + $0xbc0] ss:$48 sps:$4 sm:$0xff]  }
 0x8f8   :  { %v11406_v48 = vpop.f32.mrb[28].mxu1  ;;  %v11408_v49 = vpop.f32.mrb[32].mxu0  ;;  %7262 = vmatprep.subr.bf16.mxu0 %v10271_v12  ;;  %v10329_v12 = vld [vmem:[#allocation20 + $0xbc8] ss:$48 sps:$4 sm:$0xff]  }
 0x8f9   :  { %v11410_v1 = vpop.f32.mrb[29].mxu1  ;;  %v11412_v4 = vpop.f32.mrb[33].mxu0 }
 0x8fa   :  { %v6880_v3 = vpop.f32.mrb[30].mxu1  ;;  %v6962_v51 = vpop.f32.mrb[34].mxu0  ;;  %7181 = vmatpush1.bf16.msra.mxu1 %v10266_v6  ;;  %v10332_v6 = vld [vmem:[#allocation23 + $0x40] sm:$0xff]  }
 0x8fb   :  { %7263 = vmatpush1.bf16.msra.mxu0 %v10269_v45  ;;  %v6881_v30 = vpop.f32.mrb[31].mxu1  ;;  %v6963_v44 = vpop.f32.mrb[35].mxu0  ;;  %7182 = vmatprep.subr.bf16.mxu1 %v10274_v47  ;;  %v10333_v45 = vld [vmem:[#allocation23 + $0xc0] sm:$0xff]   ;;  %v10336_v3 = vld [vmem:[#allocation23 + $0x48] sm:$0xff]  }
 0x8fc   :  { %7264 = vmatprep.subr.bf16.mxu0 %v10277_v63  ;;  %v10334_v47 = vld [vmem:[#allocation23] sm:$0xff]   ;;  %v10337_v51 = vld [vmem:[#allocation23 + $0xc8] sm:$0xff]   ;;  %v10340_v44 = vld [vmem:[#allocation23 + $0x50] sm:$0xff]  }
 0x8fd   :  { %v10335_v63 = vld [vmem:[#allocation23 + $0x80] sm:$0xff]   ;;  %v10339_v30 = vld [vmem:[#allocation23 + $0x88] sm:$0xff]  }
 0x8fe   :  { %7183 = vmatpush1.bf16.msra.mxu1 %v10272_v43  ;;  %v10338_v43 = vld [vmem:[#allocation23 + $0x8] sm:$0xff]  }
 0x8ff   :  { %7265 = vmatpush1.bf16.msra.mxu0 %v10275_v52  ;;  %7184 = vmatprep.subr.bf16.mxu1 %v10280_v54  ;;  %v10341_v52 = vld [vmem:[#allocation23 + $0xd0] sm:$0xff]  }
 0x900   :  { %7266 = vmatprep.subr.bf16.mxu0 %v10283_v9  ;;  %v10342_v54 = vld [vmem:[#allocation23 + $0x10] sm:$0xff]  }
 0x901   :  { %v10343_v9 = vld [vmem:[#allocation23 + $0x90] sm:$0xff]  }
 0x902   :  { %7185 = vmatpush1.bf16.msra.mxu1 %v10278_v41  ;;  %v10344_v41 = vld [vmem:[#allocation23 + $0x58] sm:$0xff]  }
 0x903   :  { %7267 = vmatpush1.bf16.msra.mxu0 %v10281_v42  ;;  %7186 = vmatprep.subr.bf16.mxu1 %v10286_v56  ;;  %v10345_v42 = vld [vmem:[#allocation23 + $0xd8] sm:$0xff]  }
 0x904   :  { %7268 = vmatprep.subr.bf16.mxu0 %v10289_v57  ;;  %v10346_v56 = vld [vmem:[#allocation23 + $0x18] sm:$0xff]   ;;  %v10348_v57 = vld [vmem:[#allocation23 + $0x60] sm:$0xff]  }
 0x906   :  { %7187 = vmatpush1.bf16.msra.mxu1 %v10284_v11  ;;  %v10349_v11 = vld [vmem:[#allocation23 + $0xe0] sm:$0xff]  }
 0x907   :  { %7269 = vmatpush1.bf16.msra.mxu0 %v10287_v58  ;;  %7188 = vmatprep.subr.bf16.mxu1 %v10292_v59  ;;  %v10350_v58 = vld [vmem:[#allocation23 + $0x20] sm:$0xff]  }
 0x908   :  { %7270 = vmatprep.subr.bf16.mxu0 %v10295_v60  ;;  %v10351_v59 = vld [vmem:[#allocation23 + $0xa0] sm:$0xff]   ;;  %v4817_v60 = vld [vmem:[#allocation22] sm:$0xff] }
 0x90a   :  { %7189 = vmatpush1.bf16.msra.mxu1 %v10290_v33  ;;  %v4824_v33 = vrot.slane %v4817_v60, %v11242_v17 }
 0x90b   :  { %7271 = vmatpush1.bf16.msra.mxu0 %v10293_v61  ;;  %7190 = vmatprep.subr.bf16.mxu1 %v10298_v62  ;;  %v4832_v61 = vrot.slane %v4817_v60, %v11202_v26  ;;  %v4828_v62 = vrot.slane %v4817_v60, %v11248_v20 }
 0x90c   :  { %7272 = vmatprep.subr.bf16.mxu0 %v10301_v2  ;;  %v4836_v2 = vrot.slane %v4817_v60, %v11239_v16 }
 0x90e   :  { %7191 = vmatpush1.bf16.msra.mxu1 %v10296_v34  ;;  %v4840_v34 = vrot.slane %v4817_v60, %v11251_v21  ;;  %v10353_v21 = vld [vmem:[#allocation23 + $0xe8] sm:$0xff]  }
 0x90f   :  { %7273 = vmatpush1.bf16.msra.mxu0 %v10299_v8  ;;  %7192 = vmatprep.subr.bf16.mxu1 %v10304_v50  ;;  %v8922_v8 = vadd.f32 %v11406_v48, %v4824_v33  ;;  %v4848_v50 = vrot.slane %v4817_v60, %v11217_v40 }
 0x910   :  { %7274 = vmatprep.subr.bf16.mxu0 %v10307_v55  ;;  %v4844_v55 = vrot.slane %v4817_v60, %v11254_v22 }
 0x911   :  { %v7293_v48 = vmul.f32 %v8922_v8, %v11274_v39 }
 0x912   :  { %7193 = vmatpush1.bf16.msra.mxu1 %v10302_v7  ;;  %v8924_v7 = vadd.f32 %v11408_v49, %v4832_v61  ;;  %v10355_v49 = vld [vmem:[#allocation23 + $0xa8] sm:$0xff]  }
 0x913   :  { %7275 = vmatpush1.bf16.msra.mxu0 %v10305_v10  ;;  %7194 = vmatprep.subr.bf16.mxu1 %v10310_v13  ;;  %v4852_v10 = vrot.slane %v4817_v60, %v11245_v18  ;;  %v8923_v13 = vadd.f32 %v11410_v1, %v4828_v62 }
 0x914   :  { %7276 = vmatprep.subr.bf16.mxu0 %v10313_v14  ;;  %v7295_v18 = vmul.f32 %v8924_v7, %v11274_v39 }
 0x916   :  { %7195 = vmatpush1.bf16.msra.mxu1 %v10308_v15  ;;  %v8925_v15 = vadd.f32 %v11412_v4, %v4836_v2 }
 0x917   :  { %7277 = vmatpush1.bf16.msra.mxu0 %v10311_v23  ;;  %7196 = vmatprep.subr.bf16.mxu1 %v10316_v25 }
 0x918   :  { %7278 = vmatprep.subr.bf16.mxu0 %v10319_v27 }
 0x91a   :  { %7197 = vmatpush1.bf16.msra.mxu1 %v10314_v46  ;;  %v10352_v46 = vld [vmem:[#allocation23 + $0x68] sm:$0xff]  }
 0x91b   :  { %7279 = vmatpush1.bf16.msra.mxu0 %v10317_v35  ;;  %7198 = vmatprep.subr.bf16.mxu1 %v10322_v29 }
 0x91c   :  { %7280 = vmatprep.subr.bf16.mxu0 %v10325_v31  ;;  %v10354_v31 = vld [vmem:[#allocation23 + $0x28] sm:$0xff]  }
 0x91e   :  { %7199 = vmatpush1.bf16.msra.mxu1 %v10320_v36 }
 0x91f   :  { %7281 = vmatpush1.bf16.msra.mxu0 %v10323_v24  ;;  %7200 = vmatprep.subr.bf16.mxu1 %v10328_v32  ;;  %v7294_v32 = vmul.f32 %v8923_v13, %v11274_v39 }
 0x920   :  { %7282 = vmatprep.subr.bf16.mxu0 %v10331_v37 }
 0x922   :  { %7201 = vmatpush1.bf16.msra.mxu1 %v10326_v38 }
 0x923   :  { %7283 = vmatpush1.bf16.msra.mxu0 %v10329_v12  ;;  %8777 = vmatprep.subr.bf16.mxu1 %v10332_v6  ;;  %v7296_v6 = vmul.f32 %v8925_v15, %v11274_v39 }
 0x924   :  { %8799 = vmatprep.subr.bf16.mxu0 %v10333_v45 }
 0x925   :  { %7203 = vmatmul.mubr.bf16.vlgmr.msra.gmra.mrb[36].mxu1 %v11388_v5 }
 0x926   :  { %7285 = vmatmul.mubr.bf16.vlgmr.msra.gmra.mrb[40].mxu0 %v11388_v5  ;;  %8778 = vmatpush3.bf16.msra.mxu1 %v10334_v47  ;;  %v10347_v5 = vld [vmem:[#allocation23 + $0x98] sm:$0xff]  }
 0x927   :  { %8800 = vmatpush3.bf16.msra.mxu0 %v10335_v63  ;;  %8779 = vmatprep.subr.bf16.mxu1 %v10336_v3  ;;  %v10356_v63 = vld [vmem:[#allocation23 + $0x70] sm:$0xff]  }
 0x928   :  { %8801 = vmatprep.subr.bf16.mxu0 %v10337_v51  ;;  %v10357_v3 = vld [vmem:[#allocation23 + $0xf0] sm:$0xff]  }
 0x92a   :  { %8780 = vmatpush3.bf16.msra.mxu1 %v10338_v43 }
 0x92b   :  { %8802 = vmatpush3.bf16.msra.mxu0 %v10339_v30  ;;  %8781 = vmatprep.subr.bf16.mxu1 %v10340_v44  ;;  %v10358_v30 = vld [vmem:[#allocation23 + $0x30] sm:$0xff]  }
 0x92c   :  { %8803 = vmatprep.subr.bf16.mxu0 %v10341_v52  ;;  %v10359_v44 = vld [vmem:[#allocation23 + $0xb0] sm:$0xff]  }
 0x92e   :  { %8782 = vmatpush3.bf16.msra.mxu1 %v10342_v54  ;;  %v10360_v54 = vld [vmem:[#allocation23 + $0x78] sm:$0xff]  }
 0x92f   :  { %8804 = vmatpush3.bf16.msra.mxu0 %v10343_v9  ;;  %8783 = vmatprep.subr.bf16.mxu1 %v10344_v41  ;;  %v10361_v9 = vld [vmem:[#allocation23 + $0xf8] sm:$0xff]  }
 0x930   :  { %8805 = vmatprep.subr.bf16.mxu0 %v10345_v42  ;;  %v10362_v41 = vld [vmem:[#allocation23 + $0x38] sm:$0xff]  }
 0x931   :  { %v10363_v42 = vld [vmem:[#allocation23 + $0xb8] sm:$0xff]  }
 0x932   :  { %8784 = vmatpush3.bf16.msra.mxu1 %v10346_v56  ;;  %v4818_v56 = vld [vmem:[#allocation22 + $0x8] sm:$0xf] }
 0x933   :  { %8806 = vmatpush3.bf16.msra.mxu0 %v10347_v5  ;;  %8785 = vmatprep.subr.bf16.mxu1 %v10348_v57  ;;  %v4856_v5 = vrot.slane %v4818_v56, %v11242_v17  ;;  %v4864_v57 = vrot.slane %v4818_v56, %v11202_v26 }
 0x934   :  { %8807 = vmatprep.subr.bf16.mxu0 %v10349_v11  ;;  %v4860_v11 = vrot.slane %v4818_v56, %v11248_v20 }
 0x936   :  { %8786 = vmatpush3.bf16.msra.mxu1 %v10350_v58  ;;  %v4868_v58 = vrot.slane %v4818_v56, %v11239_v16 }
 0x937   :  { %8808 = vmatpush3.bf16.msra.mxu0 %v10351_v59  ;;  %8787 = vmatprep.subr.bf16.mxu1 %v10352_v46 }
 0x938   :  { %8809 = vmatprep.subr.bf16.mxu0 %v10353_v21 }
 0x93a   :  { %8788 = vmatpush3.bf16.msra.mxu1 %v10354_v31  ;;  %v10365_v31 = vld [vmem:[#allocation26 + $0x8] sm:$0xff]  }
 0x93b   :  { %8810 = vmatpush3.bf16.msra.mxu0 %v10355_v49  ;;  %8789 = vmatprep.subr.bf16.mxu1 %v10356_v63  ;;  %v10366_v49 = vld [vmem:[#allocation26 + $0x10] sm:$0xff]  }
 0x93c   :  { %8811 = vmatprep.subr.bf16.mxu0 %v10357_v3 }
 0x93e   :  { %8790 = vmatpush3.bf16.msra.mxu1 %v10358_v30 }
 0x93f   :  { %8812 = vmatpush3.bf16.msra.mxu0 %v10359_v44  ;;  %8791 = vmatprep.subr.bf16.mxu1 %v10360_v54 }
 0x940   :  { %8813 = vmatprep.subr.bf16.mxu0 %v10361_v9 }
 0x942   :  { %8792 = vmatpush3.bf16.msra.mxu1 %v10362_v41 }
 0x943   :  { %8814 = vmatpush3.bf16.msra.mxu0 %v10363_v42  ;;  %8890 = vmatprep.subr.bf16.mxu1 %v10818_v0 }
 0x978   :  { %v7040_v14 = vpop.f32.mrb[32].mxu1 }
 0x979   :  { %v8926_v23 = vadd.f32 %v7040_v14, %v4840_v34  ;;  %v7122_v25 = vpop.f32.mrb[36].mxu0  ;;  %v7042_v27 = vpop.f32.mrb[33].mxu1 }
 0x97a   :  { %v8928_v35 = vadd.f32 %v7122_v25, %v4848_v50  ;;  %v8927_v40 = vadd.f32 %v7042_v27, %v4844_v55  ;;  %v7124_v29 = vpop.f32.mrb[37].mxu0  ;;  %v7044_v22 = vpop.f32.mrb[34].mxu1 }
 0x97b   :  { %v7297_v1 = vmul.f32 %v8926_v23, %v11285_v28  ;;  %v8929_v36 = vadd.f32 %v7124_v29, %v4852_v10  ;;  %v7126_v24 = vpop.f32.mrb[38].mxu0  ;;  %v7045_v4 = vpop.f32.mrb[35].mxu1 }
 0x97c   :  { %v7299_v37 = vmul.f32 %v8928_v35, %v11285_v28  ;;  %v7298_v38 = vmul.f32 %v8927_v40, %v11285_v28  ;;  %v7127_v12 = vpop.f32.mrb[39].mxu0  ;;  %v10364_v35 = vld [vmem:[#allocation26] sm:$0xff]   ;;  %v10370_v24 = vld [vmem:[#allocation26 + $0x30] sm:$0xff]   ;;  %v10371_v4 = vld [vmem:[#allocation26 + $0x38] sm:$0xff]  }
 0x97d   :  { %v7301_v45 = vadd.f32 %v7297_v1, %v7293_v48  ;;  %v7300_v47 = vmul.f32 %v8929_v36, %v11285_v28  ;;  %v10368_v1 = vld [vmem:[#allocation26 + $0x20] sm:$0xff]   ;;  %v10369_v36 = vld [vmem:[#allocation26 + $0x28] sm:$0xff]   ;;  %v8709_v12 = vld [vmem:[#allocation25] ss:$0 sm:$0xff] }
 0x97e   :  { %v7303_v51 = vadd.f32 %v7299_v37, %v7295_v18  ;;  %v7302_v43 = vadd.f32 %v7298_v38, %v7294_v32  ;;  %v10367_v18 = vld [vmem:[#allocation26 + $0x18] sm:$0xff]   ;;  %v7665_v32 = vand.u32 127, %v731_v19 }
 0x97f   :  { %v7304_v52 = vadd.f32 %v7300_v47, %v7296_v6 }
 0x980   :  { %vm7668_vm3 = vcmp.lt.s32.totalorder %v7665_v32, 24  ;;  %vm7667_vm4 = vcmp.lt.s32.totalorder %v7665_v32, 16  ;;  %vm7666_vm5 = vcmp.lt.s32.totalorder %v7665_v32, 8 }
 0x9f8   :  { %v7204_v59 = vpop.f32.mrb[36].mxu1 }
 0x9f9   :  { %v8930_v60 = vadd.f32 %v7204_v59, %v4856_v5  ;;  %v7286_v33 = vpop.f32.mrb[40].mxu0  ;;  %v7206_v61 = vpop.f32.mrb[37].mxu1 }
 0x9fa   :  { %v8932_v62 = vadd.f32 %v7286_v33, %v4864_v57  ;;  %v8931_v2 = vadd.f32 %v7206_v61, %v4860_v11  ;;  %v7288_v34 = vpop.f32.mrb[41].mxu0  ;;  %v7208_v8 = vpop.f32.mrb[38].mxu1 }
 0x9fb   :  { %v7305_v50 = vmul.f32 %v8930_v60, %v11283_v53  ;;  %v8933_v55 = vadd.f32 %v7288_v34, %v4868_v58  ;;  %v7290_v7 = vpop.f32.mrb[42].mxu0  ;;  %v7209_v10 = vpop.f32.mrb[39].mxu1 }
 0x9fc   :  { %v7307_v17 = vmul.f32 %v8932_v62, %v11283_v53  ;;  %v7306_v26 = vmul.f32 %v8931_v2, %v11283_v53  ;;  %v7291_v20 = vpop.f32.mrb[43].mxu0 }
 0x9fd   :  { %v7309_v13 = vadd.f32 %v7305_v50, %v7301_v45  ;;  %v7308_v16 = vmul.f32 %v8933_v55, %v11283_v53 }
 0x9fe   :  { %v7311_v14 = vadd.f32 %v7307_v17, %v7303_v51  ;;  %v7310_v15 = vadd.f32 %v7306_v26, %v7302_v43  ;;  %v7669_v51 = vsel %vm7668_vm3, %v11283_v53, 0.0 }
 0x9ff   :  { %v7313_v23 = vmax.f32 %v7309_v13, 0.0  ;;  %v7312_v25 = vadd.f32 %v7308_v16, %v7304_v52 }
 0xa00   :  { %v7315_v27 = vmax.f32 %v7311_v14, 0.0  ;;  %v7314_v46 = vmax.f32 %v7310_v15, 0.0 }
 0xa01   :  { %v7316_v21 = vmax.f32 %v7312_v25, 0.0  ;;  %v7317_v40 = vpack.c.bf16 %v7313_v23, %v7313_v23 }
 0xa02   :  { %v7318_v48 = vpack.c.bf16 %v7314_v46, %v7314_v46  ;;  %v7319_v22 = vpack.c.bf16 %v7315_v27, %v7315_v27 }
 0xa03   :  { %v7320_v29 = vpack.c.bf16 %v7316_v21, %v7316_v21 }
 0xa04   :  { %7616 = vmatprep.mubr.bf16.mxu1 %v7318_v48 }
 0xa05   :  { %7656 = vmatprep.mubr.bf16.mxu0 %v7320_v29  ;;  %7617 = vmatmul.mubr.bf16.vlgmr.msra.gmra.mrb[40].mxu1 %v7317_v40 }
 0xa06   :  { %7657 = vmatmul.mubr.bf16.vlgmr.msra.gmra.mrb[44].mxu0 %v7319_v22  ;;  %8891 = vmatpush3.bf16.msra.mxu1 %v10364_v35 }
 0xa07   :  { %8892 = vmatprep.subr.bf16.mxu1 %v10818_v0  ;;  %8906 = vmatprep.mubr.msk.bf16.mxu1 %vm10819_vm0, %v10818_v0 }
 0xa0a   :  { %8893 = vmatpush3.bf16.msra.mxu1 %v10365_v31 }
 0xa0b   :  { %8894 = vmatprep.subr.bf16.mxu1 %v10818_v0 }
 0xa0e   :  { %8895 = vmatpush3.bf16.msra.mxu1 %v10366_v49 }
 0xa0f   :  { %8896 = vmatprep.subr.bf16.mxu1 %v10818_v0 }
 0xa12   :  { %8897 = vmatpush3.bf16.msra.mxu1 %v10367_v18 }
 0xa13   :  { %8898 = vmatprep.subr.bf16.mxu1 %v10818_v0 }
 0xa16   :  { %8899 = vmatpush3.bf16.msra.mxu1 %v10368_v1 }
 0xa17   :  { %8900 = vmatprep.subr.bf16.mxu1 %v10818_v0 }
 0xa1a   :  { %8901 = vmatpush3.bf16.msra.mxu1 %v10369_v36 }
 0xa1b   :  { %8902 = vmatprep.subr.bf16.mxu1 %v10818_v0 }
 0xa1e   :  { %8903 = vmatpush3.bf16.msra.mxu1 %v10370_v24 }
 0xa1f   :  { %8904 = vmatprep.subr.bf16.mxu1 %v10818_v0  ;;  %v7670_v0 = vsel %vm7667_vm4, %v11285_v28, %v7669_v51 }
 0xa20   :  { %v7671_v54 = vsel %vm7666_vm5, %v11274_v39, %v7670_v0 }
 0xa22   :  { %8905 = vmatpush3.bf16.msra.mxu1 %v10371_v4 }
 0xad8   :  { %v8793_v37 = vpop.f32.mrb[40].mxu1 }
 0xad9   :  { %v8815_v38 = vpop.f32.mrb[44].mxu0  ;;  %v8794_v6 = vpop.f32.mrb[41].mxu1 }
 0xada   :  { %v8795_v45 = vadd.f32 %v8794_v6, %v8793_v37  ;;  %v8816_v47 = vpop.f32.mrb[45].mxu0  ;;  %v8796_v63 = vpop.f32.mrb[42].mxu1 }
 0xadb   :  { %v8817_v3 = vadd.f32 %v8816_v47, %v8815_v38  ;;  %v8818_v43 = vpop.f32.mrb[46].mxu0  ;;  %v8797_v30 = vpop.f32.mrb[43].mxu1 }
 0xadc   :  { %v7619_v44 = vadd.f32 %v8795_v45, %v8709_v12  ;;  %v8819_v52 = vpop.f32.mrb[47].mxu0 }
 0xade   :  { %v7659_v19 = vadd.f32 %v8817_v3, %v7619_v44 }
 0xae0   :  { %v7672_v9 = vmul.f32 %v7671_v54, %v7659_v19 }
 0xae2   :  { %v7673_v41 = vpack.c.bf16 %v7672_v9, %v7672_v9 }
 0xae4   :  { %8907 = vmatmul.mubr.bf16.vlgmr.msra.gmra.mrb[44].mxu1 %v7673_v41 }
 0xae5   :  { %10743 = shalt.err (!%p10740_p6)
}
 0xae6   :  { %s11510_s0 = sld [smem:[#allocation45_spill]] }
 0xaec   :  { %s10744_s6 = scalar_lea.hbm %s11510_s0, 128 }
 0xaed   :  { %p10745_p7 = scmp.ne.s32.totalorder %s11510_s0, %s10744_s6  ;;  %p10748_p8 = scmp.lt.u32.totalorder %s10744_s6, %s11510_s0 }
 0xaef   :  { %p10750_p9 = pnand %p10748_p8, %p10745_p7 }
 0xaf1   :  { %10753 = shalt.err (!%p10750_p9)
}
 0xaf2   :  { %7798 = dma.vmem_to_hbm [thread:$0]  %s7796_s20, 128, %s11510_s0, [#allocation30]  }
 0xaf3   :  { %s10824_s23 = smov [#allocation28]  }
 0xaf4   :  { %s7785_s9 = sshll.u32 %s10824_s23, 4  ;;  %s7786_s9 = int_to_ptr.vmem [resolvable:$true] %s7785_s9 }
 0xaf5   :  { %s10754_s3 = scalar_lea.vmem %s7786_s9, 128  ;;  %p10759_p11 = scmp.lt.s32.totalorder %s7786_s9, %s7786_s9 }
 0xaf6   :  { %p10755_p10 = scmp.ne.s32.totalorder %s7786_s9, %s10754_s3  ;;  %p10760_p12 = scmp.lt.s32.totalorder %s10754_s3, %s10754_s3 }
 0xaf8   :  { %p10761_p13 = por %p10760_p12, %p10759_p11 }
 0xafa   :  { %p10762_p0 = pnand %p10761_p13, %p10755_p10 }
 0xbb7   :  { %v7772_v39 = vpop.f32.mrb[44].mxu1 }
 0xbb8   :  { %7778 = vst [vmem:[#allocation28] sm:$0xff] %v7772_v39  ;;  %v8908_v53 = vpop.f32.mrb[45].mxu1 }
 0xbb9   :  { %v7775_v28 = vpop.f32.mrb[46].mxu1 }
 0xbba   :  { %10765 = shalt.err (!%p10762_p0)
}
 0xbbb   :  { %s11511_s28 = sld [smem:[#allocation44_spill]] }
 0xbc1   :  { %s10766_s18 = scalar_lea.hbm %s11511_s28, 128 }
 0xbc2   :  { %p10767_p1 = scmp.ne.s32.totalorder %s11511_s28, %s10766_s18  ;;  %p10770_p2 = scmp.lt.u32.totalorder %s10766_s18, %s11511_s28 }
 0xbc4   :  { %p10772_p3 = pnand %p10770_p2, %p10767_p1 }
 0xbc6   :  { %10775 = shalt.err (!%p10772_p3)
}
 0xbc7   :  { %7788 = dma.vmem_to_hbm [thread:$0]  %s7786_s9, 128, %s11511_s28, [#allocation4]   ;;  %v8909_v42 = vpop.f32.mrb[47].mxu1 }
 0xbc8   :  { %10794 = dma.done.wait [#allocation4], 128  }
 0xbc9   :  { %10795 = vsyncadd [#allocation4], 4294967168 }
 0xbca   :  { %10796 = dma.done.wait [#allocation30], 128  }
 0xbcb   :  { %10797 = vsyncadd [#allocation30], 4294967168 }
 0xbcc   :  { %7805 = vsyncpa [#allocation3], 1 }
 0xbcd   :  { %7806 = vsyncpa [#allocation6], 1 }
 0xbce   :  { %7807 = vsyncpa [#allocation9], 1 }
 0xbcf   :  { %7808 = vsyncpa [#allocation12], 1 }
 0xbd0   :  { %7809 = vsyncpa [#allocation15], 1 }
 0xbd1   :  { %7810 = vsyncpa [#allocation18], 1 }
 0xbd2   :  { %7811 = vsyncpa [#allocation21], 1 }
 0xbd3   :  { %7812 = vsyncpa [#allocation24], 1 }
 0xbd4   :  { %7813 = vsyncpa [#allocation27], 1 }
 0xbd5   :  { %7814 = vsyncpa [#allocation4], 1 }
 0xbd6   :  { %7815 = vsyncpa [#allocation30], 1 }

</bundles_post_ra>
